<compile_context>
chip_gen: v7x
topology: tpu7x:2x2x1
jax: 0.10.0
libtpu: 0.0.40
codegen_flags: <defaults>
</compile_context>

<pallas_src>
import functools
import math

import jax
import jax.numpy as jnp
from jax.experimental import pallas as pl
from jax.experimental.pallas import tpu as pltpu

_HI = jax.lax.Precision.HIGHEST


def _transformer_block_kernel(
    x_ref,       # (B_t, C, S)   activation slab for this batch tile
    lin_wt_ref,  # (C, C)        block-level Linear weight, pre-transposed (compute dt)
    lin_b_ref,   # (1, C)        block-level Linear bias (f32)
    wq_ref,      # (1, C, C)     fused q weight (q-Linear . in_proj_q, scale folded)
    bq_ref,      # (1, 1, C)     fused q bias (scale folded, f32)
    wk_ref, bk_ref,
    wv_ref, bv_ref,
    ow_ref,      # (1, C, C)     out_proj weight, pre-transposed
    ob_ref,      # (1, 1, C)     out_proj bias (f32)
    mlp_ref,     # (1, C, C)     fused fc1^T @ fc2^T
    o_ref,       # (B_t, C, S)
    p_scr,       # (B_t*S, C) f32  activations carried across the layer grid axis
    ctx_scr,     # (B_t*S, C) f32  per-head attention contexts
    *,
    num_heads,
    compute_dtype,
):
    l = pl.program_id(1)
    B_t, C, S = x_ref.shape
    D = C // num_heads
    cdt = compute_dtype

    # ---- layer 0 only: (C,S) -> (S,C) layout change in VMEM + positional Linear ----
    @pl.when(l == 0)
    def _init():
        for bt in range(B_t):
            p_scr[bt * S:(bt + 1) * S, :] = x_ref[bt].T.astype(jnp.float32)
        p0 = p_scr[...]
        p_scr[...] = (p0
                      + jnp.dot(p0.astype(cdt), lin_wt_ref[...],
                                preferred_element_type=jnp.float32)
                      + lin_b_ref[...])

    p = p_scr[...]                       # (B_t*S, C) f32
    pm = p.astype(cdt)

    # ---- fused q/k/v projections (q-Linear + MHA in_proj pre-multiplied) ----
    q2 = jnp.dot(pm, wq_ref[0], preferred_element_type=jnp.float32) + bq_ref[0]
    k2 = jnp.dot(pm, wk_ref[0], preferred_element_type=jnp.float32) + bk_ref[0]
    v2 = jnp.dot(pm, wv_ref[0], preferred_element_type=jnp.float32) + bv_ref[0]

    # ---- per-batch-element, per-head attention; contexts go into ctx_scr ----
    for bt in range(B_t):                # small static unroll
        row = slice(bt * S, (bt + 1) * S)
        qb = q2[row, :].astype(cdt)      # (S, C)
        kbT = k2[row, :].T.astype(cdt)   # (C, S): one transpose per (layer, batch elem)
        vb = v2[row, :].astype(cdt)      # (S, C)
        for h in range(num_heads):       # small static unroll
            cs = slice(h * D, (h + 1) * D)
            sc = jnp.dot(qb[:, cs], kbT[cs, :],
                         preferred_element_type=jnp.float32)        # (S, S)
            sc = sc - jnp.max(sc, axis=-1, keepdims=True)
            e = jnp.exp(sc)
            a = e * pl.reciprocal(jnp.sum(e, axis=-1, keepdims=True), approx=True)
            ctx_scr[row, cs] = jnp.dot(a.astype(cdt), vb[:, cs],
                                       preferred_element_type=jnp.float32)

    # ---- single K=C out-projection over the whole batch tile + residual ----
    attn = jnp.dot(ctx_scr[...].astype(cdt), ow_ref[0],
                   preferred_element_type=jnp.float32) + ob_ref[0]
    p = attn + p

    # ---- fused MLP (fc2 . fc1 pre-multiplied) + residual ----
    p = jnp.dot(p.astype(cdt), mlp_ref[0], preferred_element_type=jnp.float32) + p
    p_scr[...] = p

    # ---- last layer only: (S,C) -> (C,S) in VMEM and write the output slab ----
    @pl.when(l == pl.num_programs(1) - 1)
    def _finalize():
        for bt in range(B_t):
            o_ref[bt] = p[bt * S:(bt + 1) * S, :].T.astype(o_ref.dtype)


def _pick_batch_tile(B, S):
    """Smallest divisor of B giving an MXU-friendly M = bt*S >= 128 (keeps the batch
    grid axis as long as possible for megacore)."""
    for bt in range(1, B + 1):
        if B % bt == 0 and bt * S >= 128:
            return bt
    return B


def transformer_block_pallas(x_nchw, params, num_heads, *,
                             compute_dtype=jnp.bfloat16, batch_tile=None):
    """Equivalent of TransformerBlock.forward for a c1 == c2 configuration."""
    B, C, W, H = x_nchw.shape
    S = W * H
    layers = params["layers"]
    L = len(layers)
    assert C == params["lin_w"].shape[0], "c1 != c2 (Conv stem) not supported"
    assert C % num_heads == 0
    D = C // num_heads
    scale = 1.0 / math.sqrt(D)

    if batch_tile is None:
        batch_tile = _pick_batch_tile(B, S)
    assert B % batch_tile == 0
    B_t = batch_tile

    # Free (contiguous) reshape: (B, C, W, H) -> (B, C, S).  No HBM transpose here.
    x2 = x_nchw.reshape(B, C, S)

    # One-time wrapper-side weight fusion / transposition (exact algebra, f32 HIGHEST).
    mm = lambda a, b: jnp.dot(a, b, precision=_HI)
    lin_wt = params["lin_w"].T.astype(compute_dtype)
    lin_b = params["lin_b"].reshape(1, C).astype(jnp.float32)

    wq_f, bq_f, wk_f, bk_f, wv_f, bv_f, ow, ob, mlp_w = ([] for _ in range(9))
    for lp in layers:
        iw, ib = lp["in_w"], lp["in_b"]
        wq_f.append(scale * mm(lp["wq"].T, iw[:C].T))        # scale & q-bias folded
        bq_f.append(scale * ib[:C].reshape(1, C))
        wk_f.append(mm(lp["wk"].T, iw[C:2 * C].T))
        bk_f.append(ib[C:2 * C].reshape(1, C))
        wv_f.append(mm(lp["wv"].T, iw[2 * C:].T))
        bv_f.append(ib[2 * C:].reshape(1, C))
        ow.append(lp["out_w"].T)
        ob.append(lp["out_b"].reshape(1, C))
        mlp_w.append(mm(lp["fc1"].T, lp["fc2"].T))           # fc2(fc1(p)) fused

    stack_w = lambda xs: jnp.stack(xs).astype(compute_dtype)     # MXU operands
    stack_b = lambda xs: jnp.stack(xs).astype(jnp.float32)       # VPU adds stay f32
    wq_s, wk_s, wv_s = stack_w(wq_f), stack_w(wk_f), stack_w(wv_f)
    ow_s, mlp_s = stack_w(ow), stack_w(mlp_w)
    bq_s, bk_s, bv_s, ob_s = stack_b(bq_f), stack_b(bk_f), stack_b(bv_f), stack_b(ob)

    const_spec = lambda a: pl.BlockSpec(a.shape, lambda b, l: (0,) * a.ndim)
    layer_w_spec = pl.BlockSpec((1, C, C), lambda b, l: (l, 0, 0))
    layer_b_spec = pl.BlockSpec((1, 1, C), lambda b, l: (l, 0, 0))

    # Advisory cost estimate for XLA's scheduler.
    wsz = jnp.dtype(compute_dtype).itemsize
    flops = 2 * B * S * C * C * (1 + 5 * L) + 4 * B * L * S * S * C
    transc = B * L * num_heads * S * S
    bytes_acc = (2 * B * C * S * x_nchw.dtype.itemsize
                 + C * C * wsz + C * 4
                 + L * (5 * C * C * wsz + 4 * C * 4))

    out = pl.pallas_call(
        functools.partial(_transformer_block_kernel,
                          num_heads=num_heads, compute_dtype=compute_dtype),
        out_shape=jax.ShapeDtypeStruct((B, C, S), x_nchw.dtype),
        grid=(B // B_t, L),
        in_specs=[
            pl.BlockSpec((B_t, C, S), lambda b, l: (b, 0, 0)),   # resident across l
            const_spec(lin_wt), const_spec(lin_b),
            layer_w_spec, layer_b_spec,        # fused q
            layer_w_spec, layer_b_spec,        # fused k
            layer_w_spec, layer_b_spec,        # fused v
            layer_w_spec, layer_b_spec,        # out_proj
            layer_w_spec,                      # fused MLP
        ],
        out_specs=pl.BlockSpec((B_t, C, S), lambda b, l: (b, 0, 0)),
        scratch_shapes=[
            pltpu.VMEM((B_t * S, C), jnp.float32),   # p carried across layers
            pltpu.VMEM((B_t * S, C), jnp.float32),   # per-head contexts
        ],
        compiler_params=pltpu.CompilerParams(
            dimension_semantics=("parallel", "arbitrary")),
        cost_estimate=pl.CostEstimate(flops=flops, transcendentals=transc,
                                      bytes_accessed=bytes_acc),
    )(x2, lin_wt, lin_b, wq_s, bq_s, wk_s, bk_s, wv_s, bv_s, ow_s, ob_s, mlp_s)

    # TODO(synk): the c1 != c2 Conv(1x1)+BatchNorm+SiLU stem of TransformerBlock is not
    # implemented; this wrapper covers the c1 == c2 configuration only.
    return out.reshape(B, C, W, H)


def _make_params(key, c, num_layers, scale=0.1):
    """Deterministic random weights matching the PyTorch module's parameter shapes."""
    keys = jax.random.split(key, 2 + num_layers * 9)
    it = iter(keys)

    def w(shape):
        return scale * jax.random.normal(next(it), shape, dtype=jnp.float32)

    params = {"lin_w": w((c, c)), "lin_b": w((c,)), "layers": []}
    for _ in range(num_layers):
        params["layers"].append({
            "wq": w((c, c)), "wk": w((c, c)), "wv": w((c, c)),
            "in_w": w((3 * c, c)), "in_b": w((3 * c,)),
            "out_w": w((c, c)), "out_b": w((c,)),
            "fc1": w((c, c)), "fc2": w((c, c)),
        })
    return params


def _reference_transformer_block(x, params, num_heads):
    """Pure-JAX reference mirroring the PyTorch forward (correctness check only)."""
    B, C, W, H = x.shape
    S = W * H
    D = C // num_heads

    p = jnp.transpose(x.reshape(B, C, S), (2, 0, 1))            # (S, B, C)
    p = p + jnp.dot(p, params["lin_w"].T, precision=_HI) + params["lin_b"]

    for lp in params["layers"]:
        q = jnp.dot(p, lp["wq"].T, precision=_HI)
        k = jnp.dot(p, lp["wk"].T, precision=_HI)
        v = jnp.dot(p, lp["wv"].T, precision=_HI)

        iw, ib = lp["in_w"], lp["in_b"]
        q2 = jnp.dot(q, iw[:C].T, precision=_HI) + ib[:C]
        k2 = jnp.dot(k, iw[C:2 * C].T, precision=_HI) + ib[C:2 * C]
        v2 = jnp.dot(v, iw[2 * C:].T, precision=_HI) + ib[2 * C:]

        def heads(t):
            return jnp.transpose(t.reshape(S, B, num_heads, D), (1, 2, 0, 3))

        qh = heads(q2) / math.sqrt(D)
        kh = heads(k2)
        vh = heads(v2)
        sc = jnp.einsum("bhqd,bhkd->bhqk", qh, kh, precision=_HI)
        attn = jax.nn.softmax(sc, axis=-1)
        ctx = jnp.einsum("bhqk,bhkd->bhqd", attn, vh, precision=_HI)
        ctx = jnp.transpose(ctx, (2, 0, 1, 3)).reshape(S, B, C)

        p = jnp.dot(ctx, lp["out_w"].T, precision=_HI) + lp["out_b"] + p
        p = jnp.dot(jnp.dot(p, lp["fc1"].T, precision=_HI),
                    lp["fc2"].T, precision=_HI) + p

    return jnp.transpose(p, (1, 2, 0)).reshape(B, C, W, H)


if __name__ == "__main__":
    # c1 == c2 == 32 -> the TransformerBlock's optional Conv stem is None.
    B, C, W, H = 2, 32, 8, 8
    NUM_HEADS, NUM_LAYERS = 4, 2

    key = jax.random.PRNGKey(0)
    kx, kp = jax.random.split(key)
    x = jax.random.normal(kx, (B, C, W, H), dtype=jnp.float32)
    params = _make_params(kp, C, NUM_LAYERS)

    ref = _reference_transformer_block(x, params, NUM_HEADS)

    # f32 MXU path: tight correctness check of structure + weight fusion.
    out_f32 = jax.block_until_ready(
        transformer_block_pallas(x, params, NUM_HEADS, compute_dtype=jnp.float32))
    assert out_f32.shape == (B, C, W, H), out_f32.shape
    assert out_f32.dtype == x.dtype
    err32 = float(jnp.max(jnp.abs(out_f32 - ref)))
    assert jnp.allclose(out_f32, ref, atol=5e-3, rtol=5e-3), f"f32 max |err| = {err32}"

    # bf16 MXU path (default; matches the bf16-native MXU on v5e/v6e/v7x).
    out_bf16 = jax.block_until_ready(
        transformer_block_pallas(x, params, NUM_HEADS, compute_dtype=jnp.bfloat16))
    assert out_bf16.shape == (B, C, W, H), out_bf16.shape
    assert out_bf16.dtype == x.dtype
    err16 = float(jnp.max(jnp.abs(out_bf16 - ref)))
    assert jnp.allclose(out_bf16, ref, atol=1e-1, rtol=1e-1), f"bf16 max |err| = {err16}"

    print("KERNEL_OK")
</pallas_src>

<mosaic_0001>
module attributes {stable_mosaic.version = 11 : i64} {
  func.func @_transformer_block_kernel(%arg0: i32, %arg1: i32, %arg2: memref<2x32x64xf32, #tpu.memory_space<vmem>>, %arg3: memref<32x32xf32, #tpu.memory_space<vmem>>, %arg4: memref<1x32xf32, #tpu.memory_space<vmem>>, %arg5: memref<1x32x32xf32, #tpu.memory_space<vmem>>, %arg6: memref<1x1x32xf32, #tpu.memory_space<vmem>>, %arg7: memref<1x32x32xf32, #tpu.memory_space<vmem>>, %arg8: memref<1x1x32xf32, #tpu.memory_space<vmem>>, %arg9: memref<1x32x32xf32, #tpu.memory_space<vmem>>, %arg10: memref<1x1x32xf32, #tpu.memory_space<vmem>>, %arg11: memref<1x32x32xf32, #tpu.memory_space<vmem>>, %arg12: memref<1x1x32xf32, #tpu.memory_space<vmem>>, %arg13: memref<1x32x32xf32, #tpu.memory_space<vmem>>, %arg14: memref<2x32x64xf32, #tpu.memory_space<vmem>>, %arg15: memref<128x32xf32, #tpu.memory_space<vmem>>, %arg16: memref<128x32xf32, #tpu.memory_space<vmem>>) attributes {dimension_semantics = [#tpu.dimension_semantics<parallel>, #tpu.dimension_semantics<arbitrary>], iteration_bounds = array<i64: 1, 2>, scalar_prefetch = 0 : i64, scratch_operands = 2 : i64, tpu.core_type = #tpu.core_type<tc>, window_params = [{transform_indices = @transform_0, window_bounds = array<i64: 2, 32, 64>}, {pipeline_mode = #tpu.pipeline_mode<synchronous>, transform_indices = @transform_1, window_bounds = array<i64: 32, 32>}, {pipeline_mode = #tpu.pipeline_mode<synchronous>, transform_indices = @transform_2, window_bounds = array<i64: 1, 32>}, {transform_indices = @transform_3, window_bounds = array<i64: 1, 32, 32>}, {transform_indices = @transform_4, window_bounds = array<i64: 1, 1, 32>}, {transform_indices = @transform_5, window_bounds = array<i64: 1, 32, 32>}, {transform_indices = @transform_6, window_bounds = array<i64: 1, 1, 32>}, {transform_indices = @transform_7, window_bounds = array<i64: 1, 32, 32>}, {transform_indices = @transform_8, window_bounds = array<i64: 1, 1, 32>}, {transform_indices = @transform_9, window_bounds = array<i64: 1, 32, 32>}, {transform_indices = @transform_10, window_bounds = array<i64: 1, 1, 32>}, {transform_indices = @transform_11, window_bounds = array<i64: 1, 32, 32>}, {transform_indices = @transform_12, window_bounds = array<i64: 2, 32, 64>}]} {
    %c0_i32 = arith.constant 0 : i32
    %0 = arith.cmpi eq, %arg1, %c0_i32 : i32
    %1 = arith.extui %0 : i1 to i32
    %c0_i32_0 = arith.constant 0 : i32
    %2 = arith.cmpi ne, %1, %c0_i32_0 : i32
    scf.if %2 {
      %c0_82 = arith.constant 0 : index
      %c0_83 = arith.constant 0 : index
      %c0_84 = arith.constant 0 : index
      %178 = vector.load %arg2[%c0_82, %c0_83, %c0_84] : memref<2x32x64xf32, #tpu.memory_space<vmem>>, vector<1x32x64xf32>
      %179 = vector.shape_cast %178 : vector<1x32x64xf32> to vector<32x64xf32>
      %180 = tpu.transpose %179, [1, 0] : vector<32x64xf32> -> vector<64x32xf32>
      %c0_85 = arith.constant 0 : index
      %c0_86 = arith.constant 0 : index
      %181 = vector.load %arg15[%c0_85, %c0_86] : memref<128x32xf32, #tpu.memory_space<vmem>>, vector<64x32xf32>
      tpu.vector_store %arg15[%c0_85, %c0_86], %180 {strides = array<i32>} : memref<128x32xf32, #tpu.memory_space<vmem>>, vector<64x32xf32>,
      %c1 = arith.constant 1 : index
      %c0_87 = arith.constant 0 : index
      %c0_88 = arith.constant 0 : index
      %182 = vector.load %arg2[%c1, %c0_87, %c0_88] : memref<2x32x64xf32, #tpu.memory_space<vmem>>, vector<1x32x64xf32>
      %183 = vector.shape_cast %182 : vector<1x32x64xf32> to vector<32x64xf32>
      %184 = tpu.transpose %183, [1, 0] : vector<32x64xf32> -> vector<64x32xf32>
      %c64_89 = arith.constant 64 : index
      %c0_90 = arith.constant 0 : index
      %185 = vector.load %arg15[%c64_89, %c0_90] : memref<128x32xf32, #tpu.memory_space<vmem>>, vector<64x32xf32>
      tpu.vector_store %arg15[%c64_89, %c0_90], %184 {strides = array<i32>} : memref<128x32xf32, #tpu.memory_space<vmem>>, vector<64x32xf32>,
      %c0_91 = arith.constant 0 : index
      %c0_92 = arith.constant 0 : index
      %186 = vector.load %arg15[%c0_91, %c0_92] : memref<128x32xf32, #tpu.memory_space<vmem>>, vector<128x32xf32>
      %c0_93 = arith.constant 0 : index
      %c0_94 = arith.constant 0 : index
      %187 = vector.load %arg3[%c0_93, %c0_94] : memref<32x32xf32, #tpu.memory_space<vmem>>, vector<32x32xf32>
      %cst_95 = arith.constant dense<0.000000e+00> : vector<128x32xf32>
      %188 = tpu.matmul %186, %187, %cst_95 {dimension_numbers = #tpu.dot_dimension_numbers<[1], [0], [0], [1], [0, 0, 1, 1], [], []>} : vector<128x32xf32>, vector<32x32xf32>, vector<128x32xf32> -> vector<128x32xf32>
      %189 = arith.addf %186, %188 : vector<128x32xf32>
      %c0_96 = arith.constant 0 : index
      %c0_97 = arith.constant 0 : index
      %190 = vector.load %arg4[%c0_96, %c0_97] : memref<1x32xf32, #tpu.memory_space<vmem>>, vector<1x32xf32>
      %191 = vector.broadcast %190 : vector<1x32xf32> to vector<128x32xf32>
      %192 = arith.addf %189, %191 : vector<128x32xf32>
      %c0_98 = arith.constant 0 : index
      %c0_99 = arith.constant 0 : index
      %193 = vector.load %arg15[%c0_98, %c0_99] : memref<128x32xf32, #tpu.memory_space<vmem>>, vector<128x32xf32>
      tpu.vector_store %arg15[%c0_98, %c0_99], %192 {strides = array<i32>} : memref<128x32xf32, #tpu.memory_space<vmem>>, vector<128x32xf32>,
    } else {
    }
    %c0 = arith.constant 0 : index
    %c0_1 = arith.constant 0 : index
    %3 = vector.load %arg15[%c0, %c0_1] : memref<128x32xf32, #tpu.memory_space<vmem>>, vector<128x32xf32>
    %c0_2 = arith.constant 0 : index
    %c0_3 = arith.constant 0 : index
    %c0_4 = arith.constant 0 : index
    %4 = vector.load %arg5[%c0_2, %c0_3, %c0_4] : memref<1x32x32xf32, #tpu.memory_space<vmem>>, vector<1x32x32xf32>
    %5 = vector.shape_cast %4 : vector<1x32x32xf32> to vector<32x32xf32>
    %cst = arith.constant dense<0.000000e+00> : vector<128x32xf32>
    %6 = tpu.matmul %3, %5, %cst {dimension_numbers = #tpu.dot_dimension_numbers<[1], [0], [0], [1], [0, 0, 1, 1], [], []>} : vector<128x32xf32>, vector<32x32xf32>, vector<128x32xf32> -> vector<128x32xf32>
    %c0_5 = arith.constant 0 : index
    %c0_6 = arith.constant 0 : index
    %c0_7 = arith.constant 0 : index
    %7 = vector.load %arg6[%c0_5, %c0_6, %c0_7] : memref<1x1x32xf32, #tpu.memory_space<vmem>>, vector<1x1x32xf32>
    %8 = vector.shape_cast %7 : vector<1x1x32xf32> to vector<1x32xf32>
    %9 = vector.broadcast %8 : vector<1x32xf32> to vector<128x32xf32>
    %10 = arith.addf %6, %9 : vector<128x32xf32>
    %c0_8 = arith.constant 0 : index
    %c0_9 = arith.constant 0 : index
    %c0_10 = arith.constant 0 : index
    %11 = vector.load %arg7[%c0_8, %c0_9, %c0_10] : memref<1x32x32xf32, #tpu.memory_space<vmem>>, vector<1x32x32xf32>
    %12 = vector.shape_cast %11 : vector<1x32x32xf32> to vector<32x32xf32>
    %cst_11 = arith.constant dense<0.000000e+00> : vector<128x32xf32>
    %13 = tpu.matmul %3, %12, %cst_11 {dimension_numbers = #tpu.dot_dimension_numbers<[1], [0], [0], [1], [0, 0, 1, 1], [], []>} : vector<128x32xf32>, vector<32x32xf32>, vector<128x32xf32> -> vector<128x32xf32>
    %c0_12 = arith.constant 0 : index
    %c0_13 = arith.constant 0 : index
    %c0_14 = arith.constant 0 : index
    %14 = vector.load %arg8[%c0_12, %c0_13, %c0_14] : memref<1x1x32xf32, #tpu.memory_space<vmem>>, vector<1x1x32xf32>
    %15 = vector.shape_cast %14 : vector<1x1x32xf32> to vector<1x32xf32>
    %16 = vector.broadcast %15 : vector<1x32xf32> to vector<128x32xf32>
    %17 = arith.addf %13, %16 : vector<128x32xf32>
    %c0_15 = arith.constant 0 : index
    %c0_16 = arith.constant 0 : index
    %c0_17 = arith.constant 0 : index
    %18 = vector.load %arg9[%c0_15, %c0_16, %c0_17] : memref<1x32x32xf32, #tpu.memory_space<vmem>>, vector<1x32x32xf32>
    %19 = vector.shape_cast %18 : vector<1x32x32xf32> to vector<32x32xf32>
    %cst_18 = arith.constant dense<0.000000e+00> : vector<128x32xf32>
    %20 = tpu.matmul %3, %19, %cst_18 {dimension_numbers = #tpu.dot_dimension_numbers<[1], [0], [0], [1], [0, 0, 1, 1], [], []>} : vector<128x32xf32>, vector<32x32xf32>, vector<128x32xf32> -> vector<128x32xf32>
    %c0_19 = arith.constant 0 : index
    %c0_20 = arith.constant 0 : index
    %c0_21 = arith.constant 0 : index
    %21 = vector.load %arg10[%c0_19, %c0_20, %c0_21] : memref<1x1x32xf32, #tpu.memory_space<vmem>>, vector<1x1x32xf32>
    %22 = vector.shape_cast %21 : vector<1x1x32xf32> to vector<1x32xf32>
    %23 = vector.broadcast %22 : vector<1x32xf32> to vector<128x32xf32>
    %24 = arith.addf %20, %23 : vector<128x32xf32>
    %25 = vector.extract_strided_slice %10 {offsets = [0, 0], sizes = [64, 32], strides = [1, 1]} : vector<128x32xf32> to vector<64x32xf32>
    %26 = vector.extract_strided_slice %17 {offsets = [0, 0], sizes = [64, 32], strides = [1, 1]} : vector<128x32xf32> to vector<64x32xf32>
    %27 = tpu.transpose %26, [1, 0] : vector<64x32xf32> -> vector<32x64xf32>
    %28 = vector.extract_strided_slice %24 {offsets = [0, 0], sizes = [64, 32], strides = [1, 1]} : vector<128x32xf32> to vector<64x32xf32>
    %29 = vector.extract_strided_slice %25 {offsets = [0, 0], sizes = [64, 8], strides = [1, 1]} : vector<64x32xf32> to vector<64x8xf32>
    %30 = vector.extract_strided_slice %27 {offsets = [0, 0], sizes = [8, 64], strides = [1, 1]} : vector<32x64xf32> to vector<8x64xf32>
    %cst_22 = arith.constant dense<0.000000e+00> : vector<64x64xf32>
    %31 = tpu.matmul %29, %30, %cst_22 {dimension_numbers = #tpu.dot_dimension_numbers<[1], [0], [0], [1], [0, 0, 1, 1], [], []>} : vector<64x8xf32>, vector<8x64xf32>, vector<64x64xf32> -> vector<64x64xf32>
    %cst_23 = arith.constant dense<0xFF800000> : vector<64xf32>
    %32 = vector.multi_reduction <maximumf>, %31, %cst_23 [1] : vector<64x64xf32> to vector<64xf32>
    %33 = vector.shape_cast %32 : vector<64xf32> to vector<64x1xf32>
    %34 = vector.broadcast %33 : vector<64x1xf32> to vector<64x64xf32>
    %35 = arith.subf %31, %34 : vector<64x64xf32>
    %36 = math.exp %35 : vector<64x64xf32>
    %cst_24 = arith.constant dense<0.000000e+00> : vector<64xf32>
    %37 = vector.multi_reduction <add>, %36, %cst_24 [1] : vector<64x64xf32> to vector<64xf32>
    %38 = vector.shape_cast %37 : vector<64xf32> to vector<64x1xf32>
    %39 = tpu.reciprocal %38 {approx = true} : vector<64x1xf32> -> vector<64x1xf32>
    %40 = vector.broadcast %39 : vector<64x1xf32> to vector<64x64xf32>
    %41 = arith.mulf %36, %40 : vector<64x64xf32>
    %42 = vector.extract_strided_slice %28 {offsets = [0, 0], sizes = [64, 8], strides = [1, 1]} : vector<64x32xf32> to vector<64x8xf32>
    %cst_25 = arith.constant dense<0.000000e+00> : vector<64x8xf32>
    %43 = tpu.matmul %41, %42, %cst_25 {dimension_numbers = #tpu.dot_dimension_numbers<[1], [0], [0], [1], [0, 0, 1, 1], [], []>} : vector<64x64xf32>, vector<64x8xf32>, vector<64x8xf32> -> vector<64x8xf32>
    %c0_26 = arith.constant 0 : index
    %c0_27 = arith.constant 0 : index
    %44 = vector.load %arg16[%c0_26, %c0_27] : memref<128x32xf32, #tpu.memory_space<vmem>>, vector<64x8xf32>
    tpu.vector_store %arg16[%c0_26, %c0_27], %43 {strides = array<i32>} : memref<128x32xf32, #tpu.memory_space<vmem>>, vector<64x8xf32>,
    %45 = vector.extract_strided_slice %25 {offsets = [0, 8], sizes = [64, 8], strides = [1, 1]} : vector<64x32xf32> to vector<64x8xf32>
    %46 = vector.extract_strided_slice %27 {offsets = [8, 0], sizes = [8, 64], strides = [1, 1]} : vector<32x64xf32> to vector<8x64xf32>
    %cst_28 = arith.constant dense<0.000000e+00> : vector<64x64xf32>
    %47 = tpu.matmul %45, %46, %cst_28 {dimension_numbers = #tpu.dot_dimension_numbers<[1], [0], [0], [1], [0, 0, 1, 1], [], []>} : vector<64x8xf32>, vector<8x64xf32>, vector<64x64xf32> -> vector<64x64xf32>
    %cst_29 = arith.constant dense<0xFF800000> : vector<64xf32>
    %48 = vector.multi_reduction <maximumf>, %47, %cst_29 [1] : vector<64x64xf32> to vector<64xf32>
    %49 = vector.shape_cast %48 : vector<64xf32> to vector<64x1xf32>
    %50 = vector.broadcast %49 : vector<64x1xf32> to vector<64x64xf32>
    %51 = arith.subf %47, %50 : vector<64x64xf32>
    %52 = math.exp %51 : vector<64x64xf32>
    %cst_30 = arith.constant dense<0.000000e+00> : vector<64xf32>
    %53 = vector.multi_reduction <add>, %52, %cst_30 [1] : vector<64x64xf32> to vector<64xf32>
    %54 = vector.shape_cast %53 : vector<64xf32> to vector<64x1xf32>
    %55 = tpu.reciprocal %54 {approx = true} : vector<64x1xf32> -> vector<64x1xf32>
    %56 = vector.broadcast %55 : vector<64x1xf32> to vector<64x64xf32>
    %57 = arith.mulf %52, %56 : vector<64x64xf32>
    %58 = vector.extract_strided_slice %28 {offsets = [0, 8], sizes = [64, 8], strides = [1, 1]} : vector<64x32xf32> to vector<64x8xf32>
    %cst_31 = arith.constant dense<0.000000e+00> : vector<64x8xf32>
    %59 = tpu.matmul %57, %58, %cst_31 {dimension_numbers = #tpu.dot_dimension_numbers<[1], [0], [0], [1], [0, 0, 1, 1], [], []>} : vector<64x64xf32>, vector<64x8xf32>, vector<64x8xf32> -> vector<64x8xf32>
    %c0_32 = arith.constant 0 : index
    %c8 = arith.constant 8 : index
    %60 = vector.load %arg16[%c0_32, %c8] : memref<128x32xf32, #tpu.memory_space<vmem>>, vector<64x8xf32>
    tpu.vector_store %arg16[%c0_32, %c8], %59 {strides = array<i32>} : memref<128x32xf32, #tpu.memory_space<vmem>>, vector<64x8xf32>,
    %61 = vector.extract_strided_slice %25 {offsets = [0, 16], sizes = [64, 8], strides = [1, 1]} : vector<64x32xf32> to vector<64x8xf32>
    %62 = vector.extract_strided_slice %27 {offsets = [16, 0], sizes = [8, 64], strides = [1, 1]} : vector<32x64xf32> to vector<8x64xf32>
    %cst_33 = arith.constant dense<0.000000e+00> : vector<64x64xf32>
    %63 = tpu.matmul %61, %62, %cst_33 {dimension_numbers = #tpu.dot_dimension_numbers<[1], [0], [0], [1], [0, 0, 1, 1], [], []>} : vector<64x8xf32>, vector<8x64xf32>, vector<64x64xf32> -> vector<64x64xf32>
    %cst_34 = arith.constant dense<0xFF800000> : vector<64xf32>
    %64 = vector.multi_reduction <maximumf>, %63, %cst_34 [1] : vector<64x64xf32> to vector<64xf32>
    %65 = vector.shape_cast %64 : vector<64xf32> to vector<64x1xf32>
    %66 = vector.broadcast %65 : vector<64x1xf32> to vector<64x64xf32>
    %67 = arith.subf %63, %66 : vector<64x64xf32>
    %68 = math.exp %67 : vector<64x64xf32>
    %cst_35 = arith.constant dense<0.000000e+00> : vector<64xf32>
    %69 = vector.multi_reduction <add>, %68, %cst_35 [1] : vector<64x64xf32> to vector<64xf32>
    %70 = vector.shape_cast %69 : vector<64xf32> to vector<64x1xf32>
    %71 = tpu.reciprocal %70 {approx = true} : vector<64x1xf32> -> vector<64x1xf32>
    %72 = vector.broadcast %71 : vector<64x1xf32> to vector<64x64xf32>
    %73 = arith.mulf %68, %72 : vector<64x64xf32>
    %74 = vector.extract_strided_slice %28 {offsets = [0, 16], sizes = [64, 8], strides = [1, 1]} : vector<64x32xf32> to vector<64x8xf32>
    %cst_36 = arith.constant dense<0.000000e+00> : vector<64x8xf32>
    %75 = tpu.matmul %73, %74, %cst_36 {dimension_numbers = #tpu.dot_dimension_numbers<[1], [0], [0], [1], [0, 0, 1, 1], [], []>} : vector<64x64xf32>, vector<64x8xf32>, vector<64x8xf32> -> vector<64x8xf32>
    %c0_37 = arith.constant 0 : index
    %c16 = arith.constant 16 : index
    %76 = vector.load %arg16[%c0_37, %c16] : memref<128x32xf32, #tpu.memory_space<vmem>>, vector<64x8xf32>
    tpu.vector_store %arg16[%c0_37, %c16], %75 {strides = array<i32>} : memref<128x32xf32, #tpu.memory_space<vmem>>, vector<64x8xf32>,
    %77 = vector.extract_strided_slice %25 {offsets = [0, 24], sizes = [64, 8], strides = [1, 1]} : vector<64x32xf32> to vector<64x8xf32>
    %78 = vector.extract_strided_slice %27 {offsets = [24, 0], sizes = [8, 64], strides = [1, 1]} : vector<32x64xf32> to vector<8x64xf32>
    %cst_38 = arith.constant dense<0.000000e+00> : vector<64x64xf32>
    %79 = tpu.matmul %77, %78, %cst_38 {dimension_numbers = #tpu.dot_dimension_numbers<[1], [0], [0], [1], [0, 0, 1, 1], [], []>} : vector<64x8xf32>, vector<8x64xf32>, vector<64x64xf32> -> vector<64x64xf32>
    %cst_39 = arith.constant dense<0xFF800000> : vector<64xf32>
    %80 = vector.multi_reduction <maximumf>, %79, %cst_39 [1] : vector<64x64xf32> to vector<64xf32>
    %81 = vector.shape_cast %80 : vector<64xf32> to vector<64x1xf32>
    %82 = vector.broadcast %81 : vector<64x1xf32> to vector<64x64xf32>
    %83 = arith.subf %79, %82 : vector<64x64xf32>
    %84 = math.exp %83 : vector<64x64xf32>
    %cst_40 = arith.constant dense<0.000000e+00> : vector<64xf32>
    %85 = vector.multi_reduction <add>, %84, %cst_40 [1] : vector<64x64xf32> to vector<64xf32>
    %86 = vector.shape_cast %85 : vector<64xf32> to vector<64x1xf32>
    %87 = tpu.reciprocal %86 {approx = true} : vector<64x1xf32> -> vector<64x1xf32>
    %88 = vector.broadcast %87 : vector<64x1xf32> to vector<64x64xf32>
    %89 = arith.mulf %84, %88 : vector<64x64xf32>
    %90 = vector.extract_strided_slice %28 {offsets = [0, 24], sizes = [64, 8], strides = [1, 1]} : vector<64x32xf32> to vector<64x8xf32>
    %cst_41 = arith.constant dense<0.000000e+00> : vector<64x8xf32>
    %91 = tpu.matmul %89, %90, %cst_41 {dimension_numbers = #tpu.dot_dimension_numbers<[1], [0], [0], [1], [0, 0, 1, 1], [], []>} : vector<64x64xf32>, vector<64x8xf32>, vector<64x8xf32> -> vector<64x8xf32>
    %c0_42 = arith.constant 0 : index
    %c24 = arith.constant 24 : index
    %92 = vector.load %arg16[%c0_42, %c24] : memref<128x32xf32, #tpu.memory_space<vmem>>, vector<64x8xf32>
    tpu.vector_store %arg16[%c0_42, %c24], %91 {strides = array<i32>} : memref<128x32xf32, #tpu.memory_space<vmem>>, vector<64x8xf32>,
    %93 = vector.extract_strided_slice %10 {offsets = [64, 0], sizes = [64, 32], strides = [1, 1]} : vector<128x32xf32> to vector<64x32xf32>
    %94 = vector.extract_strided_slice %17 {offsets = [64, 0], sizes = [64, 32], strides = [1, 1]} : vector<128x32xf32> to vector<64x32xf32>
    %95 = tpu.transpose %94, [1, 0] : vector<64x32xf32> -> vector<32x64xf32>
    %96 = vector.extract_strided_slice %24 {offsets = [64, 0], sizes = [64, 32], strides = [1, 1]} : vector<128x32xf32> to vector<64x32xf32>
    %97 = vector.extract_strided_slice %93 {offsets = [0, 0], sizes = [64, 8], strides = [1, 1]} : vector<64x32xf32> to vector<64x8xf32>
    %98 = vector.extract_strided_slice %95 {offsets = [0, 0], sizes = [8, 64], strides = [1, 1]} : vector<32x64xf32> to vector<8x64xf32>
    %cst_43 = arith.constant dense<0.000000e+00> : vector<64x64xf32>
    %99 = tpu.matmul %97, %98, %cst_43 {dimension_numbers = #tpu.dot_dimension_numbers<[1], [0], [0], [1], [0, 0, 1, 1], [], []>} : vector<64x8xf32>, vector<8x64xf32>, vector<64x64xf32> -> vector<64x64xf32>
    %cst_44 = arith.constant dense<0xFF800000> : vector<64xf32>
    %100 = vector.multi_reduction <maximumf>, %99, %cst_44 [1] : vector<64x64xf32> to vector<64xf32>
    %101 = vector.shape_cast %100 : vector<64xf32> to vector<64x1xf32>
    %102 = vector.broadcast %101 : vector<64x1xf32> to vector<64x64xf32>
    %103 = arith.subf %99, %102 : vector<64x64xf32>
    %104 = math.exp %103 : vector<64x64xf32>
    %cst_45 = arith.constant dense<0.000000e+00> : vector<64xf32>
    %105 = vector.multi_reduction <add>, %104, %cst_45 [1] : vector<64x64xf32> to vector<64xf32>
    %106 = vector.shape_cast %105 : vector<64xf32> to vector<64x1xf32>
    %107 = tpu.reciprocal %106 {approx = true} : vector<64x1xf32> -> vector<64x1xf32>
    %108 = vector.broadcast %107 : vector<64x1xf32> to vector<64x64xf32>
    %109 = arith.mulf %104, %108 : vector<64x64xf32>
    %110 = vector.extract_strided_slice %96 {offsets = [0, 0], sizes = [64, 8], strides = [1, 1]} : vector<64x32xf32> to vector<64x8xf32>
    %cst_46 = arith.constant dense<0.000000e+00> : vector<64x8xf32>
    %111 = tpu.matmul %109, %110, %cst_46 {dimension_numbers = #tpu.dot_dimension_numbers<[1], [0], [0], [1], [0, 0, 1, 1], [], []>} : vector<64x64xf32>, vector<64x8xf32>, vector<64x8xf32> -> vector<64x8xf32>
    %c64 = arith.constant 64 : index
    %c0_47 = arith.constant 0 : index
    %112 = vector.load %arg16[%c64, %c0_47] : memref<128x32xf32, #tpu.memory_space<vmem>>, vector<64x8xf32>
    tpu.vector_store %arg16[%c64, %c0_47], %111 {strides = array<i32>} : memref<128x32xf32, #tpu.memory_space<vmem>>, vector<64x8xf32>,
    %113 = vector.extract_strided_slice %93 {offsets = [0, 8], sizes = [64, 8], strides = [1, 1]} : vector<64x32xf32> to vector<64x8xf32>
    %114 = vector.extract_strided_slice %95 {offsets = [8, 0], sizes = [8, 64], strides = [1, 1]} : vector<32x64xf32> to vector<8x64xf32>
    %cst_48 = arith.constant dense<0.000000e+00> : vector<64x64xf32>
    %115 = tpu.matmul %113, %114, %cst_48 {dimension_numbers = #tpu.dot_dimension_numbers<[1], [0], [0], [1], [0, 0, 1, 1], [], []>} : vector<64x8xf32>, vector<8x64xf32>, vector<64x64xf32> -> vector<64x64xf32>
    %cst_49 = arith.constant dense<0xFF800000> : vector<64xf32>
    %116 = vector.multi_reduction <maximumf>, %115, %cst_49 [1] : vector<64x64xf32> to vector<64xf32>
    %117 = vector.shape_cast %116 : vector<64xf32> to vector<64x1xf32>
    %118 = vector.broadcast %117 : vector<64x1xf32> to vector<64x64xf32>
    %119 = arith.subf %115, %118 : vector<64x64xf32>
    %120 = math.exp %119 : vector<64x64xf32>
    %cst_50 = arith.constant dense<0.000000e+00> : vector<64xf32>
    %121 = vector.multi_reduction <add>, %120, %cst_50 [1] : vector<64x64xf32> to vector<64xf32>
    %122 = vector.shape_cast %121 : vector<64xf32> to vector<64x1xf32>
    %123 = tpu.reciprocal %122 {approx = true} : vector<64x1xf32> -> vector<64x1xf32>
    %124 = vector.broadcast %123 : vector<64x1xf32> to vector<64x64xf32>
    %125 = arith.mulf %120, %124 : vector<64x64xf32>
    %126 = vector.extract_strided_slice %96 {offsets = [0, 8], sizes = [64, 8], strides = [1, 1]} : vector<64x32xf32> to vector<64x8xf32>
    %cst_51 = arith.constant dense<0.000000e+00> : vector<64x8xf32>
    %127 = tpu.matmul %125, %126, %cst_51 {dimension_numbers = #tpu.dot_dimension_numbers<[1], [0], [0], [1], [0, 0, 1, 1], [], []>} : vector<64x64xf32>, vector<64x8xf32>, vector<64x8xf32> -> vector<64x8xf32>
    %c64_52 = arith.constant 64 : index
    %c8_53 = arith.constant 8 : index
    %128 = vector.load %arg16[%c64_52, %c8_53] : memref<128x32xf32, #tpu.memory_space<vmem>>, vector<64x8xf32>
    tpu.vector_store %arg16[%c64_52, %c8_53], %127 {strides = array<i32>} : memref<128x32xf32, #tpu.memory_space<vmem>>, vector<64x8xf32>,
    %129 = vector.extract_strided_slice %93 {offsets = [0, 16], sizes = [64, 8], strides = [1, 1]} : vector<64x32xf32> to vector<64x8xf32>
    %130 = vector.extract_strided_slice %95 {offsets = [16, 0], sizes = [8, 64], strides = [1, 1]} : vector<32x64xf32> to vector<8x64xf32>
    %cst_54 = arith.constant dense<0.000000e+00> : vector<64x64xf32>
    %131 = tpu.matmul %129, %130, %cst_54 {dimension_numbers = #tpu.dot_dimension_numbers<[1], [0], [0], [1], [0, 0, 1, 1], [], []>} : vector<64x8xf32>, vector<8x64xf32>, vector<64x64xf32> -> vector<64x64xf32>
    %cst_55 = arith.constant dense<0xFF800000> : vector<64xf32>
    %132 = vector.multi_reduction <maximumf>, %131, %cst_55 [1] : vector<64x64xf32> to vector<64xf32>
    %133 = vector.shape_cast %132 : vector<64xf32> to vector<64x1xf32>
    %134 = vector.broadcast %133 : vector<64x1xf32> to vector<64x64xf32>
    %135 = arith.subf %131, %134 : vector<64x64xf32>
    %136 = math.exp %135 : vector<64x64xf32>
    %cst_56 = arith.constant dense<0.000000e+00> : vector<64xf32>
    %137 = vector.multi_reduction <add>, %136, %cst_56 [1] : vector<64x64xf32> to vector<64xf32>
    %138 = vector.shape_cast %137 : vector<64xf32> to vector<64x1xf32>
    %139 = tpu.reciprocal %138 {approx = true} : vector<64x1xf32> -> vector<64x1xf32>
    %140 = vector.broadcast %139 : vector<64x1xf32> to vector<64x64xf32>
    %141 = arith.mulf %136, %140 : vector<64x64xf32>
    %142 = vector.extract_strided_slice %96 {offsets = [0, 16], sizes = [64, 8], strides = [1, 1]} : vector<64x32xf32> to vector<64x8xf32>
    %cst_57 = arith.constant dense<0.000000e+00> : vector<64x8xf32>
    %143 = tpu.matmul %141, %142, %cst_57 {dimension_numbers = #tpu.dot_dimension_numbers<[1], [0], [0], [1], [0, 0, 1, 1], [], []>} : vector<64x64xf32>, vector<64x8xf32>, vector<64x8xf32> -> vector<64x8xf32>
    %c64_58 = arith.constant 64 : index
    %c16_59 = arith.constant 16 : index
    %144 = vector.load %arg16[%c64_58, %c16_59] : memref<128x32xf32, #tpu.memory_space<vmem>>, vector<64x8xf32>
    tpu.vector_store %arg16[%c64_58, %c16_59], %143 {strides = array<i32>} : memref<128x32xf32, #tpu.memory_space<vmem>>, vector<64x8xf32>,
    %145 = vector.extract_strided_slice %93 {offsets = [0, 24], sizes = [64, 8], strides = [1, 1]} : vector<64x32xf32> to vector<64x8xf32>
    %146 = vector.extract_strided_slice %95 {offsets = [24, 0], sizes = [8, 64], strides = [1, 1]} : vector<32x64xf32> to vector<8x64xf32>
    %cst_60 = arith.constant dense<0.000000e+00> : vector<64x64xf32>
    %147 = tpu.matmul %145, %146, %cst_60 {dimension_numbers = #tpu.dot_dimension_numbers<[1], [0], [0], [1], [0, 0, 1, 1], [], []>} : vector<64x8xf32>, vector<8x64xf32>, vector<64x64xf32> -> vector<64x64xf32>
    %cst_61 = arith.constant dense<0xFF800000> : vector<64xf32>
    %148 = vector.multi_reduction <maximumf>, %147, %cst_61 [1] : vector<64x64xf32> to vector<64xf32>
    %149 = vector.shape_cast %148 : vector<64xf32> to vector<64x1xf32>
    %150 = vector.broadcast %149 : vector<64x1xf32> to vector<64x64xf32>
    %151 = arith.subf %147, %150 : vector<64x64xf32>
    %152 = math.exp %151 : vector<64x64xf32>
    %cst_62 = arith.constant dense<0.000000e+00> : vector<64xf32>
    %153 = vector.multi_reduction <add>, %152, %cst_62 [1] : vector<64x64xf32> to vector<64xf32>
    %154 = vector.shape_cast %153 : vector<64xf32> to vector<64x1xf32>
    %155 = tpu.reciprocal %154 {approx = true} : vector<64x1xf32> -> vector<64x1xf32>
    %156 = vector.broadcast %155 : vector<64x1xf32> to vector<64x64xf32>
    %157 = arith.mulf %152, %156 : vector<64x64xf32>
    %158 = vector.extract_strided_slice %96 {offsets = [0, 24], sizes = [64, 8], strides = [1, 1]} : vector<64x32xf32> to vector<64x8xf32>
    %cst_63 = arith.constant dense<0.000000e+00> : vector<64x8xf32>
    %159 = tpu.matmul %157, %158, %cst_63 {dimension_numbers = #tpu.dot_dimension_numbers<[1], [0], [0], [1], [0, 0, 1, 1], [], []>} : vector<64x64xf32>, vector<64x8xf32>, vector<64x8xf32> -> vector<64x8xf32>
    %c64_64 = arith.constant 64 : index
    %c24_65 = arith.constant 24 : index
    %160 = vector.load %arg16[%c64_64, %c24_65] : memref<128x32xf32, #tpu.memory_space<vmem>>, vector<64x8xf32>
    tpu.vector_store %arg16[%c64_64, %c24_65], %159 {strides = array<i32>} : memref<128x32xf32, #tpu.memory_space<vmem>>, vector<64x8xf32>,
    %c0_66 = arith.constant 0 : index
    %c0_67 = arith.constant 0 : index
    %161 = vector.load %arg16[%c0_66, %c0_67] : memref<128x32xf32, #tpu.memory_space<vmem>>, vector<128x32xf32>
    %c0_68 = arith.constant 0 : index
    %c0_69 = arith.constant 0 : index
    %c0_70 = arith.constant 0 : index
    %162 = vector.load %arg11[%c0_68, %c0_69, %c0_70] : memref<1x32x32xf32, #tpu.memory_space<vmem>>, vector<1x32x32xf32>
    %163 = vector.shape_cast %162 : vector<1x32x32xf32> to vector<32x32xf32>
    %cst_71 = arith.constant dense<0.000000e+00> : vector<128x32xf32>
    %164 = tpu.matmul %161, %163, %cst_71 {dimension_numbers = #tpu.dot_dimension_numbers<[1], [0], [0], [1], [0, 0, 1, 1], [], []>} : vector<128x32xf32>, vector<32x32xf32>, vector<128x32xf32> -> vector<128x32xf32>
    %c0_72 = arith.constant 0 : index
    %c0_73 = arith.constant 0 : index
    %c0_74 = arith.constant 0 : index
    %165 = vector.load %arg12[%c0_72, %c0_73, %c0_74] : memref<1x1x32xf32, #tpu.memory_space<vmem>>, vector<1x1x32xf32>
    %166 = vector.shape_cast %165 : vector<1x1x32xf32> to vector<1x32xf32>
    %167 = vector.broadcast %166 : vector<1x32xf32> to vector<128x32xf32>
    %168 = arith.addf %164, %167 : vector<128x32xf32>
    %169 = arith.addf %168, %3 : vector<128x32xf32>
    %c0_75 = arith.constant 0 : index
    %c0_76 = arith.constant 0 : index
    %c0_77 = arith.constant 0 : index
    %170 = vector.load %arg13[%c0_75, %c0_76, %c0_77] : memref<1x32x32xf32, #tpu.memory_space<vmem>>, vector<1x32x32xf32>
    %171 = vector.shape_cast %170 : vector<1x32x32xf32> to vector<32x32xf32>
    %cst_78 = arith.constant dense<0.000000e+00> : vector<128x32xf32>
    %172 = tpu.matmul %169, %171, %cst_78 {dimension_numbers = #tpu.dot_dimension_numbers<[1], [0], [0], [1], [0, 0, 1, 1], [], []>} : vector<128x32xf32>, vector<32x32xf32>, vector<128x32xf32> -> vector<128x32xf32>
    %173 = arith.addf %172, %169 : vector<128x32xf32>
    %c0_79 = arith.constant 0 : index
    %c0_80 = arith.constant 0 : index
    %174 = vector.load %arg15[%c0_79, %c0_80] : memref<128x32xf32, #tpu.memory_space<vmem>>, vector<128x32xf32>
    tpu.vector_store %arg15[%c0_79, %c0_80], %173 {strides = array<i32>} : memref<128x32xf32, #tpu.memory_space<vmem>>, vector<128x32xf32>,
    %c1_i32 = arith.constant 1 : i32
    %175 = arith.cmpi eq, %arg1, %c1_i32 : i32
    %176 = arith.extui %175 : i1 to i32
    %c0_i32_81 = arith.constant 0 : i32
    %177 = arith.cmpi ne, %176, %c0_i32_81 : i32
    scf.if %177 {
      %178 = vector.extract_strided_slice %173 {offsets = [0, 0], sizes = [64, 32], strides = [1, 1]} : vector<128x32xf32> to vector<64x32xf32>
      %179 = tpu.transpose %178, [1, 0] : vector<64x32xf32> -> vector<32x64xf32>
      %c0_82 = arith.constant 0 : index
      %c0_83 = arith.constant 0 : index
      %c0_84 = arith.constant 0 : index
      %180 = vector.load %arg14[%c0_82, %c0_83, %c0_84] : memref<2x32x64xf32, #tpu.memory_space<vmem>>, vector<1x32x64xf32>
      %181 = vector.shape_cast %180 : vector<1x32x64xf32> to vector<32x64xf32>
      %182 = vector.shape_cast %179 : vector<32x64xf32> to vector<1x32x64xf32>
      tpu.vector_store %arg14[%c0_82, %c0_83, %c0_84], %182 {strides = array<i32>} : memref<2x32x64xf32, #tpu.memory_space<vmem>>, vector<1x32x64xf32>,
      %183 = vector.extract_strided_slice %173 {offsets = [64, 0], sizes = [64, 32], strides = [1, 1]} : vector<128x32xf32> to vector<64x32xf32>
      %184 = tpu.transpose %183, [1, 0] : vector<64x32xf32> -> vector<32x64xf32>
      %c1 = arith.constant 1 : index
      %c0_85 = arith.constant 0 : index
      %c0_86 = arith.constant 0 : index
      %185 = vector.load %arg14[%c1, %c0_85, %c0_86] : memref<2x32x64xf32, #tpu.memory_space<vmem>>, vector<1x32x64xf32>
      %186 = vector.shape_cast %185 : vector<1x32x64xf32> to vector<32x64xf32>
      %187 = vector.shape_cast %184 : vector<32x64xf32> to vector<1x32x64xf32>
      tpu.vector_store %arg14[%c1, %c0_85, %c0_86], %187 {strides = array<i32>} : memref<2x32x64xf32, #tpu.memory_space<vmem>>, vector<1x32x64xf32>,
    } else {
    }
    return
  }
  func.func @transform_0(%arg0: i32, %arg1: i32) -> (i32, i32, i32) {
    %c0_i32 = arith.constant 0 : i32
    %c0_i32_0 = arith.constant 0 : i32
    %c0_i32_1 = arith.constant 0 : i32
    return %arg0, %c0_i32, %c0_i32_0 : i32, i32, i32
  }
  func.func @transform_1(%arg0: i32, %arg1: i32) -> (i32, i32) {
    %c0_i32 = arith.constant 0 : i32
    %c0_i32_0 = arith.constant 0 : i32
    %c0_i32_1 = arith.constant 0 : i32
    return %c0_i32, %c0_i32_0 : i32, i32
  }
  func.func @transform_2(%arg0: i32, %arg1: i32) -> (i32, i32) {
    %c0_i32 = arith.constant 0 : i32
    %c0_i32_0 = arith.constant 0 : i32
    %c0_i32_1 = arith.constant 0 : i32
    return %c0_i32, %c0_i32_0 : i32, i32
  }
  func.func @transform_3(%arg0: i32, %arg1: i32) -> (i32, i32, i32) {
    %c0_i32 = arith.constant 0 : i32
    %c0_i32_0 = arith.constant 0 : i32
    %c0_i32_1 = arith.constant 0 : i32
    return %arg1, %c0_i32, %c0_i32_0 : i32, i32, i32
  }
  func.func @transform_4(%arg0: i32, %arg1: i32) -> (i32, i32, i32) {
    %c0_i32 = arith.constant 0 : i32
    %c0_i32_0 = arith.constant 0 : i32
    %c0_i32_1 = arith.constant 0 : i32
    return %arg1, %c0_i32, %c0_i32_0 : i32, i32, i32
  }
  func.func @transform_5(%arg0: i32, %arg1: i32) -> (i32, i32, i32) {
    %c0_i32 = arith.constant 0 : i32
    %c0_i32_0 = arith.constant 0 : i32
    %c0_i32_1 = arith.constant 0 : i32
    return %arg1, %c0_i32, %c0_i32_0 : i32, i32, i32
  }
  func.func @transform_6(%arg0: i32, %arg1: i32) -> (i32, i32, i32) {
    %c0_i32 = arith.constant 0 : i32
    %c0_i32_0 = arith.constant 0 : i32
    %c0_i32_1 = arith.constant 0 : i32
    return %arg1, %c0_i32, %c0_i32_0 : i32, i32, i32
  }
  func.func @transform_7(%arg0: i32, %arg1: i32) -> (i32, i32, i32) {
    %c0_i32 = arith.constant 0 : i32
    %c0_i32_0 = arith.constant 0 : i32
    %c0_i32_1 = arith.constant 0 : i32
    return %arg1, %c0_i32, %c0_i32_0 : i32, i32, i32
  }
  func.func @transform_8(%arg0: i32, %arg1: i32) -> (i32, i32, i32) {
    %c0_i32 = arith.constant 0 : i32
    %c0_i32_0 = arith.constant 0 : i32
    %c0_i32_1 = arith.constant 0 : i32
    return %arg1, %c0_i32, %c0_i32_0 : i32, i32, i32
  }
  func.func @transform_9(%arg0: i32, %arg1: i32) -> (i32, i32, i32) {
    %c0_i32 = arith.constant 0 : i32
    %c0_i32_0 = arith.constant 0 : i32
    %c0_i32_1 = arith.constant 0 : i32
    return %arg1, %c0_i32, %c0_i32_0 : i32, i32, i32
  }
  func.func @transform_10(%arg0: i32, %arg1: i32) -> (i32, i32, i32) {
    %c0_i32 = arith.constant 0 : i32
    %c0_i32_0 = arith.constant 0 : i32
    %c0_i32_1 = arith.constant 0 : i32
    return %arg1, %c0_i32, %c0_i32_0 : i32, i32, i32
  }
  func.func @transform_11(%arg0: i32, %arg1: i32) -> (i32, i32, i32) {
    %c0_i32 = arith.constant 0 : i32
    %c0_i32_0 = arith.constant 0 : i32
    %c0_i32_1 = arith.constant 0 : i32
    return %arg1, %c0_i32, %c0_i32_0 : i32, i32, i32
  }
  func.func @transform_12(%arg0: i32, %arg1: i32) -> (i32, i32, i32) {
    %c0_i32 = arith.constant 0 : i32
    %c0_i32_0 = arith.constant 0 : i32
    %c0_i32_1 = arith.constant 0 : i32
    return %arg0, %c0_i32, %c0_i32_0 : i32, i32, i32
  }
}

</mosaic_0001>

<bundles_post_ra>
// kernel: tpu_custom_call.1
= control target key start
LH: loop header
LB: loop body
LE: loop exit
PB: predicated region body
PF: predicated region fallthrough
CT: control target
= control target key end

     0   :  { %s10581_s0 = inlined_call_operand.hbm [shape: f32[2,32,64], index: 0, kind: input, shape index: {}]   ;;  %s10582_s1 = inlined_call_operand.hbm [shape: f32[32,32], index: 1, kind: input, shape index: {}]   ;;  %s10583_s2 = inlined_call_operand.vmem [shape: f32[1,32], index: 2, kind: input, shape index: {}]   ;;  %s10584_s3 = inlined_call_operand.hbm [shape: f32[2,32,32], index: 3, kind: input, shape index: {}]   ;;  %s10585_s4 = inlined_call_operand.vmem [shape: f32[2,1,32], index: 4, kind: input, shape index: {}]   ;;  %s10586_s5 = inlined_call_operand.hbm [shape: f32[2,32,32], index: 5, kind: input, shape index: {}]   ;;  %s10587_s6 = inlined_call_operand.vmem [shape: f32[2,1,32], index: 6, kind: input, shape index: {}]   ;;  %s10588_s7 = inlined_call_operand.hbm [shape: f32[2,32,32], index: 7, kind: input, shape index: {}]   ;;  %s10589_s8 = inlined_call_operand.vmem [shape: f32[2,1,32], index: 8, kind: input, shape index: {}]   ;;  %s10590_s9 = inlined_call_operand.hbm [shape: f32[2,32,32], index: 9, kind: input, shape index: {}]   ;;  %s10591_s10 = inlined_call_operand.vmem [shape: f32[2,1,32], index: 10, kind: input, shape index: {}]   ;;  %s10592_s11 = inlined_call_operand.hbm [shape: f32[2,32,32], index: 11, kind: input, shape index: {}]   ;;  %s10593_s12 = inlined_call_operand.hbm [shape: f32[2,32,64], index: 12, kind: output, shape index: {}]  }
   0x1   :  { %10626 = sst [smem:[#allocation44_spill]] %s10581_s0 }
   0x2   :  { %10627 = sst [smem:[#allocation45_spill]] %s10583_s2 }
   0x3   :  { %10628 = sst [smem:[#allocation46_spill]] %s10584_s3 }
   0x4   :  { %10629 = sst [smem:[#allocation47_spill]] %s10586_s5 }
   0x5   :  { %10630 = sst [smem:[#allocation48_spill]] %s10587_s6 }
   0x6   :  { %10631 = sst [smem:[#allocation49_spill]] %s10588_s7 }
   0x7   :  { %10632 = sst [smem:[#allocation50_spill]] %s10589_s8 }
   0x8   :  { %10633 = sst [smem:[#allocation51_spill]] %s10590_s9 }
   0x9   :  { %10634 = sst [smem:[#allocation52_spill]] %s10591_s10 }
   0xa   :  { %10635 = sst [smem:[#allocation53_spill]] %s10593_s12 }
   0xb   :  { %17 = vsyncpa [#allocation5], 0 }
   0xc   :  { %18 = vsyncpa [#allocation8], 0 }
   0xd   :  { %19 = vsyncpa [#allocation6], 0  ;;  %s8513_s21 = smov 0   ;;  %s8515_s22 = smov 0  }
   0xe   :  { %s8517_s23 = smov 0   ;;  %s8519_s24 = smov 0  }
   0xf   :  { %s8521_s25 = smov 0   ;;  %s8523_s26 = smov 0  }
  0x10 LB: > { %10636 = sst [smem:[#allocation19_spill]] %s8425_s25  ;;  %s8542_s27 = sadd.s32 4294967295, %s8429_s26   ;;  %s8429_s26 = sphi %s8523_s26, %s25_s26   ;;  %s8425_s25 = sphi %s8521_s25, %s10738_s25   ;;  %s8421_s24 = sphi %s8519_s24, %s10737_s24   ;;  %s8417_s23 = sphi %s8517_s23, %s10741_s23   ;;  %s8413_s22 = sphi %s8515_s22, %s10740_s22   ;;  %s8409_s21 = sphi %s8513_s21, %s10739_s21  }
  0x11   : > { %p119_p0 = scmp.ne.s32.totalorder %s8417_s23, %s8413_s22  ;;  %p120_p1 = scmp.eq.s32.totalorder %s8429_s26, 0 }
  0x12   : > { %p125_p2 = scmp.ne.s32.totalorder %s8413_s22, %s8409_s21  ;;  %p10595_p3 = scmp.eq.s32.totalorder %s8542_s27, 0 }
  0x13   : > { %p121_p4 = por %p120_p1, %p119_p0  ;;  %p5789_p5 = scmp.ge.s32.totalorder %s8429_s26, 1 }
  0x14   : > { %p8553_p6 = por %p10595_p3, %p125_p2  ;;  %p370_p7 = scmp.lt.s32.totalorder %s8429_s26, 3 }
  0x15   : > { %s8431_s13 = smov [#allocation4]   ;;  %p7555_p10 = scmp.lt.s32.totalorder %s8429_s26, 2 }
  0x16   : > { %s10637_s29 = scalar_select %p8553_p6, 1, 0 }
  0x17   : > { %p8558_p8 = pnand %p5789_p5, %p370_p7  ;;  %s386_s14 = sshll.u32 %s8431_s13, 4  ;;  %s387_s14 = int_to_ptr.vmem [resolvable:$true] %s386_s14 }
  0x18   : > { %p8571_p12 = pnand %p7555_p10, %p121_p4  ;;  %s34_s17 = sadd.s32 1, %s8425_s25 }
  0x19   : > { %s10638_s30 = scalar_select %p8558_p8, 1, 0 }
  0x1a   : > { %p7530_p9 = pneg %p8558_p8  ;;  %s10641_s0 = sld [smem:[#allocation44_spill]] }
  0x1b   : > { %s10640_s16 = scalar_select %p8571_p12, 1, 0 }
  0x1c   : > { %p8567_p11 = pnand %p7530_p9, %p10595_p3 }
  0x1e   : > { %s10639_s15 = scalar_select %p8567_p11, 1, 0 }
  0x1f   : > { %p10604_p0 = pneg %p8567_p11 }
  0x20   : > { %s8135_s20 = scalar_lea.hbm %s10641_s0, 1024 }
  0x21   : > { %p8136_p13 = scmp.ne.s32.totalorder %s10641_s0, %s8135_s20  ;;  %p8142_p4 = scmp.lt.u32.totalorder %s8135_s20, %s10641_s0 }
  0x23   : > { %p8138_p1 = pnand %p10604_p0, %p8136_p13 }
  0x25   : > { %p8139_p2 = pneg %p8138_p1 }
  0x27   : > { %p8144_p5 = pnand %p8142_p4, %p8139_p2 }
  0x29   : > { %8147 = shalt.err (!%p8144_p5)
}
  0x2a   : > { %s8148_s2 = scalar_lea.vmem %s387_s14, 1024  ;;  %p8156_p3 = scmp.lt.s32.totalorder %s387_s14, %s387_s14 }
  0x2b   : > { %p8149_p7 = scmp.ne.s32.totalorder %s387_s14, %s8148_s2  ;;  %p8157_p6 = scmp.lt.s32.totalorder %s8148_s2, %s8148_s2 }
  0x2d   : > { %p8151_p9 = pnand %p8149_p7, %p10604_p0  ;;  %p8158_p8 = por %p8157_p6, %p8156_p3 }
  0x2f   : > { %p8152_p10 = pneg %p8151_p9 }
  0x31   : > { %p8159_p12 = pnand %p8158_p8, %p8152_p10 }
  0x33   : > { %8162 = shalt.err (!%p8159_p12)
}
  0x34   : > { %s10599_s18 = smov 128   ;;  %s10601_s12 = smov 8  }
  0x35   : > { %7533 = dma.hbm_to_vmem [thread:$0]  (!%p8567_p11), %s10641_s0, 1024, %s387_s14, [#allocation5], %s10599_s18, %s10599_s18, %s10601_s12  }
  0x36   : > { %p35_p3 = scmp.ge.s32.totalorder %s34_s17, 2  ;;  %s416_s2 = sand.u32 1, %s8429_s26  }
  0x37   : > { %s418_s20 = sand.u32 1, %s8417_s23   ;;  %s8610_s10 = sshll.u32 %s8425_s25, 9 }
  0x38   : > { %s10743_s17 = smov (%p35_p3, %s34_s17), 0  ;;  %s8605_s21 = sshll.u32 %s418_s20, 5 }
  0x39   : > { %10642 = sst [smem:[#allocation20_spill]] %s10743_s17  ;;  %s109_s13 = ssub.s32 %s8425_s25, %s10743_s17 }
  0x3a   : > { %p110_p6 = scmp.eq.s32.totalorder %s109_s13, 0  ;;  %s10643_s3 = sld [smem:[#allocation46_spill]] }
  0x3b   : > { %s420_s14 = scalar_lea.vmem [#allocation9], %s8605_s21  ;;  %s10644_s18 = sadd.s32 1, %s8417_s23 }
  0x3c   : > { %s427_s19 = sshll.u32 %s420_s14, 4  ;;  %s8626_s13 = scalar_lea.sflag [#allocation5], %s416_s2  ;;  %s8624_s19 = int_to_ptr.vmem [resolvable:$true] %s427_s19 }
  0x3d   : > { %s8622_s20 = scalar_select %p110_p6, %s8417_s23, %s10644_s18  }
  0x3e   : > { %p10645_p12 = scmp.ne.s32.totalorder %s10640_s16, 0 }
  0x40   : > { %s8616_s28 = scalar_lea.hbm %s10643_s3, %s8610_s10  ;;  %p8632_p13 = pneg %p10645_p12 }
  0x41   : > { %s8163_s12 = scalar_lea.hbm %s8616_s28, 512  ;;  %s8168_s18 = scalar_lea.hbm %s10643_s3, 1024 }
  0x42   : > { %p8164_p8 = scmp.ne.s32.totalorder %s8616_s28, %s8163_s12  ;;  %p8169_p4 = scmp.lt.u32.totalorder %s8616_s28, %s10643_s3 }
  0x43   : > { %s10646_s6 = scalar_select %p8632_p13, 1, 0 }
  0x44   : > { %p8166_p1 = pnand %p8632_p13, %p8164_p8  ;;  %p8170_p5 = scmp.lt.u32.totalorder %s8168_s18, %s8163_s12 }
  0x45   : > { %p8172_p9 = scmp.lt.u32.totalorder %s8163_s12, %s8616_s28 }
  0x46   : > { %p8167_p2 = pneg %p8166_p1  ;;  %p8171_p7 = por %p8170_p5, %p8169_p4 }
  0x48   : > { %p8173_p10 = por %p8172_p9, %p8171_p7 }
  0x4a   : > { %p8174_p3 = pnand %p8173_p10, %p8167_p2 }
  0x4c   : > { %8177 = shalt.err (!%p8174_p3)
}
  0x4d   : > { %s8178_s2 = scalar_lea.vmem %s8624_s19, 512  ;;  %s8434_s8 = smov [#allocation9]  }
  0x4e   : > { %p8179_p6 = scmp.ne.s32.totalorder %s8624_s19, %s8178_s2  ;;  %s8183_s14 = sshll.u32 %s8434_s8, 4  ;;  %s8184_s14 = int_to_ptr.vmem [resolvable:$false] %s8183_s14 }
  0x4f   : > { %s8185_s0 = scalar_lea.vmem %s8184_s14, 1024  ;;  %p8186_p0 = scmp.lt.s32.totalorder %s8624_s19, %s8184_s14 }
  0x50   : > { %p8181_p8 = pnand %p8179_p6, %p8632_p13  ;;  %p8187_p11 = scmp.lt.s32.totalorder %s8185_s0, %s8178_s2 }
  0x52   : > { %p8182_p1 = pneg %p8181_p8  ;;  %p8188_p4 = por %p8187_p11, %p8186_p0 }
  0x54   : > { %p8189_p5 = pnand %p8188_p4, %p8182_p1 }
  0x56   : > { %8192 = shalt.err (!%p8189_p5)
}
  0x57   : > { %s10647_s17 = smov 8   ;;  %s10648_s12 = smov 128  }
  0x58   : > { %7540 = dma.hbm_to_vmem [thread:$0]  (!%p10645_p12), %s8616_s28, 512, %s8624_s19, %s8626_s13, %s10648_s12, %s10648_s12, %s10647_s17  }
  0x59   : > { %s10649_s5 = sld [smem:[#allocation47_spill]]  ;;  %s447_s2 = scalar_lea.vmem [#allocation10], %s8605_s21 }
  0x5a   : > { %s454_s0 = sshll.u32 %s447_s2, 4  ;;  %s8666_s0 = int_to_ptr.vmem [resolvable:$true] %s454_s0 }
  0x5f   : > { %s8663_s14 = scalar_lea.hbm %s10649_s5, %s8610_s10  ;;  %s8198_s19 = scalar_lea.hbm %s10649_s5, 1024 }
  0x60   : > { %s8193_s3 = scalar_lea.hbm %s8663_s14, 512  ;;  %p8199_p7 = scmp.lt.u32.totalorder %s8663_s14, %s10649_s5 }
  0x61   : > { %p8194_p11 = scmp.ne.s32.totalorder %s8663_s14, %s8193_s3  ;;  %p8200_p9 = scmp.lt.u32.totalorder %s8198_s19, %s8193_s3 }
  0x62   : > { %p8202_p3 = scmp.lt.u32.totalorder %s8193_s3, %s8663_s14 }
  0x63   : > { %p8196_p0 = pnand %p8194_p11, %p8632_p13  ;;  %p8201_p10 = por %p8200_p9, %p8199_p7 }
  0x65   : > { %p8197_p2 = pneg %p8196_p0  ;;  %p8203_p6 = por %p8202_p3, %p8201_p10 }
  0x67   : > { %p8204_p8 = pnand %p8203_p6, %p8197_p2 }
  0x69   : > { %8207 = shalt.err (!%p8204_p8)
}
  0x6a   : > { %s8208_s2 = scalar_lea.vmem %s8666_s0, 512  ;;  %s8435_s25 = smov [#allocation10]  }
  0x6b   : > { %p8209_p1 = scmp.ne.s32.totalorder %s8666_s0, %s8208_s2  ;;  %s8213_s28 = sshll.u32 %s8435_s25, 4  ;;  %s8214_s28 = int_to_ptr.vmem [resolvable:$false] %s8213_s28 }
  0x6c   : > { %s8215_s18 = scalar_lea.vmem %s8214_s28, 1024  ;;  %p8216_p11 = scmp.lt.s32.totalorder %s8666_s0, %s8214_s28 }
  0x6d   : > { %p8211_p4 = pnand %p8209_p1, %p8632_p13  ;;  %p8217_p0 = scmp.lt.s32.totalorder %s8215_s18, %s8208_s2 }
  0x6f   : > { %p8212_p5 = pneg %p8211_p4  ;;  %p8218_p7 = por %p8217_p0, %p8216_p11 }
  0x71   : > { %p8219_p9 = pnand %p8218_p7, %p8212_p5 }
  0x73   : > { %8222 = shalt.err (!%p8219_p9)
}
  0x74   : > { %7543 = dma.hbm_to_vmem [thread:$0]  (!%p10645_p12), %s8663_s14, 512, %s8666_s0, %s8626_s13, %s10648_s12, %s10648_s12, %s10647_s17  }
  0x75   : > { %s10650_s7 = sld [smem:[#allocation49_spill]]  ;;  %s474_s2 = scalar_lea.vmem [#allocation11], %s8605_s21 }
  0x76   : > { %s481_s25 = sshll.u32 %s474_s2, 4  ;;  %s8700_s25 = int_to_ptr.vmem [resolvable:$true] %s481_s25 }
  0x7b   : > { %s8697_s8 = scalar_lea.hbm %s10650_s7, %s8610_s10  ;;  %s8228_s0 = scalar_lea.hbm %s10650_s7, 1024 }
  0x7c   : > { %s8223_s28 = scalar_lea.hbm %s8697_s8, 512  ;;  %p8229_p6 = scmp.lt.u32.totalorder %s8697_s8, %s10650_s7 }
  0x7d   : > { %p8224_p2 = scmp.ne.s32.totalorder %s8697_s8, %s8223_s28  ;;  %p8230_p8 = scmp.lt.u32.totalorder %s8228_s0, %s8223_s28 }
  0x7e   : > { %p8232_p4 = scmp.lt.u32.totalorder %s8223_s28, %s8697_s8 }
  0x7f   : > { %p8226_p10 = pnand %p8224_p2, %p8632_p13  ;;  %p8231_p1 = por %p8230_p8, %p8229_p6 }
  0x81   : > { %p8227_p3 = pneg %p8226_p10  ;;  %p8233_p5 = por %p8232_p4, %p8231_p1 }
  0x83   : > { %p8234_p11 = pnand %p8233_p5, %p8227_p3 }
  0x85   : > { %8237 = shalt.err (!%p8234_p11)
}
  0x86   : > { %s8238_s2 = scalar_lea.vmem %s8700_s25, 512  ;;  %s8436_s18 = smov [#allocation11]  }
  0x87   : > { %p8239_p0 = scmp.ne.s32.totalorder %s8700_s25, %s8238_s2  ;;  %s8243_s14 = sshll.u32 %s8436_s18, 4  ;;  %s8244_s14 = int_to_ptr.vmem [resolvable:$false] %s8243_s14 }
  0x88   : > { %s8245_s3 = scalar_lea.vmem %s8244_s14, 1024  ;;  %p8246_p2 = scmp.lt.s32.totalorder %s8700_s25, %s8244_s14 }
  0x89   : > { %p8241_p7 = pnand %p8239_p0, %p8632_p13  ;;  %p8247_p10 = scmp.lt.s32.totalorder %s8245_s3, %s8238_s2 }
  0x8b   : > { %p8242_p9 = pneg %p8241_p7  ;;  %p8248_p6 = por %p8247_p10, %p8246_p2 }
  0x8d   : > { %p8249_p8 = pnand %p8248_p6, %p8242_p9 }
  0x8f   : > { %8252 = shalt.err (!%p8249_p8)
}
  0x90   : > { %7546 = dma.hbm_to_vmem [thread:$0]  (!%p10645_p12), %s8697_s8, 512, %s8700_s25, %s8626_s13, %s10648_s12, %s10648_s12, %s10647_s17  }
  0x91   : > { %s10651_s9 = sld [smem:[#allocation51_spill]]  ;;  %s501_s2 = scalar_lea.vmem [#allocation12], %s8605_s21 }
  0x92   : > { %s508_s18 = sshll.u32 %s501_s2, 4  ;;  %s8734_s18 = int_to_ptr.vmem [resolvable:$true] %s508_s18 }
  0x97   : > { %s8731_s19 = scalar_lea.hbm %s10651_s9, %s8610_s10  ;;  %s8258_s25 = scalar_lea.hbm %s10651_s9, 1024 }
  0x98   : > { %s8253_s14 = scalar_lea.hbm %s8731_s19, 512  ;;  %p8259_p5 = scmp.lt.u32.totalorder %s8731_s19, %s10651_s9 }
  0x99   : > { %p8254_p3 = scmp.ne.s32.totalorder %s8731_s19, %s8253_s14  ;;  %p8260_p11 = scmp.lt.u32.totalorder %s8258_s25, %s8253_s14 }
  0x9a   : > { %p8262_p7 = scmp.lt.u32.totalorder %s8253_s14, %s8731_s19 }
  0x9b   : > { %p8256_p1 = pnand %p8254_p3, %p8632_p13  ;;  %p8261_p0 = por %p8260_p11, %p8259_p5 }
  0x9d   : > { %p8257_p4 = pneg %p8256_p1  ;;  %p8263_p9 = por %p8262_p7, %p8261_p0 }
  0x9f   : > { %p8264_p2 = pnand %p8263_p9, %p8257_p4 }
  0xa1   : > { %8267 = shalt.err (!%p8264_p2)
}
  0xa2   : > { %s8268_s2 = scalar_lea.vmem %s8734_s18, 512  ;;  %s8437_s3 = smov [#allocation12]  }
  0xa3   : > { %p8269_p10 = scmp.ne.s32.totalorder %s8734_s18, %s8268_s2  ;;  %s8273_s8 = sshll.u32 %s8437_s3, 4  ;;  %s8274_s8 = int_to_ptr.vmem [resolvable:$false] %s8273_s8 }
  0xa4   : > { %s8275_s28 = scalar_lea.vmem %s8274_s8, 1024  ;;  %p8276_p3 = scmp.lt.s32.totalorder %s8734_s18, %s8274_s8 }
  0xa5   : > { %p8271_p6 = pnand %p8269_p10, %p8632_p13  ;;  %p8277_p1 = scmp.lt.s32.totalorder %s8275_s28, %s8268_s2 }
  0xa7   : > { %p8272_p8 = pneg %p8271_p6  ;;  %p8278_p5 = por %p8277_p1, %p8276_p3 }
  0xa9   : > { %p8279_p11 = pnand %p8278_p5, %p8272_p8 }
  0xab   : > { %8282 = shalt.err (!%p8279_p11)
}
  0xac   : > { %7549 = dma.hbm_to_vmem [thread:$0]  (!%p10645_p12), %s8731_s19, 512, %s8734_s18, %s8626_s13, %s10648_s12, %s10648_s12, %s10647_s17  }
  0xad   : > { %s8438_s14 = smov [#allocation7]   ;;  %s8765_s2 = scalar_lea.hbm %s10592_s11, %s8610_s10 }
  0xae   : > { %s399_s25 = sshll.u32 %s8438_s14, 4  ;;  %s8283_s5 = scalar_lea.hbm %s10582_s1, 512  ;;  %s400_s25 = int_to_ptr.vmem [resolvable:$true] %s399_s25 }
  0xaf   : > { %p8284_p4 = scmp.ne.s32.totalorder %s10582_s1, %s8283_s5  ;;  %p10652_p0 = scmp.ne.s32.totalorder %s10639_s15, 0 }
  0xb0   : > { %p8290_p10 = scmp.lt.u32.totalorder %s8283_s5, %s10582_s1 }
  0xb1   : > { %p10653_p7 = pneg %p10652_p0 }
  0xb3   : > { %p8286_p9 = pnand %p8284_p4, %p10653_p7 }
  0xb5   : > { %p8287_p2 = pneg %p8286_p9 }
  0xb7   : > { %p8292_p6 = pnand %p8290_p10, %p8287_p2 }
  0xb9   : > { %8295 = shalt.err (!%p8292_p6)
}
  0xba   : > { %s8296_s10 = scalar_lea.vmem %s400_s25, 512  ;;  %p10654_p3 = pmov %p10653_p7 }
  0xbb   : > { %p8297_p8 = scmp.ne.s32.totalorder %s400_s25, %s8296_s10  ;;  %p8304_p11 = scmp.lt.s32.totalorder %s400_s25, %s400_s25 }
  0xbc   : > { %p8305_p12 = scmp.lt.s32.totalorder %s8296_s10, %s8296_s10 }
  0xbd   : > { %p8299_p1 = pnand %p8297_p8, %p10654_p3 }
  0xbe   : > { %p8306_p13 = por %p8305_p12, %p8304_p11 }
  0xbf   : > { %p8300_p5 = pneg %p8299_p1 }
  0xc1   : > { %p8307_p4 = pnand %p8306_p13, %p8300_p5 }
  0xc3   : > { %8310 = shalt.err (!%p8307_p4)
}
  0xc4   : > { %7536 = dma.hbm_to_vmem [thread:$0]  (!%p10652_p0), %s10582_s1, 512, %s400_s25, [#allocation8], %s10648_s12, %s10648_s12, %s10647_s17  }
  0xc5   : > { %s528_s9 = scalar_lea.vmem [#allocation13], %s8605_s21  ;;  %s8311_s0 = scalar_lea.hbm %s8765_s2, 512 }
  0xc6   : > { %s535_s14 = sshll.u32 %s528_s9, 4  ;;  %p8312_p12 = scmp.ne.s32.totalorder %s8765_s2, %s8311_s0  ;;  %s8791_s14 = int_to_ptr.vmem [resolvable:$true] %s535_s14 }
  0xc7   : > { %p10655_p13 = scmp.ne.s32.totalorder %s10646_s6, 0  ;;  %s8316_s8 = scalar_lea.hbm %s10592_s11, 1024 }
  0xc8   : > { %p8317_p2 = scmp.lt.u32.totalorder %s8765_s2, %s10592_s11  ;;  %p8318_p10 = scmp.lt.u32.totalorder %s8316_s8, %s8311_s0 }
  0xc9   : > { %p8314_p7 = pnand %p8312_p12, %p10655_p13  ;;  %p8320_p0 = scmp.lt.u32.totalorder %s8311_s0, %s8765_s2 }
  0xca   : > { %p8319_p6 = por %p8318_p10, %p8317_p2 }
  0xcb   : > { %p8315_p9 = pneg %p8314_p7 }
  0xcc   : > { %p8321_p8 = por %p8320_p0, %p8319_p6 }
  0xce   : > { %p8322_p3 = pnand %p8321_p8, %p8315_p9 }
  0xd0   : > { %8325 = shalt.err (!%p8322_p3)
}
  0xd1   : > { %s8326_s21 = scalar_lea.vmem %s8791_s14, 512  ;;  %s8439_s25 = smov [#allocation13]  }
  0xd2   : > { %p8327_p1 = scmp.ne.s32.totalorder %s8791_s14, %s8326_s21  ;;  %s8331_s18 = sshll.u32 %s8439_s25, 4  ;;  %s8332_s18 = int_to_ptr.vmem [resolvable:$false] %s8331_s18 }
  0xd3   : > { %s8333_s10 = scalar_lea.vmem %s8332_s18, 1024  ;;  %p8334_p4 = scmp.lt.s32.totalorder %s8791_s14, %s8332_s18 }
  0xd4   : > { %p8329_p5 = pnand %p8327_p1, %p10655_p13  ;;  %p8335_p12 = scmp.lt.s32.totalorder %s8333_s10, %s8326_s21 }
  0xd6   : > { %p8330_p11 = pneg %p8329_p5  ;;  %p8336_p7 = por %p8335_p12, %p8334_p4 }
  0xd8   : > { %p8337_p2 = pnand %p8336_p7, %p8330_p11 }
  0xda   : > { %8340 = shalt.err (!%p8337_p2)
}
  0xdb   : > { %p10656_p9 = scmp.ne.s32.totalorder %s10640_s16, 0  ;;  %p10657_p13 = scmp.ne.s32.totalorder %s10638_s30, 0 }
  0xdd   : > { %7552 = dma.hbm_to_vmem [thread:$0]  (!%p10656_p9), %s8765_s2, 512, %s8791_s14, %s8626_s13, %s10648_s12, %s10648_s12, %s10647_s17  }
  0xde   : > { %547 = sbr.rel (%p10657_p13) target bundleno = 5599 (0x15df), region = 68 }
  0xe5   : > { %p10658_p10 = scmp.eq.s32.totalorder %s8542_s27, 0 }
  0xe7   : > { %8392 = dma.done.wait (%p10658_p10), [#allocation5], 1024   ;;  %p10659_p6 = pmov %p10658_p10 }
  0xe9   : > { %8394 = vsyncadd (%p10659_p6), [#allocation5], 4294966272  ;;  %p10660_p0 = pmov %p10659_p6 }
  0xeb   : > { %8396 = dma.done.wait (%p10660_p0), [#allocation8], 512   ;;  %p10661_p8 = pmov %p10660_p0 }
  0xec   : > { %s557_s16 = sand.u32 1, %s8542_s27   ;;  %s559_s13 = sand.u32 1, %s8413_s22  }
  0xed   : > { %8398 = vsyncadd (%p10661_p8), [#allocation8], 4294966784  ;;  %s5811_s6 = sshll.u32 %s559_s13, 5  ;;  %s558_s30 = scalar_lea.sflag [#allocation5], %s557_s16 }
  0xee   : > { %s8830_s17 = scalar_lea.vmem [#allocation9], %s5811_s6  ;;  %p10662_p3 = scmp.ne.s32.totalorder %s10637_s29, 0 }
  0xf0   : > { %8400 = dma.done.wait (%p10662_p3), %s558_s30, 2560  }
  0xf1   : > { %8402 = vsyncadd (%p10662_p3), %s558_s30, 4294964736  ;;  %p666_p1 = scmp.lt.s32.totalorder %s8421_s24, 1  ;;  %s10663_s0 = sld [smem:[#allocation48_spill]] }
  0xf2   : > { %s10664_s8 = sld [smem:[#allocation50_spill]]  ;;  %s10665_s25 = sld [smem:[#allocation52_spill]] }
  0xf3   : > { %s8838_s12 = scalar_select %p666_p1, %s8421_s24, 1 }
  0xf4   : > { %s8858_s10 = scalar_lea.vmem [#allocation10], %s5811_s6  ;;  %s8860_s16 = scalar_lea.vmem [#allocation11], %s5811_s6 }
  0xf5   : > { %s8844_s7 = scalar_lea.vmem %s10585_s4, %s8838_s12  ;;  %s8862_s13 = scalar_lea.vmem [#allocation12], %s5811_s6 }
  0xf6   : > { %s8864_s30 = scalar_lea.vmem [#allocation13], %s5811_s6  ;;  %p5816_p5 = scmp.ne.s32.totalorder %s8421_s24, 0 }
  0xf7   : > { %s671_s15 = scalar_lea.vmem %s10663_s0, %s8838_s12  ;;  %v729_v0 = vld [vmem:[#allocation4 + $0x20] sm:$0xff] (!%p5816_p5)  ;;  %v730_v2 = vld [vmem:[#allocation4 + $0x28] sm:$0xff] (!%p5816_p5)  ;;  %v731_v7 = vld [vmem:[#allocation4 + $0x30] sm:$0xff] (!%p5816_p5)  ;;  %vm719_vm0 = vcmask (!%p5816_p5), 261120   ;;  %s10666_s5 = sld [smem:[#allocation45_spill]] (!%p5816_p5) }
  0xf8   : > { %s674_s28 = scalar_lea.vmem %s10664_s8, %s8838_s12  ;;  %s677_s18 = scalar_lea.vmem %s10665_s25, %s8838_s12  ;;  %v683_v1 = vld [vmem:[#allocation4] sm:$0xff] (!%p5816_p5)  ;;  %733 = vxpose.xlu1.b32.start [1/4] (short) (narrow) (!%p5816_p5), %v729_v0, 64  ;;  %v684_v3 = vld [vmem:[#allocation4 + $0x8] sm:$0xff] (!%p5816_p5)  ;;  %v685_v8 = vld [vmem:[#allocation4 + $0x10] sm:$0xff] (!%p5816_p5) }
  0xf9   : > { %682 = sbr.rel (%p5816_p5) target bundleno = 632 (0x278), region = 100  ;;  %687 = vxpose.xlu0.b32.start [1/4] (short) (narrow) (!%p5816_p5), %v683_v1, 64  ;;  %v789_v4 = vld [vmem:[#allocation7] sm:$0xff] (!%p5816_p5)  ;;  %v790_v5 = vld [vmem:[#allocation7 + $0x8] sm:$0xff] (!%p5816_p5)  ;;  %v791_v9 = vld [vmem:[#allocation7 + $0x10] sm:$0xff] (!%p5816_p5) }
  0xfa   : > { %v7136_v6 = vpack.c.bf16 (!%p5816_p5), %v790_v5, %v789_v4  ;;  %v792_v10 = vld [vmem:[#allocation7 + $0x18] sm:$0xff] (!%p5816_p5) }
  0xfb   : > { %v7140_v11 = vpack.c.bf16 (!%p5816_p5), %v792_v10, %v791_v9  ;;  %v732_v12 = vld [vmem:[#allocation4 + $0x38] sm:$0xff] (!%p5816_p5) }
  0xfc   : > { %734 = vxpose.xlu1.b32.cont [2/4] (short) (narrow) (!%p5816_p5), %v730_v2, 64  ;;  %7137 = vmatprep.subr.bf16.mxu0 (!%p5816_p5), %v7136_v6  ;;  %v686_v13 = vld [vmem:[#allocation4 + $0x18] sm:$0xff] (!%p5816_p5) }
  0xfd   : > { %688 = vxpose.xlu0.b32.cont [2/4] (short) (narrow) (!%p5816_p5), %v684_v3, 64  ;;  %7504 = vmatprep.subr.bf16.mxu1 (!%p5816_p5), %v7136_v6  ;;  %v5833_v47 = vld [vmem:[%s10666_s5] ss:$0 sm:$0xff] (!%p5816_p5) }
  0xfe   : > { %7139 = vmatpush3.bf16.msra.mxu0 (!%p5816_p5), %v7136_v6  ;;  %7506 = vmatpush3.bf16.msra.mxu1 (!%p5816_p5), %v7136_v6 }
  0xff   : > { %7141 = vmatprep.subr.bf16.mxu0 (!%p5816_p5), %v7140_v11  ;;  %7505 = vmatprep.subr.bf16.mxu1 (!%p5816_p5), %v7140_v11 }
 0x100   : > { %735 = vxpose.xlu1.b32.cont [3/4] (short) (narrow) %v731_v7, 64 }
 0x101   : > { %689 = vxpose.xlu0.b32.cont [3/4] (short) (narrow) %v685_v8, 64 }
 0x102   : > { %7143 = vmatpush3.bf16.msra.mxu0 %v7140_v11  ;;  %7507 = vmatpush3.bf16.msra.mxu1 %v7140_v11 }
 0x104   : > { %736 = vxpose.xlu1.b32.end [4/4] (short) (narrow) %v732_v12, 64 }
 0x105   : > { %690 = vxpose.xlu0.b32.end [4/4] (short) (narrow) %v686_v13, 64 }
 0x178   : > { %v749_v14 = vpop.trf.xlu1 }
 0x179   : > { %v703_v15 = vpop.trf.xlu0  ;;  %765 = vst.msk [vmem:[#allocation2 + $0x40] sm:$0xff] %vm719_vm0, %v749_v14 }
 0x17a   : > { %720 = vst.msk [vmem:[#allocation2] sm:$0xff] %vm719_vm0, %v703_v15 }
 0x17c   : > { %v750_v16 = vpop.trf.xlu1 }
 0x17d   : > { %v704_v17 = vpop.trf.xlu0  ;;  %766 = vst.msk [vmem:[#allocation2 + $0x48] sm:$0xff] %vm719_vm0, %v750_v16 }
 0x17e   : > { %721 = vst.msk [vmem:[#allocation2 + $0x8] sm:$0xff] %vm719_vm0, %v704_v17 }
 0x180   : > { %v751_v18 = vpop.trf.xlu1  ;;  %v781_v21 = vld [vmem:[#allocation2 + $0x40] sm:$0xff] }
 0x181   : > { %v705_v19 = vpop.trf.xlu0  ;;  %v773_v20 = vld [vmem:[#allocation2] sm:$0xff]  ;;  %767 = vst.msk [vmem:[#allocation2 + $0x50] sm:$0xff] %vm719_vm0, %v751_v18  ;;  %6516 = vmatprep.mubr.msk.f32.mxu1 %vm719_vm0, %v781_v21 }
 0x182   : > { %722 = vst.msk [vmem:[#allocation2 + $0x10] sm:$0xff] %vm719_vm0, %v705_v19  ;;  %6504 = vmatprep.mubr.msk.f32.mxu0 %vm719_vm0, %v773_v20 }
 0x184   : > { %v752_v22 = vpop.trf.xlu1  ;;  %v782_v25 = vld [vmem:[#allocation2 + $0x48] sm:$0xff] }
 0x185   : > { %v706_v23 = vpop.trf.xlu0  ;;  %v774_v24 = vld [vmem:[#allocation2 + $0x8] sm:$0xff]  ;;  %768 = vst.msk [vmem:[#allocation2 + $0x58] sm:$0xff] %vm719_vm0, %v752_v22  ;;  %6517 = vmatmul.mubr.msk.f32.vlgmr.msra.gmra.mrb[0].mxu1 %vm719_vm0, %v782_v25 }
 0x186   : > { %723 = vst.msk [vmem:[#allocation2 + $0x18] sm:$0xff] %vm719_vm0, %v706_v23  ;;  %6505 = vmatmul.mubr.msk.f32.vlgmr.msra.gmra.mrb[0].mxu0 %vm719_vm0, %v774_v24 }
 0x188   : > { %v753_v26 = vpop.trf.xlu1  ;;  %v783_v29 = vld [vmem:[#allocation2 + $0x50] sm:$0xff] }
 0x189   : > { %v707_v27 = vpop.trf.xlu0  ;;  %v775_v28 = vld [vmem:[#allocation2 + $0x10] sm:$0xff]  ;;  %769 = vst.msk [vmem:[#allocation2 + $0x60] sm:$0xff] %vm719_vm0, %v753_v26  ;;  %6519 = vmatprep.mubr.msk.f32.mxu1 %vm719_vm0, %v783_v29 }
 0x18a   : > { %724 = vst.msk [vmem:[#allocation2 + $0x20] sm:$0xff] %vm719_vm0, %v707_v27  ;;  %6507 = vmatprep.mubr.msk.f32.mxu0 %vm719_vm0, %v775_v28 }
 0x18c   : > { %v754_v30 = vpop.trf.xlu1  ;;  %v784_v33 = vld [vmem:[#allocation2 + $0x58] sm:$0xff] }
 0x18d   : > { %v708_v31 = vpop.trf.xlu0  ;;  %v776_v32 = vld [vmem:[#allocation2 + $0x18] sm:$0xff]  ;;  %770 = vst.msk [vmem:[#allocation2 + $0x68] sm:$0xff] %vm719_vm0, %v754_v30  ;;  %6520 = vmatmul.mubr.msk.f32.gmra.mrb[2].mxu1 %vm719_vm0, %v784_v33 }
 0x18e   : > { %725 = vst.msk [vmem:[#allocation2 + $0x28] sm:$0xff] %vm719_vm0, %v708_v31  ;;  %6508 = vmatmul.mubr.msk.f32.gmra.mrb[2].mxu0 %vm719_vm0, %v776_v32 }
 0x190   : > { %v755_v34 = vpop.trf.xlu1  ;;  %v785_v37 = vld [vmem:[#allocation2 + $0x60] sm:$0xff] }
 0x191   : > { %v709_v35 = vpop.trf.xlu0  ;;  %v777_v36 = vld [vmem:[#allocation2 + $0x20] sm:$0xff]  ;;  %771 = vst.msk [vmem:[#allocation2 + $0x70] sm:$0xff] %vm719_vm0, %v755_v34  ;;  %6522 = vmatprep.mubr.msk.f32.mxu1 %vm719_vm0, %v785_v37 }
 0x192   : > { %726 = vst.msk [vmem:[#allocation2 + $0x30] sm:$0xff] %vm719_vm0, %v709_v35  ;;  %6510 = vmatprep.mubr.msk.f32.mxu0 %vm719_vm0, %v777_v36 }
 0x194   : > { %v756_v38 = vpop.trf.xlu1  ;;  %v786_v41 = vld [vmem:[#allocation2 + $0x68] sm:$0xff] }
 0x195   : > { %v710_v39 = vpop.trf.xlu0  ;;  %v778_v40 = vld [vmem:[#allocation2 + $0x28] sm:$0xff]  ;;  %772 = vst.msk [vmem:[#allocation2 + $0x78] sm:$0xff] %vm719_vm0, %v756_v38  ;;  %6523 = vmatmul.mubr.msk.f32.gmra.mrb[4].mxu1 %vm719_vm0, %v786_v41 }
 0x196   : > { %727 = vst.msk [vmem:[#allocation2 + $0x38] sm:$0xff] %vm719_vm0, %v710_v39  ;;  %6511 = vmatmul.mubr.msk.f32.gmra.mrb[4].mxu0 %vm719_vm0, %v778_v40 }
 0x198   : > { %v8897_v43 = vld [vmem:[#allocation2 + $0x70] sm:$0xff] }
 0x199   : > { %v8895_v42 = vld [vmem:[#allocation2 + $0x30] sm:$0xff]  ;;  %6525 = vmatprep.mubr.msk.f32.mxu1 %vm719_vm0, %v8897_v43 }
 0x19a   : > { %6513 = vmatprep.mubr.msk.f32.mxu0 %vm719_vm0, %v8895_v42 }
 0x19c   : > { %v788_v45 = vld [vmem:[#allocation2 + $0x78] sm:$0xff] }
 0x19d   : > { %v780_v44 = vld [vmem:[#allocation2 + $0x38] sm:$0xff]  ;;  %6526 = vmatmul.mubr.msk.f32.gmra.mrb[6].mxu1 %vm719_vm0, %v788_v45 }
 0x19e   : > { %6514 = vmatmul.mubr.msk.f32.gmra.mrb[6].mxu0 %vm719_vm0, %v780_v44 }
 0x258   : > { %v6518_v48 = vpop.f32.mrb[0].mxu1 }
 0x259   : > { %v6506_v46 = vpop.f32.mrb[0].mxu0  ;;  %v995_v50 = vadd.f32 %v6518_v48, %v782_v25  ;;  %v947_v52 = vpop.f32.mrb[1].mxu1 }
 0x25a   : > { %v987_v49 = vadd.f32 %v6506_v46, %v774_v24  ;;  %v907_v51 = vpop.f32.mrb[1].mxu0  ;;  %v994_v54 = vadd.f32 %v947_v52, %v781_v21 }
 0x25b   : > { %v986_v53 = vadd.f32 %v907_v51, %v773_v20  ;;  %v1018_v56 = vadd.f32 %v5833_v47, %v995_v50 }
 0x25c   : > { %v1010_v55 = vadd.f32 %v5833_v47, %v987_v49  ;;  %v1017_v58 = vadd.f32 %v5833_v47, %v994_v54 }
 0x25d   : > { %v1009_v57 = vadd.f32 %v5833_v47, %v986_v53  ;;  %1034 = vst.msk [vmem:[#allocation2 + $0x48] sm:$0xff] %vm719_vm0, %v1018_v56 }
 0x25e   : > { %1026 = vst.msk [vmem:[#allocation2 + $0x8] sm:$0xff] %vm719_vm0, %v1010_v55  ;;  %1033 = vst.msk [vmem:[#allocation2 + $0x40] sm:$0xff] %vm719_vm0, %v1017_v58 }
 0x25f   : > { %1025 = vst.msk [vmem:[#allocation2] sm:$0xff] %vm719_vm0, %v1009_v57 }
 0x260   : > { %v6521_v60 = vpop.f32.mrb[2].mxu1 }
 0x261   : > { %v6509_v59 = vpop.f32.mrb[2].mxu0  ;;  %v997_v62 = vadd.f32 %v6521_v60, %v784_v33  ;;  %v957_v0 = vpop.f32.mrb[3].mxu1 }
 0x262   : > { %v989_v61 = vadd.f32 %v6509_v59, %v776_v32  ;;  %v917_v63 = vpop.f32.mrb[3].mxu0  ;;  %v996_v2 = vadd.f32 %v957_v0, %v783_v29 }
 0x263   : > { %v988_v1 = vadd.f32 %v917_v63, %v775_v28  ;;  %v1020_v4 = vadd.f32 %v5833_v47, %v997_v62 }
 0x264   : > { %v1012_v3 = vadd.f32 %v5833_v47, %v989_v61  ;;  %v1019_v6 = vadd.f32 %v5833_v47, %v996_v2 }
 0x265   : > { %v1011_v5 = vadd.f32 %v5833_v47, %v988_v1  ;;  %1036 = vst.msk [vmem:[#allocation2 + $0x58] sm:$0xff] %vm719_vm0, %v1020_v4 }
 0x266   : > { %1028 = vst.msk [vmem:[#allocation2 + $0x18] sm:$0xff] %vm719_vm0, %v1012_v3  ;;  %1035 = vst.msk [vmem:[#allocation2 + $0x50] sm:$0xff] %vm719_vm0, %v1019_v6 }
 0x267   : > { %1027 = vst.msk [vmem:[#allocation2 + $0x10] sm:$0xff] %vm719_vm0, %v1011_v5 }
 0x268   : > { %v6524_v8 = vpop.f32.mrb[4].mxu1 }
 0x269   : > { %v6512_v7 = vpop.f32.mrb[4].mxu0  ;;  %v999_v10 = vadd.f32 %v6524_v8, %v786_v41  ;;  %v967_v12 = vpop.f32.mrb[5].mxu1 }
 0x26a   : > { %v991_v9 = vadd.f32 %v6512_v7, %v778_v40  ;;  %v927_v11 = vpop.f32.mrb[5].mxu0  ;;  %v998_v14 = vadd.f32 %v967_v12, %v785_v37 }
 0x26b   : > { %v990_v13 = vadd.f32 %v927_v11, %v777_v36  ;;  %v1022_v16 = vadd.f32 %v5833_v47, %v999_v10 }
 0x26c   : > { %v1014_v15 = vadd.f32 %v5833_v47, %v991_v9  ;;  %v1021_v18 = vadd.f32 %v5833_v47, %v998_v14 }
 0x26d   : > { %v1013_v17 = vadd.f32 %v5833_v47, %v990_v13  ;;  %1038 = vst.msk [vmem:[#allocation2 + $0x68] sm:$0xff] %vm719_vm0, %v1022_v16 }
 0x26e   : > { %1030 = vst.msk [vmem:[#allocation2 + $0x28] sm:$0xff] %vm719_vm0, %v1014_v15  ;;  %1037 = vst.msk [vmem:[#allocation2 + $0x60] sm:$0xff] %vm719_vm0, %v1021_v18 }
 0x26f   : > { %1029 = vst.msk [vmem:[#allocation2 + $0x20] sm:$0xff] %vm719_vm0, %v1013_v17 }
 0x270   : > { %v6527_v20 = vpop.f32.mrb[6].mxu1 }
 0x271   : > { %v6515_v19 = vpop.f32.mrb[6].mxu0  ;;  %v1001_v22 = vadd.f32 %v6527_v20, %v788_v45  ;;  %v977_v24 = vpop.f32.mrb[7].mxu1 }
 0x272   : > { %v993_v21 = vadd.f32 %v6515_v19, %v780_v44  ;;  %v937_v23 = vpop.f32.mrb[7].mxu0  ;;  %v1000_v26 = vadd.f32 %v977_v24, %v8897_v43 }
 0x273   : > { %v992_v25 = vadd.f32 %v937_v23, %v8895_v42  ;;  %v1024_v28 = vadd.f32 %v5833_v47, %v1001_v22 }
 0x274   : > { %v1016_v27 = vadd.f32 %v5833_v47, %v993_v21  ;;  %v1023_v30 = vadd.f32 %v5833_v47, %v1000_v26 }
 0x275   : > { %v1015_v29 = vadd.f32 %v5833_v47, %v992_v25  ;;  %1040 = vst.msk [vmem:[#allocation2 + $0x78] sm:$0xff] %vm719_vm0, %v1024_v28 }
 0x276   : > { %1032 = vst.msk [vmem:[#allocation2 + $0x38] sm:$0xff] %vm719_vm0, %v1016_v27  ;;  %1039 = vst.msk [vmem:[#allocation2 + $0x70] sm:$0xff] %vm719_vm0, %v1023_v30 }
 0x277   : > { %1031 = vst.msk [vmem:[#allocation2 + $0x30] sm:$0xff] %vm719_vm0, %v1015_v29 }
 0x278 PF: > { %v1262_v31 = vld [vmem:[%s8858_s10] sm:$0xff]  ;;  %v1263_v32 = vld [vmem:[%s8858_s10 + $0x8] sm:$0xff]  ;;  %v1264_v33 = vld [vmem:[%s8858_s10 + $0x10] sm:$0xff]  ;;  %vm1068_vm1 = vcmask 261120   ;;  %vm1574_vm2 = vcmask 64512   ;;  %s8440_s0 = smov 120  }
 0x279   : > { %v7152_v34 = vpack.c.bf16 %v1263_v32, %v1262_v31  ;;  %v1265_v35 = vld [vmem:[%s8858_s10 + $0x18] sm:$0xff]  ;;  %v8930_v36 = vld [vmem:[#allocation2] sm:$0xff]  ;;  %v1058_v39 = vld [vmem:[%s8830_s17 + $0x8] sm:$0xff]  ;;  %vm1728_vm4 = vcmask 523264   ;;  %s8444_s19 = smov 16   ;;  %s8445_s21 = smov 24  }
 0x27a   : > { %v7156_v37 = vpack.c.bf16 %v1265_v35, %v1264_v33  ;;  %6568 = vmatprep.mubr.msk.f32.mxu1 %vm1068_vm1, %v8930_v36  ;;  %v1057_v38 = vld [vmem:[%s8830_s17] sm:$0xff]  ;;  %6536 = vmatprep.mubr.msk.f32.mxu0 %vm1068_vm1, %v8930_v36  ;;  %v1059_v41 = vld [vmem:[%s8830_s17 + $0x10] sm:$0xff]  ;;  %v1060_v42 = vld [vmem:[%s8830_s17 + $0x18] sm:$0xff]  ;;  %vm2404_vm5 = vcmask 130112   ;;  %vm2855_vm6 = vcmask 195712   ;;  %vm3306_vm7 = vcmask 261312  }
 0x27b   : > { %7153 = vmatprep.subr.bf16.mxu1 %v7152_v34  ;;  %v7144_v40 = vpack.c.bf16 %v1058_v39, %v1057_v38  ;;  %v7148_v43 = vpack.c.bf16 %v1060_v42, %v1059_v41  ;;  %v1418_v44 = vld [vmem:[%s8860_s16] sm:$0xff]  ;;  %v1419_v45 = vld [vmem:[%s8860_s16 + $0x8] sm:$0xff]  ;;  %v1043_v48 = vld [vmem:[#allocation2 + $0x10] sm:$0xff]  ;;  %p6110_p11 = scmp.ne.s32.totalorder %s8421_s24, 1 }
 0x27c   : > { %7155 = vmatpush3.bf16.msra.mxu1 %v7152_v34  ;;  %v1042_v46 = vld [vmem:[#allocation2 + $0x8] sm:$0xff]  ;;  %v7160_v47 = vpack.c.bf16 %v1419_v45, %v1418_v44  ;;  %v1420_v49 = vld [vmem:[%s8860_s16 + $0x10] sm:$0xff]  ;;  %v1421_v50 = vld [vmem:[%s8860_s16 + $0x18] sm:$0xff] }
 0x27d   : > { %7157 = vmatprep.subr.bf16.mxu1 %v7156_v37  ;;  %7145 = vmatprep.subr.bf16.mxu0 %v7144_v40  ;;  %v1044_v51 = vld [vmem:[#allocation2 + $0x18] sm:$0xff]  ;;  %v1045_v52 = vld [vmem:[#allocation2 + $0x20] sm:$0xff]  ;;  %v7164_v53 = vpack.c.bf16 %v1421_v50, %v1420_v49  ;;  %v1046_v54 = vld [vmem:[#allocation2 + $0x28] sm:$0xff] }
 0x27e   : > { %7147 = vmatpush3.bf16.msra.mxu0 %v7144_v40  ;;  %v1047_v55 = vld [vmem:[#allocation2 + $0x30] sm:$0xff]  ;;  %v1048_v56 = vld [vmem:[#allocation2 + $0x38] sm:$0xff]  ;;  %v1049_v57 = vld [vmem:[#allocation2 + $0x40] sm:$0xff] }
 0x27f   : > { %7149 = vmatprep.subr.bf16.mxu0 %v7148_v43  ;;  %v1050_v58 = vld [vmem:[#allocation2 + $0x48] sm:$0xff]  ;;  %v1051_v59 = vld [vmem:[#allocation2 + $0x50] sm:$0xff]  ;;  %v1052_v60 = vld [vmem:[#allocation2 + $0x58] sm:$0xff] }
 0x280   : > { %7159 = vmatpush3.bf16.msra.mxu1 %v7156_v37  ;;  %v1053_v61 = vld [vmem:[#allocation2 + $0x60] sm:$0xff]  ;;  %v1054_v62 = vld [vmem:[#allocation2 + $0x68] sm:$0xff]  ;;  %v1055_v63 = vld [vmem:[#allocation2 + $0x70] sm:$0xff] }
 0x281   : > { %v1056_v0 = vld [vmem:[#allocation2 + $0x78] sm:$0xff]  ;;  %v8996_v1 = vld [vmem:[%s671_s15] ss:$0 sm:$0xff]  ;;  %vm9002_vm3 = vmpackc.low %vm1574_vm2, %vm1574_vm2  ;;  %s8441_s15 = smov 112  }
 0x282   : > { %7151 = vmatpush3.bf16.msra.mxu0 %v7148_v43  ;;  %v5834_v11 = vld [vmem:[%s8844_s7] ss:$0 sm:$0xff] }
 0x283   : > { %6569 = vmatmul.mubr.msk.f32.vlgmr.msra.gmra.mrb[0].mxu1 %vm1068_vm1, %v1042_v46  ;;  %7161 = vmatprep.subr.bf16.mxu0 %v7160_v47 }
 0x284   : > { %6571 = vmatprep.mubr.msk.f32.mxu1 %vm1068_vm1, %v1043_v48 }
 0x285   : > { %6537 = vmatmul.mubr.msk.f32.vlgmr.msra.gmra.mrb[0].mxu0 %vm1068_vm1, %v1042_v46 }
 0x286   : > { %6539 = vmatprep.mubr.msk.f32.mxu0 %vm1068_vm1, %v1043_v48  ;;  %7163 = vmatpush3.bf16.msra.mxu0 %v7160_v47 }
 0x287   : > { %6572 = vmatmul.mubr.msk.f32.gmra.mrb[2].mxu1 %vm1068_vm1, %v1044_v51  ;;  %7165 = vmatprep.subr.bf16.mxu0 %v7164_v53 }
 0x288   : > { %6574 = vmatprep.mubr.msk.f32.mxu1 %vm1068_vm1, %v1045_v52 }
 0x289   : > { %6540 = vmatmul.mubr.msk.f32.gmra.mrb[2].mxu0 %vm1068_vm1, %v1044_v51 }
 0x28a   : > { %6542 = vmatprep.mubr.msk.f32.mxu0 %vm1068_vm1, %v1045_v52  ;;  %7167 = vmatpush3.bf16.msra.mxu0 %v7164_v53  ;;  %v9138_v53 = vld [vmem:[%s674_s28] ss:$0 sm:$0xff]  ;;  %s8442_s28 = smov 104  }
 0x28b   : > { %6575 = vmatmul.mubr.msk.f32.gmra.mrb[4].mxu1 %vm1068_vm1, %v1046_v54 }
 0x28c   : > { %6577 = vmatprep.mubr.msk.f32.mxu1 %vm1068_vm1, %v1047_v55 }
 0x28d   : > { %6543 = vmatmul.mubr.msk.f32.gmra.mrb[4].mxu0 %vm1068_vm1, %v1046_v54 }
 0x28e   : > { %6545 = vmatprep.mubr.msk.f32.mxu0 %vm1068_vm1, %v1047_v55 }
 0x28f   : > { %6578 = vmatmul.mubr.msk.f32.gmra.mrb[6].mxu1 %vm1068_vm1, %v1048_v56 }
 0x290   : > { %6580 = vmatprep.mubr.msk.f32.mxu1 %vm1068_vm1, %v1049_v57 }
 0x291   : > { %6546 = vmatmul.mubr.msk.f32.gmra.mrb[6].mxu0 %vm1068_vm1, %v1048_v56 }
 0x292   : > { %6548 = vmatprep.mubr.msk.f32.mxu0 %vm1068_vm1, %v1049_v57 }
 0x293   : > { %6581 = vmatmul.mubr.msk.f32.gmra.mrb[8].mxu1 %vm1068_vm1, %v1050_v58 }
 0x294   : > { %6583 = vmatprep.mubr.msk.f32.mxu1 %vm1068_vm1, %v1051_v59 }
 0x295   : > { %6549 = vmatmul.mubr.msk.f32.gmra.mrb[8].mxu0 %vm1068_vm1, %v1050_v58 }
 0x296   : > { %6551 = vmatprep.mubr.msk.f32.mxu0 %vm1068_vm1, %v1051_v59 }
 0x297   : > { %6584 = vmatmul.mubr.msk.f32.gmra.mrb[10].mxu1 %vm1068_vm1, %v1052_v60 }
 0x298   : > { %6586 = vmatprep.mubr.msk.f32.mxu1 %vm1068_vm1, %v1053_v61 }
 0x299   : > { %6552 = vmatmul.mubr.msk.f32.gmra.mrb[10].mxu0 %vm1068_vm1, %v1052_v60 }
 0x29a   : > { %6554 = vmatprep.mubr.msk.f32.mxu0 %vm1068_vm1, %v1053_v61 }
 0x29b   : > { %6587 = vmatmul.mubr.msk.f32.gmra.mrb[12].mxu1 %vm1068_vm1, %v1054_v62 }
 0x29c   : > { %6589 = vmatprep.mubr.msk.f32.mxu1 %vm1068_vm1, %v1055_v63 }
 0x29d   : > { %6555 = vmatmul.mubr.msk.f32.gmra.mrb[12].mxu0 %vm1068_vm1, %v1054_v62 }
 0x29e   : > { %6557 = vmatprep.mubr.msk.f32.mxu0 %vm1068_vm1, %v1055_v63 }
 0x29f   : > { %6590 = vmatmul.mubr.msk.f32.gmra.mrb[14].mxu1 %vm1068_vm1, %v1056_v0 }
 0x2a1   : > { %6558 = vmatmul.mubr.msk.f32.gmra.mrb[14].mxu0 %vm1068_vm1, %v1056_v0 }
 0x2a2   : > { %6600 = vmatprep.mubr.msk.f32.mxu0 %vm1068_vm1, %v8930_v36 }
 0x2a5   : > { %6601 = vmatmul.mubr.msk.f32.vlgmr.msra.gmra.mrb[16].mxu0 %vm1068_vm1, %v1042_v46 }
 0x2a6   : > { %6603 = vmatprep.mubr.msk.f32.mxu0 %vm1068_vm1, %v1043_v48 }
 0x2a9   : > { %6604 = vmatmul.mubr.msk.f32.gmra.mrb[18].mxu0 %vm1068_vm1, %v1044_v51 }
 0x2aa   : > { %6606 = vmatprep.mubr.msk.f32.mxu0 %vm1068_vm1, %v1045_v52 }
 0x2ad   : > { %6607 = vmatmul.mubr.msk.f32.gmra.mrb[20].mxu0 %vm1068_vm1, %v1046_v54 }
 0x2ae   : > { %6609 = vmatprep.mubr.msk.f32.mxu0 %vm1068_vm1, %v1047_v55 }
 0x2b1   : > { %6610 = vmatmul.mubr.msk.f32.gmra.mrb[22].mxu0 %vm1068_vm1, %v1048_v56 }
 0x2b2   : > { %6612 = vmatprep.mubr.msk.f32.mxu0 %vm1068_vm1, %v1049_v57 }
 0x2b5   : > { %6613 = vmatmul.mubr.msk.f32.gmra.mrb[24].mxu0 %vm1068_vm1, %v1050_v58 }
 0x2b6   : > { %6615 = vmatprep.mubr.msk.f32.mxu0 %vm1068_vm1, %v1051_v59 }
 0x2b9   : > { %6616 = vmatmul.mubr.msk.f32.gmra.mrb[26].mxu0 %vm1068_vm1, %v1052_v60 }
 0x2ba   : > { %6618 = vmatprep.mubr.msk.f32.mxu0 %vm1068_vm1, %v1053_v61 }
 0x2bd   : > { %6619 = vmatmul.mubr.msk.f32.gmra.mrb[28].mxu0 %vm1068_vm1, %v1054_v62 }
 0x2be   : > { %6621 = vmatprep.mubr.msk.f32.mxu0 %vm1068_vm1, %v1055_v63 }
 0x2c1   : > { %6622 = vmatmul.mubr.msk.f32.gmra.mrb[30].mxu0 %vm1068_vm1, %v1056_v0 }
 0x356   : > { %v6570_v2 = vpop.f32.mrb[0].mxu1 }
 0x357   : > { %v1345_v3 = vadd.f32 %v6570_v2, %v8996_v1  ;;  %v1339_v4 = vpop.f32.mrb[1].mxu1 }
 0x358   : > { %v1340_v5 = vadd.f32 %v8996_v1, %v1339_v4  ;;  %v6538_v7 = vpop.f32.mrb[0].mxu0 }
 0x359   : > { %v1183_v12 = vpop.f32.mrb[1].mxu0  ;;  %v9037_v33 = vadd.f32 %v6538_v7, %v5834_v11 }
 0x35a   : > { %v6573_v8 = vpop.f32.mrb[2].mxu1  ;;  %v9006_v9 = vpack.i.bf16 %v1345_v3, %v1340_v5  ;;  %v7168_v10 = vpack.c.bf16 %v1345_v3, %v1340_v5  ;;  %v9010_v15 = vadd.f32 %v5834_v11, %v1183_v12 }
 0x35b   : > { %v1355_v13 = vadd.f32 %v6573_v8, %v8996_v1  ;;  %v1349_v14 = vpop.f32.mrb[3].mxu1 }
 0x35c   : > { %v1350_v16 = vadd.f32 %v8996_v1, %v1349_v14  ;;  %7623 = vrot.lane.b32.xlu0 %v9006_v9, %s8440_s0  ;;  %7170 = vmatprep.subr.msk.bf16.mxu1 %vm9002_vm3, %v7168_v10  ;;  %v6541_v17 = vpop.f32.mrb[2].mxu0 }
 0x35d   : > { %7173 = vmatpush3.bf16.xpose.msk.msra.mxu1 %vm9002_vm3, %v7168_v10  ;;  %6640 = vmatprep.mubr.msk.f32.mxu1 %vm1574_vm2, %v9010_v15  ;;  %v1193_v21 = vpop.f32.mrb[3].mxu0  ;;  %v9053_v38 = vadd.f32 %v6541_v17, %v5834_v11 }
 0x35e   : > { %v6576_v18 = vpop.f32.mrb[4].mxu1  ;;  %v9021_v19 = vpack.i.bf16 %v1355_v13, %v1350_v16  ;;  %v7174_v20 = vpack.c.bf16 %v1355_v13, %v1350_v16  ;;  %v9059_v39 = vadd.f32 %v5834_v11, %v1193_v21 }
 0x35f   : > { %v1365_v22 = vadd.f32 %v6576_v18, %v8996_v1  ;;  %v1359_v23 = vpop.f32.mrb[5].mxu1 }
 0x360   : > { %v1360_v24 = vadd.f32 %v8996_v1, %v1359_v23  ;;  %7628 = vrot.lane.b32.xlu0 %v9021_v19, %s8440_s0  ;;  %7176 = vmatprep.subr.msk.bf16.mxu1 %vm9002_vm3, %v7174_v20  ;;  %v6544_v25 = vpop.f32.mrb[4].mxu0 }
 0x361   : > { %v1203_v29 = vpop.f32.mrb[5].mxu0  ;;  %v9075_v42 = vadd.f32 %v6544_v25, %v5834_v11 }
 0x362   : > { %v6579_v26 = vpop.f32.mrb[6].mxu1  ;;  %v9029_v27 = vpack.i.bf16 %v1365_v22, %v1360_v24  ;;  %v7180_v28 = vpack.c.bf16 %v1365_v22, %v1360_v24  ;;  %v9065_v40 = vadd.f32 %v5834_v11, %v1203_v29 }
 0x363   : > { %v1375_v30 = vadd.f32 %v6579_v26, %v8996_v1  ;;  %v1369_v31 = vpop.f32.mrb[7].mxu1 }
 0x364   : > { %v1370_v32 = vadd.f32 %v8996_v1, %v1369_v31  ;;  %7633 = vrot.lane.b32.xlu1 %v9029_v27, %s8440_s0  ;;  %7643 = vrot.lane.b32.xlu0 %v9006_v9, %s8441_s15  ;;  %v6547_v34 = vpop.f32.mrb[6].mxu0 }
 0x365   : > { %7179 = vmatpush3.bf16.xpose.msk.msra.mxu1 %vm9002_vm3, %v7174_v20  ;;  %v1213_v37 = vpop.f32.mrb[7].mxu0  ;;  %v9081_v43 = vadd.f32 %v6547_v34, %v5834_v11 }
 0x366   : > { %v9041_v35 = vpack.i.bf16 %v1375_v30, %v1370_v32  ;;  %7182 = vmatprep.subr.msk.bf16.mxu1 %vm9002_vm3, %v7180_v28  ;;  %v7186_v36 = vpack.c.bf16 %v1375_v30, %v1370_v32  ;;  %v9071_v41 = vadd.f32 %v5834_v11, %v1213_v37  ;;  %v9143_v60 = vpop.f32.mrb[8].mxu1 }
 0x367   : > { %v9148_v2 = vpop.f32.mrb[9].mxu1 }
 0x368   : > { %7638 = vrot.lane.b32.xlu1 %v9041_v35, %s8440_s0  ;;  %1956 = vrot.lane.b32.xlu0 %v9037_v33, %s8440_s0  ;;  %v9117_v44 = vpop.f32.mrb[8].mxu0 }
 0x369   : > { %10670 = vst [vmem:[#allocation21_spill] sm:$0xff] %v9117_v44  ;;  %v9119_v45 = vpop.f32.mrb[9].mxu0 }
 0x36a   : > { %10671 = vst [vmem:[#allocation22_spill] sm:$0xff] %v9119_v45  ;;  %v9151_v5 = vpop.f32.mrb[10].mxu1 }
 0x36b   : > { %v9158_v11 = vpop.f32.mrb[11].mxu1 }
 0x36c   : > { %7653 = vrot.lane.b32.xlu0 %v9029_v27, %s8441_s15  ;;  %1954 = vrot.lane.b32.xlu1 %v9010_v15, %s8440_s0  ;;  %v9121_v46 = vpop.f32.mrb[10].mxu0 }
 0x36d   : > { %7185 = vmatpush3.bf16.xpose.msk.msra.mxu1 %vm9002_vm3, %v7180_v28  ;;  %10672 = vst [vmem:[#allocation23_spill] sm:$0xff] %v9121_v46  ;;  %v9123_v47 = vpop.f32.mrb[11].mxu0 }
 0x36e   : > { %7188 = vmatprep.subr.msk.bf16.mxu1 %vm9002_vm3, %v7186_v36  ;;  %10673 = vst [vmem:[#allocation24_spill] sm:$0xff] %v9123_v47  ;;  %v9161_v16 = vpop.f32.mrb[12].mxu1 }
 0x36f   : > { %v9168_v20 = vpop.f32.mrb[13].mxu1 }
 0x370   : > { %1960 = vrot.lane.b32.xlu0 %v9053_v38, %s8440_s0  ;;  %7648 = vrot.lane.b32.xlu1 %v9021_v19, %s8441_s15  ;;  %v9125_v48 = vpop.f32.mrb[12].mxu0 }
 0x371   : > { %10674 = vst [vmem:[#allocation25_spill] sm:$0xff] %v9125_v48  ;;  %v9127_v49 = vpop.f32.mrb[13].mxu0 }
 0x372   : > { %10675 = vst [vmem:[#allocation26_spill] sm:$0xff] %v9127_v49  ;;  %v9170_v21 = vpop.f32.mrb[14].mxu1 }
 0x373   : > { %v9176_v24 = vpop.f32.mrb[15].mxu1 }
 0x374   : > { %1962 = vrot.lane.b32.xlu0 %v9065_v40, %s8440_s0  ;;  %1958 = vrot.lane.b32.xlu1 %v9059_v39, %s8440_s0  ;;  %v9129_v50 = vpop.f32.mrb[14].mxu0 }
 0x375   : > { %7191 = vmatpush3.bf16.xpose.msk.msra.mxu1 %vm9002_vm3, %v7186_v36  ;;  %10676 = vst [vmem:[#allocation27_spill] sm:$0xff] %v9129_v50  ;;  %v9131_v51 = vpop.f32.mrb[15].mxu0 }
 0x376   : > { %10677 = vst [vmem:[#allocation28_spill] sm:$0xff] %v9131_v51 }
 0x378   : > { %1966 = vrot.lane.b32.xlu0 %v9071_v41, %s8440_s0  ;;  %7658 = vrot.lane.b32.xlu1 %v9041_v35, %s8441_s15  ;;  %v6602_v52 = vpop.f32.mrb[16].mxu0 }
 0x379   : > { %v1501_v54 = vadd.f32 %v6602_v52, %v9138_v53  ;;  %v1495_v55 = vpop.f32.mrb[17].mxu0 }
 0x37a   : > { %v1496_v56 = vadd.f32 %v9138_v53, %v1495_v55 }
 0x37c   : > { %2413 = vrot.lane.b32.xlu0 %v9010_v15, %s8441_s15  ;;  %1964 = vrot.lane.b32.xlu1 %v9075_v42, %s8440_s0  ;;  %v6605_v57 = vpop.f32.mrb[18].mxu0  ;;  %v9146_v63 = vpack.i.bf16 %v1501_v54, %v1496_v56  ;;  %v7192_v0 = vpack.c.bf16 %v1501_v54, %v1496_v56 }
 0x37d   : > { %6641 = vmatmul.mubr.msk.f32.vlgmr.msra.gmra.mrb[16].mxu1 %vm1574_vm2, %v9037_v33  ;;  %v1511_v58 = vadd.f32 %v6605_v57, %v9138_v53  ;;  %v1505_v59 = vpop.f32.mrb[19].mxu0 }
 0x37e   : > { %6643 = vmatprep.mubr.msk.f32.mxu1 %vm1574_vm2, %v9059_v39  ;;  %v1506_v61 = vadd.f32 %v9138_v53, %v1505_v59  ;;  %7193 = vmatprep.subr.bf16.mxu1 %v7192_v0 }
 0x37f   : > { %7195 = vmatpush3.bf16.msra.mxu1 %v7192_v0 }
 0x380   : > { %1968 = vrot.lane.b32.xlu1 %v9081_v43, %s8440_s0  ;;  %2417 = vrot.lane.b32.xlu0 %v9059_v39, %s8441_s15  ;;  %v6608_v62 = vpop.f32.mrb[20].mxu0  ;;  %v9153_v7 = vpack.i.bf16 %v1511_v58, %v1506_v61  ;;  %v7196_v14 = vpack.c.bf16 %v1511_v58, %v1506_v61 }
 0x381   : > { %6644 = vmatmul.mubr.msk.f32.gmra.mrb[18].mxu1 %vm1574_vm2, %v9053_v38  ;;  %v1521_v3 = vadd.f32 %v6608_v62, %v9138_v53  ;;  %v1515_v4 = vpop.f32.mrb[21].mxu0 }
 0x382   : > { %6646 = vmatprep.mubr.msk.f32.mxu1 %vm1574_vm2, %v9065_v40  ;;  %10679 = vst [vmem:[#allocation29_spill] sm:$0xff] %v9153_v7  ;;  %v1516_v8 = vadd.f32 %v9138_v53, %v1515_v4  ;;  %7197 = vmatprep.subr.bf16.mxu1 %v7196_v14 }
 0x383   : > { %7199 = vmatpush3.bf16.msra.mxu1 %v7196_v14 }
 0x384   : > { %2415 = vrot.lane.b32.xlu1 %v9037_v33, %s8441_s15  ;;  %2421 = vrot.lane.b32.xlu0 %v9065_v40, %s8441_s15  ;;  %v6611_v10 = vpop.f32.mrb[22].mxu0  ;;  %v9166_v18 = vpack.i.bf16 %v1521_v3, %v1516_v8  ;;  %v7200_v22 = vpack.c.bf16 %v1521_v3, %v1516_v8 }
 0x385   : > { %6647 = vmatmul.mubr.msk.f32.gmra.mrb[20].mxu1 %vm1574_vm2, %v9075_v42  ;;  %v1531_v12 = vadd.f32 %v6611_v10, %v9138_v53  ;;  %v1525_v13 = vpop.f32.mrb[23].mxu0 }
 0x386   : > { %6649 = vmatprep.mubr.msk.f32.mxu1 %vm1574_vm2, %v9071_v41  ;;  %v1526_v17 = vadd.f32 %v9138_v53, %v1525_v13  ;;  %10680 = vst [vmem:[#allocation30_spill] sm:$0xff] %v9166_v18  ;;  %7201 = vmatprep.subr.bf16.mxu1 %v7200_v22 }
 0x387   : > { %7203 = vmatpush3.bf16.msra.mxu1 %v7200_v22  ;;  %v1385_v22 = vadd.f32 %v9143_v60, %v8996_v1  ;;  %v1390_v60 = vadd.f32 %v8996_v1, %v9158_v11 }
 0x388   : > { %2419 = vrot.lane.b32.xlu1 %v9053_v38, %s8441_s15  ;;  %2425 = vrot.lane.b32.xlu0 %v9071_v41, %s8441_s15  ;;  %v9174_v23 = vpack.i.bf16 %v1531_v12, %v1526_v17  ;;  %v7204_v30 = vpack.c.bf16 %v1531_v12, %v1526_v17  ;;  %v9197_v3 = vpop.f32.mrb[24].mxu0 }
 0x389   : > { %6650 = vmatmul.mubr.msk.f32.gmra.mrb[22].mxu1 %vm1574_vm2, %v9081_v43  ;;  %v9201_v4 = vpop.f32.mrb[25].mxu0 }
 0x38a   : > { %10681 = vst [vmem:[#allocation31_spill] sm:$0xff] %v9174_v23  ;;  %7205 = vmatprep.subr.bf16.mxu1 %v7204_v30 }
 0x38b   : > { %7207 = vmatpush3.bf16.msra.mxu1 %v7204_v30  ;;  %v1395_v30 = vadd.f32 %v9151_v5, %v8996_v1 }
 0x38c   : > { %2423 = vrot.lane.b32.xlu1 %v9075_v42, %s8441_s15  ;;  %7663 = vrot.lane.b32.xlu0 %v9146_v63, %s8440_s0  ;;  %v9205_v8 = vpop.f32.mrb[26].mxu0 }
 0x38d   : > { %v9207_v17 = vpop.f32.mrb[27].mxu0  ;;  %v9239_v11 = vpack.i.bf16 %v1395_v30, %v1390_v60 }
 0x38f   : > { %10685 = vst [vmem:[#allocation35_spill] sm:$0xff] %v9239_v11 }
 0x390   : > { %2427 = vrot.lane.b32.xlu1 %v9081_v43, %s8441_s15  ;;  %7668 = vrot.lane.b32.xlu0 %v9146_v63, %s8441_s15 }
 0x394   : > { %7673 = vrot.lane.b32.xlu1 %v9153_v7, %s8440_s0  ;;  %7683 = vrot.lane.b32.xlu0 %v9166_v18, %s8440_s0 }
 0x398   : > { %7678 = vrot.lane.b32.xlu1 %v9153_v7, %s8441_s15  ;;  %7688 = vrot.lane.b32.xlu0 %v9166_v18, %s8441_s15 }
 0x39c   : > { %7693 = vrot.lane.b32.xlu1 %v9174_v23, %s8440_s0 }
 0x3ce   : > { %v7624_v25 = vpop.permute.xlu0 %7623 }
 0x3cf   : > { %v7626_v26 = vunpack.i.h.bf16 %v7624_v25  ;;  %v7625_v28 = vunpack.i.l.bf16 %v7624_v25  ;;  %v1380_v25 = vadd.f32 %v8996_v1, %v9148_v2 }
 0x3d1   : > { %v7208_v29 = vpack.c.bf16 %v7626_v26, %v7625_v28  ;;  %v9213_v26 = vpop.f32.mrb[28].mxu0  ;;  %v9227_v2 = vpack.c.bf16 %v1385_v22, %v1380_v25 }
 0x3d2   : > { %v7629_v31 = vpop.permute.xlu0 %7628  ;;  %v9215_v28 = vpop.f32.mrb[29].mxu0 }
 0x3d3   : > { %v7631_v32 = vunpack.i.h.bf16 %v7629_v31  ;;  %v7630_v34 = vunpack.i.l.bf16 %v7629_v31  ;;  %7210 = vmatprep.subr.msk.bf16.mxu0 %vm9002_vm3, %v7208_v29  ;;  %v9219_v31 = vpop.f32.mrb[30].mxu0  ;;  %10682 = vst [vmem:[#allocation32_spill] sm:$0xff] %v9227_v2 }
 0x3d4   : > { %7213 = vmatpush3.bf16.xpose.msk.msra.mxu0 %vm9002_vm3, %v7208_v29 }
 0x3d5   : > { %v7214_v36 = vpack.c.bf16 %v7631_v32, %v7630_v34  ;;  %v9225_v34 = vpop.f32.mrb[31].mxu0 }
 0x3d6   : > { %v7634_v37 = vpop.permute.xlu1 %7633  ;;  %v7644_v57 = vpop.permute.xlu0 %7643 }
 0x3d7   : > { %v7636_v52 = vunpack.i.h.bf16 %v7634_v37  ;;  %v7635_v54 = vunpack.i.l.bf16 %v7634_v37  ;;  %7216 = vmatprep.subr.msk.bf16.mxu0 %vm9002_vm3, %v7214_v36  ;;  %v7646_v12 = vunpack.i.h.bf16 %v7644_v57  ;;  %v7645_v13 = vunpack.i.l.bf16 %v7644_v57 }
 0x3d9   : > { %v7220_v55 = vpack.c.bf16 %v7636_v52, %v7635_v54  ;;  %v7248_v29 = vpack.c.bf16 %v7646_v12, %v7645_v13  ;;  %v1405_v54 = vadd.f32 %v9161_v16, %v8996_v1 }
 0x3da   : > { %v7639_v56 = vpop.permute.xlu1 %7638  ;;  %v1957_v0 = vpop.permute.xlu0 %1956 }
 0x3db   : > { %v7641_v58 = vunpack.i.h.bf16 %v7639_v56  ;;  %v7640_v59 = vunpack.i.l.bf16 %v7639_v56  ;;  %v9237_v56 = vpack.c.bf16 %v1395_v30, %v1390_v60 }
 0x3dc   : > { %7219 = vmatpush3.bf16.xpose.msk.msra.mxu0 %vm9002_vm3, %v7214_v36  ;;  %v9229_v36 = vpack.i.bf16 %v1385_v22, %v1380_v25 }
 0x3dd   : > { %7222 = vmatprep.subr.msk.bf16.mxu0 %vm9002_vm3, %v7220_v55  ;;  %v7226_v62 = vpack.c.bf16 %v7641_v58, %v7640_v59  ;;  %10684 = vst [vmem:[#allocation34_spill] sm:$0xff] %v9237_v56 }
 0x3de   : > { %v1955_v61 = vpop.permute.xlu1 %1954  ;;  %v7654_v14 = vpop.permute.xlu0 %7653  ;;  %10683 = vst [vmem:[#allocation33_spill] sm:$0xff] %v9229_v36 }
 0x3df   : > { %6696 = vmatprep.mubr.msk.f32.mxu0 %vm1574_vm2, %v1955_v61  ;;  %v1415_v61 = vadd.f32 %v9170_v21, %v8996_v1 }
 0x3e2   : > { %v7649_v10 = vpop.permute.xlu1 %7648  ;;  %v1961_v37 = vpop.permute.xlu0 %1960 }
 0x3e3   : > { %v7651_v5 = vunpack.i.h.bf16 %v7649_v10  ;;  %v7650_v52 = vunpack.i.l.bf16 %v7649_v10  ;;  %v7656_v10 = vunpack.i.h.bf16 %v7654_v14 }
 0x3e4   : > { %7225 = vmatpush3.bf16.xpose.msk.msra.mxu0 %vm9002_vm3, %v7220_v55  ;;  %v1400_v55 = vadd.f32 %v8996_v1, %v9168_v20 }
 0x3e5   : > { %7228 = vmatprep.subr.msk.bf16.mxu0 %vm9002_vm3, %v7226_v62  ;;  %v7254_v58 = vpack.c.bf16 %v7651_v5, %v7650_v52 }
 0x3e6   : > { %v1959_v32 = vpop.permute.xlu1 %1958  ;;  %v1963_v59 = vpop.permute.xlu0 %1962  ;;  %v9249_v16 = vpack.c.bf16 %v1405_v54, %v1400_v55  ;;  %v9251_v20 = vpack.i.bf16 %v1405_v54, %v1400_v55 }
 0x3e8   : > { %10686 = vst [vmem:[#allocation36_spill] sm:$0xff] %v9249_v16  ;;  %10687 = vst [vmem:[#allocation37_spill] sm:$0xff] %v9251_v20 }
 0x3ea   : > { %v7659_v57 = vpop.permute.xlu1 %7658  ;;  %v1967_v12 = vpop.permute.xlu0 %1966 }
 0x3eb   : > { %v7661_v22 = vunpack.i.h.bf16 %v7659_v57  ;;  %v7660_v25 = vunpack.i.l.bf16 %v7659_v57 }
 0x3ec   : > { %7231 = vmatpush3.bf16.xpose.msk.msra.mxu0 %vm9002_vm3, %v7226_v62  ;;  %v1410_v62 = vadd.f32 %v8996_v1, %v9176_v24 }
 0x3ed   : > { %7250 = vmatprep.subr.msk.bf16.mxu0 %vm9002_vm3, %v7248_v29  ;;  %v7266_v30 = vpack.c.bf16 %v7661_v22, %v7660_v25  ;;  %v1556_v22 = vadd.f32 %v9138_v53, %v9215_v28 }
 0x3ee   : > { %v1965_v21 = vpop.permute.xlu1 %1964  ;;  %v9257_v1 = vpack.c.bf16 %v1415_v61, %v1410_v62  ;;  %v9259_v24 = vpack.i.bf16 %v1415_v61, %v1410_v62  ;;  %v1541_v62 = vadd.f32 %v9197_v3, %v9138_v53 }
 0x3f0   : > { %10688 = vst [vmem:[#allocation38_spill] sm:$0xff] %v9257_v1  ;;  %10689 = vst [vmem:[#allocation39_spill] sm:$0xff] %v9259_v24 }
 0x3f3   : > { %6697 = vmatmul.mubr.msk.f32.vlgmr.msra.gmra.mrb[32].mxu0 %vm1574_vm2, %v1957_v0  ;;  %v7655_v0 = vunpack.i.l.bf16 %v7654_v14  ;;  %v1969_v14 = vpop.permute.xlu1 %1968 }
 0x3f4   : > { %7253 = vmatpush3.bf16.xpose.msk.msra.mxu0 %vm9002_vm3, %v7248_v29  ;;  %6699 = vmatprep.mubr.msk.f32.mxu0 %vm1574_vm2, %v1959_v32  ;;  %v2414_v29 = vpop.permute.xlu0 %2413 }
 0x3f5   : > { %7256 = vmatprep.subr.msk.bf16.mxu0 %vm9002_vm3, %v7254_v58  ;;  %v7260_v13 = vpack.c.bf16 %v7656_v10, %v7655_v0  ;;  %v1536_v10 = vadd.f32 %v9138_v53, %v9201_v4  ;;  %v1551_v0 = vadd.f32 %v9205_v8, %v9138_v53  ;;  %v1571_v4 = vadd.f32 %v9219_v31, %v9138_v53 }
 0x3f6   : > { %v1566_v8 = vadd.f32 %v9138_v53, %v9225_v34 }
 0x3f7   : > { %6700 = vmatmul.mubr.msk.f32.gmra.mrb[34].mxu0 %vm1574_vm2, %v1961_v37  ;;  %v2416_v37 = vpop.permute.xlu1 %2415 }
 0x3f8   : > { %6702 = vmatprep.mubr.msk.f32.mxu0 %vm1574_vm2, %v1963_v59  ;;  %v2418_v32 = vpop.permute.xlu0 %2417 }
 0x3fb   : > { %6703 = vmatmul.mubr.msk.f32.gmra.mrb[36].mxu0 %vm1574_vm2, %v1965_v21  ;;  %v2420_v52 = vpop.permute.xlu1 %2419  ;;  %v1546_v21 = vadd.f32 %v9138_v53, %v9207_v17 }
 0x3fc   : > { %7259 = vmatpush3.bf16.xpose.msk.msra.mxu0 %vm9002_vm3, %v7254_v58  ;;  %6705 = vmatprep.mubr.msk.f32.mxu0 %vm1574_vm2, %v1967_v12  ;;  %v2422_v60 = vpop.permute.xlu0 %2421  ;;  %v9293_v12 = vpack.c.bf16 %v1541_v62, %v1536_v10 }
 0x3fd   : > { %7262 = vmatprep.subr.msk.bf16.mxu0 %vm9002_vm3, %v7260_v13  ;;  %v9301_v3 = vpack.c.bf16 %v1551_v0, %v1546_v21  ;;  %v9303_v25 = vpack.i.bf16 %v1551_v0, %v1546_v21 }
 0x3ff   : > { %6706 = vmatmul.mubr.msk.f32.gmra.mrb[38].mxu0 %vm1574_vm2, %v1969_v14  ;;  %v2424_v59 = vpop.permute.xlu1 %2423  ;;  %v1561_v14 = vadd.f32 %v9213_v26, %v9138_v53  ;;  %10691 = vst [vmem:[#allocation41_spill] sm:$0xff] %v9303_v25  ;;  %v9315_v26 = vpack.i.bf16 %v1571_v4, %v1566_v8 }
 0x400   : > { %6752 = vmatprep.mubr.msk.f32.mxu0 %vm1574_vm2, %v2414_v29  ;;  %v2426_v5 = vpop.permute.xlu0 %2425 }
 0x401   : > { %v9309_v17 = vpack.c.bf16 %v1561_v14, %v1556_v22  ;;  %v9311_v29 = vpack.i.bf16 %v1561_v14, %v1556_v22  ;;  %10693 = vst [vmem:[#allocation43_spill] sm:$0xff] %v9315_v26 }
 0x403   : > { %v2428_v61 = vpop.permute.xlu1 %2427  ;;  %10692 = vst [vmem:[#allocation42_spill] sm:$0xff] %v9311_v29 }
 0x404   : > { %7265 = vmatpush3.bf16.xpose.msk.msra.mxu0 %vm9002_vm3, %v7260_v13  ;;  %v7664_v54 = vpop.permute.xlu0 %7663  ;;  %v9295_v13 = vpack.i.bf16 %v1541_v62, %v1536_v10 }
 0x405   : > { %7268 = vmatprep.subr.msk.bf16.mxu0 %vm9002_vm3, %v7266_v30  ;;  %v7666_v55 = vunpack.i.h.bf16 %v7664_v54  ;;  %v7665_v57 = vunpack.i.l.bf16 %v7664_v54 }
 0x406   : > { %10690 = vst [vmem:[#allocation40_spill] sm:$0xff] %v9295_v13 }
 0x407   : > { %v9278_v58 = vpack.c.bf16 %v7666_v55, %v7665_v57 }
 0x409   : > { %7233 = vmatprep.subr.bf16.mxu1 %v9278_v58 }
 0x40c   : > { %7271 = vmatpush3.bf16.xpose.msk.msra.mxu0 %vm9002_vm3, %v7266_v30  ;;  %v9313_v30 = vpack.c.bf16 %v1571_v4, %v1566_v8 }
 0x413   : > { %6753 = vmatmul.mubr.msk.f32.vlgmr.msra.gmra.mrb[40].mxu0 %vm1574_vm2, %v2416_v37 }
 0x414   : > { %6755 = vmatprep.mubr.msk.f32.mxu0 %vm1574_vm2, %v2418_v32 }
 0x417   : > { %6756 = vmatmul.mubr.msk.f32.gmra.mrb[42].mxu0 %vm1574_vm2, %v2420_v52 }
 0x418   : > { %6758 = vmatprep.mubr.msk.f32.mxu0 %vm1574_vm2, %v2422_v60 }
 0x41b   : > { %6759 = vmatmul.mubr.msk.f32.gmra.mrb[44].mxu0 %vm1574_vm2, %v2424_v59 }
 0x41c   : > { %6761 = vmatprep.mubr.msk.f32.mxu0 %vm1574_vm2, %v2426_v5 }
 0x41f   : > { %6762 = vmatmul.mubr.msk.f32.gmra.mrb[46].mxu0 %vm1574_vm2, %v2428_v61 }
 0x450   : > { %v6642_v28 = vpop.f32.mrb[16].mxu1 }
 0x451   : > { %v1689_v32 = vpop.f32.mrb[17].mxu1  ;;  %v1732_v60 = vsel %vm1728_vm4, %v6642_v28, -inf }
 0x452   : > { %1733 = vmax.xlane.f32.xlu1 %v1732_v60  ;;  %v1729_v37 = vsel %vm1728_vm4, %v1689_v32, -inf }
 0x453   : > { %1730 = vmax.xlane.f32.xlu0 %v1729_v37 }
 0x454   : > { %v9319_v31 = vpop.f32.mrb[18].mxu1 }
 0x455   : > { %v1738_v53 = vsel %vm1728_vm4, %v9319_v31, -inf  ;;  %v9323_v34 = vpop.f32.mrb[19].mxu1 }
 0x456   : > { %v1735_v54 = vsel %vm1728_vm4, %v9323_v34, -inf }
 0x457   : > { %1739 = vmax.xlane.f32.xlu0 %v1738_v53 }
 0x458   : > { %v9325_v5 = vpop.f32.mrb[20].mxu1 }
 0x459   : > { %v9327_v52 = vpop.f32.mrb[21].mxu1  ;;  %v1744_v59 = vsel %vm1728_vm4, %v9325_v5, -inf }
 0x45a   : > { %v1741_v55 = vsel %vm1728_vm4, %v9327_v52, -inf }
 0x45b   : > { %1736 = vmax.xlane.f32.xlu0 %v1735_v54  ;;  %1742 = vmax.xlane.f32.xlu1 %v1741_v55 }
 0x45c   : > { %v9333_v57 = vpop.f32.mrb[22].mxu1 }
 0x45d   : > { %v9337_v61 = vpop.f32.mrb[23].mxu1  ;;  %v1750_v10 = vsel %vm1728_vm4, %v9333_v57, -inf }
 0x45e   : > { %v1747_v62 = vsel %vm1728_vm4, %v9337_v61, -inf }
 0x45f   : > { %1745 = vmax.xlane.f32.xlu0 %v1744_v59  ;;  %1748 = vmax.xlane.f32.xlu1 %v1747_v62  ;;  %v9365_v59 = vpop.permute.xlu0 %7668 }
 0x463   : > { %1751 = vmax.xlane.f32.xlu0 %v1750_v10  ;;  %v9369_v10 = vpop.permute.xlu1 %7673  ;;  %v9379_v26 = vpop.permute.xlu0 %7683 }
 0x467   : > { %v9385_v25 = vpop.permute.xlu0 %7688 }
 0x4c6   : > { %v9343_v0 = vpop.f32.mrb[32].mxu0 }
 0x4c7   : > { %v9345_v21 = vpop.f32.mrb[33].mxu0  ;;  %v2126_v14 = vsel %vm1728_vm4, %v9343_v0, -inf }
 0x4c8   : > { %2127 = vmax.xlane.f32.xlu0 %v2126_v14  ;;  %v2123_v22 = vsel %vm1728_vm4, %v9345_v21, -inf }
 0x4c9   : > { %2124 = vmax.xlane.f32.xlu1 %v2123_v22 }
 0x4ca   : > { %v9351_v4 = vpop.f32.mrb[34].mxu0 }
 0x4cb   : > { %v9353_v8 = vpop.f32.mrb[35].mxu0  ;;  %v2132_v60 = vsel %vm1728_vm4, %v9351_v4, -inf }
 0x4cc   : > { %2133 = vmax.xlane.f32.xlu0 %v2132_v60  ;;  %v2129_v37 = vsel %vm1728_vm4, %v9353_v8, -inf }
 0x4cd   : > { %2130 = vmax.xlane.f32.xlu1 %v2129_v37 }
 0x4ce   : > { %v9359_v53 = vpop.f32.mrb[36].mxu0 }
 0x4cf   : > { %v9361_v54 = vpop.f32.mrb[37].mxu0  ;;  %v2138_v55 = vsel %vm1728_vm4, %v9359_v53, -inf }
 0x4d0   : > { %2139 = vmax.xlane.f32.xlu0 %v2138_v55  ;;  %v2135_v62 = vsel %vm1728_vm4, %v9361_v54, -inf  ;;  %v9381_v55 = vpop.permute.xlu1 %7678 }
 0x4d1   : > { %2136 = vmax.xlane.f32.xlu1 %v2135_v62 }
 0x4d2   : > { %v9371_v14 = vpop.f32.mrb[38].mxu0 }
 0x4d3   : > { %v9373_v22 = vpop.f32.mrb[39].mxu0  ;;  %v2144_v60 = vsel %vm1728_vm4, %v9371_v14, -inf }
 0x4d4   : > { %2145 = vmax.xlane.f32.xlu0 %v2144_v60  ;;  %v2141_v37 = vsel %vm1728_vm4, %v9373_v22, -inf  ;;  %v9383_v29 = vpop.permute.xlu1 %7693 }
 0x4d5   : > { %2142 = vmax.xlane.f32.xlu1 %v2141_v37 }
 0x4df   : > { %v1734_v62 = vpop.xlane.xlu1 %1733 }
 0x4e0   : > { %v1754_v13 = vsub.f32 %v6642_v28, %v1734_v62  ;;  %v1731_v11 = vpop.xlane.xlu0 %1730 }
 0x4e1   : > { %v1753_v24 = vsub.f32 %v1689_v32, %v1731_v11 }
 0x4e2   : > { %v1763_v20 = vmul.f32 1.442695, %v1754_v13 }
 0x4e3   : > { %v1761_v36 = vmul.f32 1.442695, %v1753_v24 }
 0x4e4   : > { %v1740_v50 = vpop.xlane.xlu0 %1739  ;;  %7862 = vpow2.f32 %v1763_v20 }
 0x4e5   : > { %7864 = vpow2.f32 %v1761_v36 }
 0x4e6   : > { %v9387_v60 = vpop.f32.mrb[40].mxu0 }
 0x4e7   : > { %v9389_v37 = vpop.f32.mrb[41].mxu0  ;;  %v2585_v51 = vsel %vm1728_vm4, %v9387_v60, -inf }
 0x4e8   : > { %v1737_v48 = vpop.xlane.xlu0 %1736  ;;  %v1743_v49 = vpop.xlane.xlu1 %1742  ;;  %2586 = vmax.xlane.f32.xlu0 %v2585_v51  ;;  %v2582_v28 = vsel %vm1728_vm4, %v9389_v37, -inf }
 0x4e9   : > { %v1755_v11 = vsub.f32 %v9323_v34, %v1737_v48  ;;  %2583 = vmax.xlane.f32.xlu1 %v2582_v28  ;;  %v1757_v13 = vsub.f32 %v9327_v52, %v1743_v49 }
 0x4ea   : > { %v9396_v24 = vpop.f32.mrb[42].mxu0 }
 0x4eb   : > { %v1765_v20 = vmul.f32 1.442695, %v1755_v11  ;;  %v9399_v36 = vpop.f32.mrb[43].mxu0  ;;  %v2591_v32 = vsel %vm1728_vm4, %v9396_v24, -inf  ;;  %v1769_v48 = vmul.f32 1.442695, %v1757_v13 }
 0x4ec   : > { %v1749_v62 = vpop.xlane.xlu1 %1748  ;;  %2592 = vmax.xlane.f32.xlu0 %v2591_v32  ;;  %v2588_v51 = vsel %vm1728_vm4, %v9399_v36, -inf }
 0x4ed   : > { %2589 = vmax.xlane.f32.xlu1 %v2588_v51  ;;  %7866 = vpow2.f32 %v1765_v20  ;;  %v1759_v34 = vsub.f32 %v9337_v61, %v1749_v62 }
 0x4ee   : > { %v9405_v46 = vpop.f32.mrb[44].mxu0  ;;  %v9412_v52 = vpop.eup %7862  ;;  %7868 = vpow2.f32 %v1769_v48 }
 0x4ef   : > { %v9408_v28 = vpop.f32.mrb[45].mxu0  ;;  %v2597_v49 = vsel %vm1728_vm4, %v9405_v46, -inf  ;;  %v9416_v32 = vpop.eup %7864  ;;  %v1773_v20 = vmul.f32 1.442695, %v1759_v34  ;;  %v1780_v61 = vsel %vm1728_vm4, %v9412_v52, 0.0 }
 0x4f0   : > { %2598 = vmax.xlane.f32.xlu0 %v2597_v49  ;;  %v2594_v11 = vsel %vm1728_vm4, %v9408_v28, -inf  ;;  %v1777_v62 = vsel %vm1728_vm4, %v9416_v32, 0.0 }
 0x4f1   : > { %2595 = vmax.xlane.f32.xlu1 %v2594_v11  ;;  %7870 = vpow2.f32 %v1773_v20 }
 0x4f2   : > { %v9418_v51 = vpop.f32.mrb[46].mxu0 }
 0x4f3   : > { %v9420_v13 = vpop.f32.mrb[47].mxu0  ;;  %v2603_v49 = vsel %vm1728_vm4, %v9418_v51, -inf }
 0x4f4   : > { %1781 = vadd.xlane.f32.xlu0 %v1780_v61  ;;  %v2600_v11 = vsel %vm1728_vm4, %v9420_v13, -inf }
 0x4f5   : > { %1778 = vadd.xlane.f32.xlu1 %v1777_v62 }
 0x4f7   : > { %v9430_v48 = vpop.eup %7866 }
 0x4f8   : > { %2604 = vmax.xlane.f32.xlu0 %v2603_v49  ;;  %v1783_v34 = vsel %vm1728_vm4, %v9430_v48, 0.0  ;;  %v9434_v47 = vpop.eup %7868  ;;  %v1746_v49 = vpop.xlane.xlu0 %1745 }
 0x4f9   : > { %2601 = vmax.xlane.f32.xlu1 %v2600_v11  ;;  %v1789_v61 = vsel %vm1728_vm4, %v9434_v47, 0.0  ;;  %v1756_v11 = vsub.f32 %v9319_v31, %v1740_v50  ;;  %v1758_v45 = vsub.f32 %v9325_v5, %v1746_v49 }
 0x4fb   : > { %v9438_v20 = vpop.eup %7870  ;;  %v1767_v44 = vmul.f32 1.442695, %v1756_v11  ;;  %v1771_v1 = vmul.f32 1.442695, %v1758_v45 }
 0x4fc   : > { %v1795_v62 = vsel %vm1728_vm4, %v9438_v20, 0.0 }
 0x4fd   : > { %1784 = vadd.xlane.f32.xlu1 %v1783_v34  ;;  %v1752_v34 = vpop.xlane.xlu0 %1751  ;;  %7872 = vpow2.f32 %v1767_v44 }
 0x4fe   : > { %v1760_v16 = vsub.f32 %v9333_v57, %v1752_v34  ;;  %7874 = vpow2.f32 %v1771_v1 }
 0x501   : > { %1790 = vadd.xlane.f32.xlu1 %v1789_v61  ;;  %v1775_v61 = vmul.f32 1.442695, %v1760_v16 }
 0x503   : > { %7876 = vpow2.f32 %v1775_v61 }
 0x505   : > { %1796 = vadd.xlane.f32.xlu1 %v1795_v62 }
 0x507   : > { %v9447_v56 = vpop.eup %7872 }
 0x508   : > { %v1786_v62 = vsel %vm1728_vm4, %v9447_v56, 0.0  ;;  %v9451_v2 = vpop.eup %7874 }
 0x509   : > { %v1792_v50 = vsel %vm1728_vm4, %v9451_v2, 0.0 }
 0x50d   : > { %v9455_v31 = vpop.eup %7876 }
 0x50e   : > { %7698 = vrot.lane.b32.xlu0 %v9174_v23, %s8441_s15  ;;  %v1798_v44 = vsel %vm1728_vm4, %v9455_v31, 0.0 }
 0x52d   : > { %1787 = vadd.xlane.f32.xlu0 %v1786_v62 }
 0x531   : > { %1793 = vadd.xlane.f32.xlu0 %v1792_v50 }
 0x535   : > { %1799 = vadd.xlane.f32.xlu0 %v1798_v44 }
 0x555   : > { %v2128_v45 = vpop.xlane.xlu0 %2127 }
 0x556   : > { %v2148_v16 = vsub.f32 %v9343_v0, %v2128_v45  ;;  %v2125_v1 = vpop.xlane.xlu1 %2124 }
 0x557   : > { %v2147_v5 = vsub.f32 %v9345_v21, %v2125_v1 }
 0x558   : > { %v2157_v57 = vmul.f32 1.442695, %v2148_v16 }
 0x559   : > { %v2155_v49 = vmul.f32 1.442695, %v2147_v5  ;;  %v2134_v11 = vpop.xlane.xlu0 %2133 }
 0x55a   : > { %7878 = vpow2.f32 %v2157_v57  ;;  %v2150_v34 = vsub.f32 %v9351_v4, %v2134_v11  ;;  %v2131_v61 = vpop.xlane.xlu1 %2130 }
 0x55b   : > { %7880 = vpow2.f32 %v2155_v49  ;;  %v2149_v62 = vsub.f32 %v9353_v8, %v2131_v61 }
 0x55c   : > { %v2161_v50 = vmul.f32 1.442695, %v2150_v34 }
 0x55d   : > { %v2159_v7 = vmul.f32 1.442695, %v2149_v62  ;;  %v2140_v23 = vpop.xlane.xlu0 %2139 }
 0x55e   : > { %7882 = vpow2.f32 %v2161_v50  ;;  %v2152_v44 = vsub.f32 %v9359_v53, %v2140_v23  ;;  %v2137_v0 = vpop.xlane.xlu1 %2136 }
 0x55f   : > { %v2151_v45 = vsub.f32 %v9361_v54, %v2137_v0  ;;  %7884 = vpow2.f32 %v2159_v7 }
 0x560   : > { %v2165_v21 = vmul.f32 1.442695, %v2152_v44 }
 0x561   : > { %v2163_v16 = vmul.f32 1.442695, %v2151_v45  ;;  %v2146_v1 = vpop.xlane.xlu0 %2145 }
 0x562   : > { %7886 = vpow2.f32 %v2165_v21  ;;  %v2154_v4 = vsub.f32 %v9371_v14, %v2146_v1  ;;  %v2143_v5 = vpop.xlane.xlu1 %2142 }
 0x563   : > { %7888 = vpow2.f32 %v2163_v16  ;;  %v2153_v11 = vsub.f32 %v9373_v22, %v2143_v5 }
 0x564   : > { %v9466_v57 = vpop.eup %7878  ;;  %v2169_v49 = vmul.f32 1.442695, %v2154_v4 }
 0x565   : > { %v9468_v8 = vpop.eup %7880  ;;  %v2174_v23 = vsel %vm1728_vm4, %v9466_v57, 0.0  ;;  %v2167_v54 = vmul.f32 1.442695, %v2153_v11 }
 0x566   : > { %2175 = vadd.xlane.f32.xlu0 %v2174_v23  ;;  %v2171_v7 = vsel %vm1728_vm4, %v9468_v8, 0.0  ;;  %7890 = vpow2.f32 %v2169_v49 }
 0x567   : > { %2172 = vadd.xlane.f32.xlu1 %v2171_v7  ;;  %7892 = vpow2.f32 %v2167_v54 }
 0x568   : > { %v9475_v53 = vpop.eup %7882 }
 0x569   : > { %v2180_v14 = vsel %vm1728_vm4, %v9475_v53, 0.0  ;;  %v9479_v34 = vpop.eup %7884 }
 0x56a   : > { %v2177_v62 = vsel %vm1728_vm4, %v9479_v34, 0.0 }
 0x56b   : > { %2181 = vadd.xlane.f32.xlu1 %v2180_v14 }
 0x56c   : > { %v9481_v61 = vpop.eup %7886 }
 0x56d   : > { %v2186_v22 = vsel %vm1728_vm4, %v9481_v61, 0.0  ;;  %v9487_v50 = vpop.eup %7888 }
 0x56e   : > { %2187 = vadd.xlane.f32.xlu0 %v2186_v22  ;;  %v2183_v44 = vsel %vm1728_vm4, %v9487_v50, 0.0 }
 0x56f   : > { %2178 = vadd.xlane.f32.xlu1 %v2177_v62 }
 0x570   : > { %v9491_v0 = vpop.eup %7890 }
 0x571   : > { %v2192_v16 = vsel %vm1728_vm4, %v9491_v0, 0.0  ;;  %v9497_v1 = vpop.eup %7892 }
 0x572   : > { %v2189_v23 = vsel %vm1728_vm4, %v9497_v1, 0.0 }
 0x573   : > { %2184 = vadd.xlane.f32.xlu1 %v2183_v44 }
 0x575   : > { %v9493_v45 = vpop.xlane.xlu0 %2586 }
 0x576   : > { %v2584_v21 = vpop.xlane.xlu1 %2583 }
 0x577   : > { %v2606_v4 = vsub.f32 %v9389_v37, %v2584_v21  ;;  %2193 = vadd.xlane.f32.xlu1 %v2192_v16 }
 0x579   : > { %v2614_v5 = vmul.f32 1.442695, %v2606_v4  ;;  %v9500_v49 = vpop.xlane.xlu0 %2592 }
 0x57a   : > { %v2590_v11 = vpop.xlane.xlu1 %2589 }
 0x57b   : > { %7894 = vpow2.f32 %v2614_v5  ;;  %v2608_v7 = vsub.f32 %v9399_v36, %v2590_v11  ;;  %2190 = vadd.xlane.f32.xlu1 %v2189_v23 }
 0x57d   : > { %v2618_v54 = vmul.f32 1.442695, %v2608_v7  ;;  %v2599_v14 = vpop.xlane.xlu0 %2598 }
 0x57e   : > { %v2611_v22 = vsub.f32 %v9405_v46, %v2599_v14  ;;  %v2596_v62 = vpop.xlane.xlu1 %2595 }
 0x57f   : > { %7896 = vpow2.f32 %v2618_v54  ;;  %v2610_v37 = vsub.f32 %v9408_v28, %v2596_v62 }
 0x580   : > { %v2624_v44 = vmul.f32 1.442695, %v2611_v22 }
 0x581   : > { %v2622_v21 = vmul.f32 1.442695, %v2610_v37  ;;  %v1782_v16 = vpop.xlane.xlu0 %1781 }
 0x582   : > { %7898 = vpow2.f32 %v2624_v44  ;;  %v1779_v4 = vpop.xlane.xlu1 %1778 }
 0x583   : > { %7900 = vpow2.f32 %v2622_v21  ;;  %v7676_v21 = vunpack.i.h.bf16 %v9369_v10 }
 0x584   : > { %7902 = vrcp.f32 %v1782_v16  ;;  %v7675_v16 = vunpack.i.l.bf16 %v9369_v10 }
 0x585   : > { %v9507_v18 = vpop.eup %7894  ;;  %7904 = vrcp.f32 %v1779_v4  ;;  %v2605_v36 = vpop.xlane.xlu0 %2604 }
 0x586   : > { %v2613_v5 = vsub.f32 %v9418_v51, %v2605_v36  ;;  %v2602_v11 = vpop.xlane.xlu1 %2601  ;;  %v2630_v46 = vsel %vm1728_vm4, %v9507_v18, 0.0 }
 0x587   : > { %v2612_v23 = vsub.f32 %v9420_v13, %v2602_v11  ;;  %2631 = vadd.xlane.f32.xlu0 %v2630_v46  ;;  %v7685_v11 = vunpack.i.l.bf16 %v9379_v26  ;;  %v7236_v46 = vpack.c.bf16 %v7676_v21, %v7675_v16 }
 0x588   : > { %v2628_v28 = vmul.f32 1.442695, %v2613_v5  ;;  %v7686_v5 = vunpack.i.h.bf16 %v9379_v26 }
 0x589   : > { %v9513_v7 = vpop.eup %7896  ;;  %v2626_v54 = vmul.f32 1.442695, %v2612_v23 }
 0x58a   : > { %7906 = vpow2.f32 %v2628_v28  ;;  %v1785_v14 = vpop.xlane.xlu1 %1784  ;;  %v2636_v22 = vsel %vm1728_vm4, %v9513_v7, 0.0  ;;  %v7696_v28 = vunpack.i.h.bf16 %v9383_v29  ;;  %v7240_v26 = vpack.c.bf16 %v7686_v5, %v7685_v11 }
 0x58b   : > { %2637 = vadd.xlane.f32.xlu0 %v2636_v22  ;;  %7908 = vrcp.f32 %v1785_v14 }
 0x58c   : > { %v9517_v62 = vpop.eup %7898  ;;  %7703 = vrot.lane.b32.xlu1 %v9006_v9, %s8442_s28  ;;  %7910 = vpow2.f32 %v2626_v54  ;;  %v7695_v54 = vunpack.i.l.bf16 %v9383_v29 }
 0x58d   : > { %v9521_v51 = vpop.eup %7900  ;;  %v2645_v13 = vsel %vm1728_vm4, %v9517_v62, 0.0 }
 0x58e   : > { %v7903_v37 = vpop.eup %7902  ;;  %v2642_v9 = vsel %vm1728_vm4, %v9521_v51, 0.0 }
 0x58f   : > { %v7905_v44 = vpop.eup %7904  ;;  %2646 = vadd.xlane.f32.xlu0 %v2645_v13  ;;  %v1810_v36 = vmul.f32 %v7903_v37, %v9412_v52  ;;  %v7671_v13 = vunpack.i.h.bf16 %v9365_v59  ;;  %v7670_v37 = vunpack.i.l.bf16 %v9365_v59 }
 0x590   : > { %v1809_v4 = vmul.f32 %v7905_v44, %v9416_v32  ;;  %v7244_v44 = vpack.c.bf16 %v7696_v28, %v7695_v54  ;;  %v7681_v54 = vunpack.i.h.bf16 %v9381_v55 }
 0x591   : > { %v9554_v21 = vpack.c.bf16 %v7671_v13, %v7670_v37 }
 0x592   : > { %6668 = vmatprep.mubr.msk.f32.mxu1 %vm1728_vm4, %v1809_v4  ;;  %v9569_v4 = vpop.permute.xlu0 %7698 }
 0x593   : > { %6669 = vmatmul.mubr.msk.f32.vlgmr.msra.gmra.mrb[24].mxu1 %vm1728_vm4, %v1810_v36  ;;  %2643 = vadd.xlane.f32.xlu0 %v2642_v9 }
 0x594   : > { %v9535_v23 = vpop.eup %7906  ;;  %7235 = vmatpush3.bf16.msra.mxu1 %v9278_v58  ;;  %v2607_v58 = vsub.f32 %v9387_v60, %v9493_v45 }
 0x595   : > { %7237 = vmatprep.subr.bf16.mxu1 %v7236_v46  ;;  %v2651_v10 = vsel %vm1728_vm4, %v9535_v23, 0.0  ;;  %v7909_v52 = vpop.eup %7908 }
 0x596   : > { %v9540_v32 = vpop.eup %7910  ;;  %v1811_v14 = vmul.f32 %v7909_v52, %v9430_v48  ;;  %v2616_v29 = vmul.f32 1.442695, %v2607_v58  ;;  %v2609_v48 = vsub.f32 %v9396_v24, %v9500_v49  ;;  %v1791_v49 = vpop.xlane.xlu1 %1790  ;;  %v7690_v58 = vunpack.i.l.bf16 %v9385_v25 }
 0x597   : > { %2652 = vadd.xlane.f32.xlu0 %v2651_v10  ;;  %v2648_v22 = vsel %vm1728_vm4, %v9540_v32, 0.0 }
 0x598   : > { %7239 = vmatpush3.bf16.msra.mxu1 %v7236_v46  ;;  %6671 = vmatprep.mubr.msk.f32.mxu1 %vm1728_vm4, %v1811_v14  ;;  %7912 = vpow2.f32 %v2616_v29  ;;  %v2620_v60 = vmul.f32 1.442695, %v2609_v48  ;;  %v7691_v14 = vunpack.i.h.bf16 %v9385_v25 }
 0x599   : > { %7241 = vmatprep.subr.bf16.mxu1 %v7240_v26 }
 0x59a   : > { %7914 = vpow2.f32 %v2620_v60  ;;  %v1797_v9 = vpop.xlane.xlu1 %1796 }
 0x59b   : > { %2649 = vadd.xlane.f32.xlu0 %v2648_v22  ;;  %7916 = vrcp.f32 %v1791_v49 }
 0x59c   : > { %7243 = vmatpush3.bf16.msra.mxu1 %v7240_v26 }
 0x59d   : > { %7245 = vmatprep.subr.bf16.mxu1 %v7244_v44 }
 0x5a0   : > { %7247 = vmatpush3.bf16.msra.mxu1 %v7244_v44  ;;  %v7280_v44 = vpack.c.bf16 %v7691_v14, %v7690_v58 }
 0x5a1   : > { %7273 = vmatprep.subr.bf16.mxu1 %v9554_v21 }
 0x5a2   : > { %v9557_v45 = vpop.eup %7912 }
 0x5a3   : > { %v2633_v59 = vsel %vm1728_vm4, %v9557_v45, 0.0 }
 0x5a4   : > { %v9561_v16 = vpop.eup %7914 }
 0x5a5   : > { %v2639_v24 = vsel %vm1728_vm4, %v9561_v16, 0.0  ;;  %v7917_v11 = vpop.eup %7916 }
 0x5b0   : > { %2634 = vadd.xlane.f32.xlu1 %v2633_v59 }
 0x5b1   : > { %7708 = vrot.lane.b32.xlu0 %v9021_v19, %s8442_s28 }
 0x5b4   : > { %2640 = vadd.xlane.f32.xlu1 %v2639_v24 }
 0x5b5   : > { %2868 = vrot.lane.b32.xlu0 %v9059_v39, %s8442_s28 }
 0x5b9   : > { %2872 = vrot.lane.b32.xlu0 %v9065_v40, %s8442_s28  ;;  %v1813_v40 = vmul.f32 %v7917_v11, %v9434_v47 }
 0x5ba   : > { %v1788_v36 = vpop.xlane.xlu0 %1787 }
 0x5bb   : > { %7918 = vrcp.f32 %v1788_v36 }
 0x5bc   : > { %7920 = vrcp.f32 %v1797_v9 }
 0x5bd   : > { %2876 = vrot.lane.b32.xlu0 %v9071_v41, %s8442_s28 }
 0x5be   : > { %v1794_v19 = vpop.xlane.xlu0 %1793 }
 0x5bf   : > { %7922 = vrcp.f32 %v1794_v19 }
 0x5c2   : > { %v1800_v5 = vpop.xlane.xlu0 %1799 }
 0x5c3   : > { %7924 = vrcp.f32 %v1800_v5 }
 0x5c5   : > { %v7919_v46 = vpop.eup %7918  ;;  %7713 = vrot.lane.b32.xlu1 %v9029_v27, %s8442_s28 }
 0x5c6   : > { %v1812_v39 = vmul.f32 %v7919_v46, %v9447_v56  ;;  %v7921_v10 = vpop.eup %7920 }
 0x5c7   : > { %v1815_v28 = vmul.f32 %v7921_v10, %v9438_v20 }
 0x5c8   : > { %6672 = vmatmul.mubr.msk.f32.gmra.mrb[26].mxu1 %vm1728_vm4, %v1812_v39 }
 0x5c9   : > { %v7923_v52 = vpop.eup %7922  ;;  %7718 = vrot.lane.b32.xlu1 %v9041_v35, %s8442_s28  ;;  %6674 = vmatprep.mubr.msk.f32.mxu1 %vm1728_vm4, %v1813_v40 }
 0x5ca   : > { %v1814_v41 = vmul.f32 %v7923_v52, %v9451_v2 }
 0x5cc   : > { %6675 = vmatmul.mubr.msk.f32.gmra.mrb[28].mxu1 %vm1728_vm4, %v1814_v41 }
 0x5cd   : > { %v7925_v27 = vpop.eup %7924  ;;  %2864 = vrot.lane.b32.xlu1 %v9010_v15, %s8442_s28  ;;  %6677 = vmatprep.mubr.msk.f32.mxu1 %vm1728_vm4, %v1815_v28 }
 0x5ce   : > { %v1816_v47 = vmul.f32 %v7925_v27, %v9455_v31 }
 0x5d0   : > { %6678 = vmatmul.mubr.msk.f32.gmra.mrb[30].mxu1 %vm1728_vm4, %v1816_v47 }
 0x5d1   : > { %2866 = vrot.lane.b32.xlu1 %v9037_v33, %s8442_s28 }
 0x5d5   : > { %2870 = vrot.lane.b32.xlu1 %v9053_v38, %s8442_s28  ;;  %v7680_v38 = vunpack.i.l.bf16 %v9381_v55 }
 0x5d7   : > { %v7276_v22 = vpack.c.bf16 %v7681_v54, %v7680_v38 }
 0x5d9   : > { %2874 = vrot.lane.b32.xlu1 %v9075_v42, %s8442_s28 }
 0x5dd   : > { %2878 = vrot.lane.b32.xlu1 %v9081_v43, %s8442_s28 }
 0x5f3   : > { %v2176_v35 = vpop.xlane.xlu0 %2175 }
 0x5f4   : > { %7926 = vrcp.f32 %v2176_v35  ;;  %v2173_v15 = vpop.xlane.xlu1 %2172 }
 0x5f5   : > { %7928 = vrcp.f32 %v2173_v15 }
 0x5f8   : > { %v2182_v2 = vpop.xlane.xlu1 %2181 }
 0x5f9   : > { %7930 = vrcp.f32 %v2182_v2 }
 0x5fb   : > { %v2188_v20 = vpop.xlane.xlu0 %2187 }
 0x5fc   : > { %v2179_v56 = vpop.xlane.xlu1 %2178 }
 0x5fd   : > { %7932 = vrcp.f32 %v2179_v56 }
 0x5fe   : > { %v7927_v31 = vpop.eup %7926  ;;  %7934 = vrcp.f32 %v2188_v20 }
 0x5ff   : > { %v7929_v33 = vpop.eup %7928  ;;  %v2204_v43 = vmul.f32 %v7927_v31, %v9466_v57  ;;  %v7700_v57 = vunpack.i.l.bf16 %v9569_v4 }
 0x600   : > { %v2185_v42 = vpop.xlane.xlu1 %2184  ;;  %v2203_v26 = vmul.f32 %v7929_v33, %v9468_v8  ;;  %v7701_v8 = vunpack.i.h.bf16 %v9569_v4 }
 0x601   : > { %7936 = vrcp.f32 %v2185_v42 }
 0x602   : > { %6724 = vmatprep.mubr.msk.f32.mxu1 %vm1728_vm4, %v2203_v26  ;;  %v7284_v59 = vpack.c.bf16 %v7701_v8, %v7700_v57 }
 0x603   : > { %6725 = vmatmul.mubr.msk.f32.vlgmr.msra.gmra.mrb[32].mxu1 %vm1728_vm4, %v2204_v43  ;;  %v7931_v55 = vpop.eup %7930 }
 0x604   : > { %7275 = vmatpush3.bf16.msra.mxu1 %v9554_v21  ;;  %v2194_v13 = vpop.xlane.xlu1 %2193  ;;  %v2206_v25 = vmul.f32 %v7931_v55, %v9475_v53 }
 0x605   : > { %7277 = vmatprep.subr.bf16.mxu1 %v7276_v22  ;;  %7938 = vrcp.f32 %v2194_v13 }
 0x607   : > { %v7933_v37 = vpop.eup %7932 }
 0x608   : > { %7279 = vmatpush3.bf16.msra.mxu1 %v7276_v22  ;;  %v2191_v29 = vpop.xlane.xlu1 %2190  ;;  %v2205_v48 = vmul.f32 %v7933_v37, %v9479_v34  ;;  %v7935_v60 = vpop.eup %7934 }
 0x609   : > { %7281 = vmatprep.subr.bf16.mxu1 %v7280_v44  ;;  %7940 = vrcp.f32 %v2191_v29  ;;  %v2208_v34 = vmul.f32 %v7935_v60, %v9481_v61 }
 0x60a   : > { %6727 = vmatprep.mubr.msk.f32.mxu1 %vm1728_vm4, %v2205_v48 }
 0x60b   : > { %v7937_v21 = vpop.eup %7936  ;;  %6728 = vmatmul.mubr.msk.f32.gmra.mrb[34].mxu1 %vm1728_vm4, %v2206_v25 }
 0x60c   : > { %7283 = vmatpush3.bf16.msra.mxu1 %v7280_v44  ;;  %v7704_v24 = vpop.permute.xlu1 %7703  ;;  %v2207_v49 = vmul.f32 %v7937_v21, %v9487_v50 }
 0x60d   : > { %7285 = vmatprep.subr.bf16.mxu1 %v7284_v59  ;;  %v7706_v4 = vunpack.i.h.bf16 %v7704_v24  ;;  %v7705_v36 = vunpack.i.l.bf16 %v7704_v24 }
 0x60e   : > { %6730 = vmatprep.mubr.msk.f32.mxu1 %vm1728_vm4, %v2207_v49 }
 0x60f   : > { %v7288_v9 = vpack.c.bf16 %v7706_v4, %v7705_v36  ;;  %6731 = vmatmul.mubr.msk.f32.gmra.mrb[36].mxu1 %vm1728_vm4, %v2208_v34  ;;  %v7939_v53 = vpop.eup %7938 }
 0x610   : > { %7287 = vmatpush3.bf16.msra.mxu1 %v7284_v59  ;;  %v2210_v50 = vmul.f32 %v7939_v53, %v9491_v0 }
 0x611   : > { %7290 = vmatprep.subr.msk.bf16.mxu1 %vm9002_vm3, %v7288_v9 }
 0x613   : > { %v7941_v19 = vpop.eup %7940 }
 0x614   : > { %v2632_v5 = vpop.xlane.xlu0 %2631  ;;  %v2209_v11 = vmul.f32 %v7941_v19, %v9497_v1 }
 0x615   : > { %7942 = vrcp.f32 %v2632_v5 }
 0x616   : > { %6733 = vmatprep.mubr.msk.f32.mxu1 %vm1728_vm4, %v2209_v11 }
 0x617   : > { %6734 = vmatmul.mubr.msk.f32.gmra.mrb[38].mxu1 %vm1728_vm4, %v2210_v50 }
 0x618   : > { %v2638_v39 = vpop.xlane.xlu0 %2637 }
 0x619   : > { %7944 = vrcp.f32 %v2638_v39 }
 0x61c   : > { %v2647_v40 = vpop.xlane.xlu0 %2646 }
 0x61f   : > { %v7943_v61 = vpop.eup %7942 }
 0x620   : > { %v2662_v46 = vmul.f32 %v7943_v61, %v9507_v18  ;;  %v2644_v10 = vpop.xlane.xlu0 %2643 }
 0x622   : > { %6780 = vmatprep.mubr.msk.f32.mxu1 %vm1728_vm4, %v2662_v46 }
 0x623   : > { %v7945_v27 = vpop.eup %7944 }
 0x624   : > { %v2653_v52 = vpop.xlane.xlu0 %2652  ;;  %v2664_v2 = vmul.f32 %v7945_v27, %v9513_v7 }
 0x628   : > { %v2650_v28 = vpop.xlane.xlu0 %2649 }
 0x62c   : > { %v7709_v0 = vpop.permute.xlu0 %7708 }
 0x62d   : > { %v7711_v47 = vunpack.i.h.bf16 %v7709_v0  ;;  %v7710_v35 = vunpack.i.l.bf16 %v7709_v0 }
 0x62f   : > { %v7294_v20 = vpack.c.bf16 %v7711_v47, %v7710_v35 }
 0x630   : > { %v2869_v8 = vpop.permute.xlu0 %2868 }
 0x634   : > { %v2873_v29 = vpop.permute.xlu0 %2872 }
 0x638   : > { %v2877_v25 = vpop.permute.xlu0 %2876 }
 0x63d   : > { %v2635_v41 = vpop.xlane.xlu1 %2634 }
 0x63e   : > { %7946 = vrcp.f32 %v2635_v41 }
 0x63f   : > { %7948 = vrcp.f32 %v2644_v10 }
 0x641   : > { %v2641_v1 = vpop.xlane.xlu1 %2640 }
 0x642   : > { %7950 = vrcp.f32 %v2641_v1 }
 0x643   : > { %7952 = vrcp.f32 %v2647_v40 }
 0x644   : > { %7954 = vrcp.f32 %v2650_v28 }
 0x645   : > { %7956 = vrcp.f32 %v2653_v52  ;;  %v7714_v31 = vpop.permute.xlu1 %7713 }
 0x646   : > { %v7716_v42 = vunpack.i.h.bf16 %v7714_v31  ;;  %v7715_v26 = vunpack.i.l.bf16 %v7714_v31 }
 0x648   : > { %v7947_v18 = vpop.eup %7946  ;;  %v7300_v13 = vpack.c.bf16 %v7716_v42, %v7715_v26 }
 0x649   : > { %v2663_v15 = vmul.f32 %v7947_v18, %v9557_v45  ;;  %v7949_v56 = vpop.eup %7948  ;;  %v7719_v43 = vpop.permute.xlu1 %7718 }
 0x64a   : > { %v2666_v45 = vmul.f32 %v7949_v56, %v9521_v51  ;;  %v7720_v55 = vunpack.i.l.bf16 %v7719_v43 }
 0x64b   : > { %6781 = vmatmul.mubr.msk.f32.vlgmr.msra.gmra.mrb[40].mxu1 %vm1728_vm4, %v2663_v15 }
 0x64c   : > { %v7951_v33 = vpop.eup %7950  ;;  %7293 = vmatpush3.bf16.xpose.msk.msra.mxu1 %vm9002_vm3, %v7288_v9  ;;  %6783 = vmatprep.mubr.msk.f32.mxu1 %vm1728_vm4, %v2664_v2 }
 0x64d   : > { %7296 = vmatprep.subr.msk.bf16.mxu1 %vm9002_vm3, %v7294_v20  ;;  %v2665_v54 = vmul.f32 %v7951_v33, %v9561_v16  ;;  %v7953_v38 = vpop.eup %7952  ;;  %v7721_v16 = vunpack.i.h.bf16 %v7719_v43  ;;  %v2865_v37 = vpop.permute.xlu1 %2864 }
 0x64e   : > { %v7955_v7 = vpop.eup %7954  ;;  %v2667_v14 = vmul.f32 %v7953_v38, %v9517_v62  ;;  %v10694_v38 = vld [vmem:[#allocation30_spill] sm:$0xff] }
 0x64f   : > { %6784 = vmatmul.mubr.msk.f32.gmra.mrb[42].mxu1 %vm1728_vm4, %v2665_v54  ;;  %v7957_v58 = vpop.eup %7956  ;;  %v2668_v22 = vmul.f32 %v7955_v7, %v9540_v32  ;;  %v7306_v62 = vpack.c.bf16 %v7721_v16, %v7720_v55 }
 0x650   : > { %6786 = vmatprep.mubr.msk.f32.mxu1 %vm1728_vm4, %v2666_v45  ;;  %v2669_v51 = vmul.f32 %v7957_v58, %v9535_v23 }
 0x651   : > { %v2867_v32 = vpop.permute.xlu1 %2866 }
 0x653   : > { %6787 = vmatmul.mubr.msk.f32.gmra.mrb[44].mxu1 %vm1728_vm4, %v2667_v14 }
 0x654   : > { %7299 = vmatpush3.bf16.xpose.msk.msra.mxu1 %vm9002_vm3, %v7294_v20  ;;  %6789 = vmatprep.mubr.msk.f32.mxu1 %vm1728_vm4, %v2668_v22 }
 0x655   : > { %7302 = vmatprep.subr.msk.bf16.mxu1 %vm9002_vm3, %v7300_v13  ;;  %v2871_v44 = vpop.permute.xlu1 %2870 }
 0x657   : > { %6790 = vmatmul.mubr.msk.f32.gmra.mrb[46].mxu1 %vm1728_vm4, %v2669_v51 }
 0x658   : > { %6808 = vmatprep.mubr.msk.f32.mxu1 %vm1574_vm2, %v2865_v37 }
 0x659   : > { %v2875_v48 = vpop.permute.xlu1 %2874 }
 0x65c   : > { %7305 = vmatpush3.bf16.xpose.msk.msra.mxu1 %vm9002_vm3, %v7300_v13 }
 0x65d   : > { %7308 = vmatprep.subr.msk.bf16.mxu1 %vm9002_vm3, %v7306_v62 }
 0x664   : > { %7311 = vmatpush3.bf16.xpose.msk.msra.mxu1 %vm9002_vm3, %v7306_v62 }
 0x665   : > { %7353 = vmatprep.subr.bf16.mxu1 %v9293_v12 }
 0x666   : > { %v6670_v23 = vpop.f32.mrb[24].mxu1 }
 0x667   : > { %1947 = vst.msk [vmem:[#allocation3 + $0x8] sm:$0xff] %vm1574_vm2, %v6670_v23  ;;  %v1907_v57 = vpop.f32.mrb[25].mxu1 }
 0x668   : > { %1946 = vst.msk [vmem:[#allocation3] sm:$0xff] %vm1574_vm2, %v1907_v57 }
 0x66b   : > { %6809 = vmatmul.mubr.msk.f32.vlgmr.msra.gmra.mrb[48].mxu1 %vm1574_vm2, %v2867_v32  ;;  %v10695_v32 = vld [vmem:[#allocation31_spill] sm:$0xff] }
 0x66c   : > { %6811 = vmatprep.mubr.msk.f32.mxu1 %vm1574_vm2, %v2869_v8  ;;  %7355 = vmatpush3.bf16.msra.mxu1 %v9293_v12  ;;  %v2879_v12 = vpop.permute.xlu1 %2878  ;;  %v10696_v8 = vld [vmem:[#allocation29_spill] sm:$0xff] }
 0x66d   : > { %7357 = vmatprep.subr.bf16.mxu1 %v9301_v3 }
 0x66f   : > { %6812 = vmatmul.mubr.msk.f32.gmra.mrb[50].mxu1 %vm1574_vm2, %v2871_v44 }
 0x670   : > { %6814 = vmatprep.mubr.msk.f32.mxu1 %vm1574_vm2, %v2873_v29  ;;  %7359 = vmatpush3.bf16.msra.mxu1 %v9301_v3 }
 0x671   : > { %7361 = vmatprep.subr.bf16.mxu1 %v9309_v17 }
 0x673   : > { %6815 = vmatmul.mubr.msk.f32.gmra.mrb[52].mxu1 %vm1574_vm2, %v2875_v48 }
 0x674   : > { %6817 = vmatprep.mubr.msk.f32.mxu1 %vm1574_vm2, %v2877_v25  ;;  %7363 = vmatpush3.bf16.msra.mxu1 %v9309_v17 }
 0x675   : > { %7365 = vmatprep.subr.bf16.mxu1 %v9313_v30 }
 0x677   : > { %6818 = vmatmul.mubr.msk.f32.gmra.mrb[54].mxu1 %vm1574_vm2, %v2879_v12 }
 0x678   : > { %7367 = vmatpush3.bf16.msra.mxu1 %v9313_v30 }
 0x69b   : > { %v6673_v60 = vpop.f32.mrb[26].mxu1 }
 0x69c   : > { %1949 = vst.msk [vmem:[#allocation3 + $0x18] sm:$0xff] %vm1574_vm2, %v6673_v60  ;;  %v1917_v3 = vpop.f32.mrb[27].mxu1 }
 0x69d   : > { %1948 = vst.msk [vmem:[#allocation3 + $0x10] sm:$0xff] %vm1574_vm2, %v1917_v3 }
 0x69f   : > { %v6676_v21 = vpop.f32.mrb[28].mxu1 }
 0x6a0   : > { %1951 = vst.msk [vmem:[#allocation3 + $0x28] sm:$0xff] %vm1574_vm2, %v6676_v21  ;;  %v1927_v59 = vpop.f32.mrb[29].mxu1 }
 0x6a1   : > { %1950 = vst.msk [vmem:[#allocation3 + $0x20] sm:$0xff] %vm1574_vm2, %v1927_v59 }
 0x6a3   : > { %v6679_v17 = vpop.f32.mrb[30].mxu1 }
 0x6a4   : > { %1953 = vst.msk [vmem:[#allocation3 + $0x38] sm:$0xff] %vm1574_vm2, %v6679_v17  ;;  %v1937_v24 = vpop.f32.mrb[31].mxu1 }
 0x6a5   : > { %1952 = vst.msk [vmem:[#allocation3 + $0x30] sm:$0xff] %vm1574_vm2, %v1937_v24 }
 0x6d6   : > { %v9678_v49 = vpop.f32.mrb[32].mxu1 }
 0x6d7   : > { %v9680_v30 = vpop.f32.mrb[33].mxu1 }
 0x6de   : > { %v9682_v4 = vpop.f32.mrb[34].mxu1 }
 0x6df   : > { %v9684_v36 = vpop.f32.mrb[35].mxu1 }
 0x6e2   : > { %v9686_v34 = vpop.f32.mrb[36].mxu1 }
 0x6e3   : > { %v9688_v9 = vpop.f32.mrb[37].mxu1 }
 0x6ea   : > { %v9690_v53 = vpop.f32.mrb[38].mxu1 }
 0x6eb   : > { %v9692_v19 = vpop.f32.mrb[39].mxu1 }
 0x71e   : > { %v9694_v5 = vpop.f32.mrb[40].mxu1 }
 0x71f   : > { %v9696_v11 = vpop.f32.mrb[41].mxu1 }
 0x722   : > { %v9698_v50 = vpop.f32.mrb[42].mxu1 }
 0x723   : > { %v9700_v61 = vpop.f32.mrb[43].mxu1 }
 0x726   : > { %v9702_v46 = vpop.f32.mrb[44].mxu1 }
 0x727   : > { %v9704_v39 = vpop.f32.mrb[45].mxu1 }
 0x72a   : > { %v9706_v40 = vpop.f32.mrb[46].mxu1 }
 0x72b   : > { %v9708_v10 = vpop.f32.mrb[47].mxu1 }
 0x73e   : > { %v6810_v52 = vpop.f32.mrb[48].mxu1 }
 0x73f   : > { %v2994_v41 = vpop.f32.mrb[49].mxu1  ;;  %v3036_v28 = vsel %vm1728_vm4, %v6810_v52, -inf }
 0x740   : > { %3037 = vmax.xlane.f32.xlu1 %v3036_v28  ;;  %v3033_v1 = vsel %vm1728_vm4, %v2994_v41, -inf }
 0x741   : > { %3034 = vmax.xlane.f32.xlu0 %v3033_v1 }
 0x742   : > { %v6813_v0 = vpop.f32.mrb[50].mxu1 }
 0x743   : > { %v3004_v27 = vpop.f32.mrb[51].mxu1  ;;  %v3042_v15 = vsel %vm1728_vm4, %v6813_v0, -inf }
 0x744   : > { %v3039_v47 = vsel %vm1728_vm4, %v3004_v27, -inf }
 0x745   : > { %3040 = vmax.xlane.f32.xlu0 %v3039_v47 }
 0x746   : > { %v6816_v35 = vpop.f32.mrb[52].mxu1 }
 0x747   : > { %v3014_v18 = vpop.f32.mrb[53].mxu1  ;;  %v3048_v31 = vsel %vm1728_vm4, %v6816_v35, -inf }
 0x748   : > { %v3045_v2 = vsel %vm1728_vm4, %v3014_v18, -inf }
 0x749   : > { %3043 = vmax.xlane.f32.xlu0 %v3042_v15  ;;  %3046 = vmax.xlane.f32.xlu1 %v3045_v2 }
 0x74a   : > { %v6819_v56 = vpop.f32.mrb[54].mxu1 }
 0x74b   : > { %v3024_v20 = vpop.f32.mrb[55].mxu1  ;;  %v3054_v33 = vsel %vm1728_vm4, %v6819_v56, -inf }
 0x74c   : > { %v3051_v54 = vsel %vm1728_vm4, %v3024_v20, -inf }
 0x74d   : > { %3049 = vmax.xlane.f32.xlu0 %v3048_v31 }
 0x751   : > { %3055 = vmax.xlane.f32.xlu0 %v3054_v33 }
 0x75a   : > { %7723 = vrot.lane.b32.xlu1 %v9146_v63, %s8442_s28 }
 0x77e   : > { %3052 = vmax.xlane.f32.xlu1 %v3051_v54 }
 0x78f   : > { %7733 = vrot.lane.b32.xlu1 %v10694_v38, %s8442_s28 }
 0x7cd   : > { %v3038_v45 = vpop.xlane.xlu1 %3037 }
 0x7ce   : > { %v3058_v7 = vsub.f32 %v6810_v52, %v3038_v45  ;;  %v3035_v42 = vpop.xlane.xlu0 %3034 }
 0x7cf   : > { %v3057_v26 = vsub.f32 %v2994_v41, %v3035_v42 }
 0x7d0   : > { %v3067_v43 = vmul.f32 1.442695, %v3058_v7 }
 0x7d1   : > { %v3065_v14 = vmul.f32 1.442695, %v3057_v26 }
 0x7d2   : > { %7958 = vpow2.f32 %v3067_v43  ;;  %v3041_v23 = vpop.xlane.xlu0 %3040 }
 0x7d3   : > { %7960 = vpow2.f32 %v3065_v14  ;;  %v3059_v44 = vsub.f32 %v3004_v27, %v3041_v23 }
 0x7d5   : > { %v3069_v25 = vmul.f32 1.442695, %v3059_v44  ;;  %v10697_v44 = vld [vmem:[#allocation32_spill] sm:$0xff] }
 0x7d6   : > { %v3047_v58 = vpop.xlane.xlu1 %3046  ;;  %v3044_v57 = vpop.xlane.xlu0 %3043 }
 0x7d7   : > { %v3060_v29 = vsub.f32 %v6813_v0, %v3044_v57  ;;  %v3061_v12 = vsub.f32 %v3014_v18, %v3047_v58  ;;  %7962 = vpow2.f32 %v3069_v25 }
 0x7d9   : > { %v3071_v60 = vmul.f32 1.442695, %v3060_v29  ;;  %v3073_v3 = vmul.f32 1.442695, %v3061_v12  ;;  %v10698_v29 = vld [vmem:[#allocation34_spill] sm:$0xff] }
 0x7da   : > { %v7724_v22 = vpop.permute.xlu1 %7723  ;;  %v3050_v48 = vpop.xlane.xlu0 %3049 }
 0x7db   : > { %v7726_v13 = vunpack.i.h.bf16 %v7724_v22  ;;  %v7725_v51 = vunpack.i.l.bf16 %v7724_v22  ;;  %v3062_v21 = vsub.f32 %v6816_v35, %v3050_v48  ;;  %7964 = vpow2.f32 %v3071_v60 }
 0x7dc   : > { %v9722_v16 = vpop.eup %7958  ;;  %7966 = vpow2.f32 %v3073_v3 }
 0x7dd   : > { %v9724_v63 = vpop.eup %7960  ;;  %v3084_v55 = vsel %vm1728_vm4, %v9722_v16, 0.0  ;;  %v7312_v37 = vpack.c.bf16 %v7726_v13, %v7725_v51  ;;  %v3075_v17 = vmul.f32 1.442695, %v3062_v21 }
 0x7de   : > { %3085 = vadd.xlane.f32.xlu0 %v3084_v55  ;;  %v3081_v62 = vsel %vm1728_vm4, %v9724_v63, 0.0  ;;  %v3056_v59 = vpop.xlane.xlu0 %3055 }
 0x7df   : > { %7313 = vmatprep.subr.bf16.mxu0 %v7312_v37  ;;  %3082 = vadd.xlane.f32.xlu1 %v3081_v62  ;;  %v3064_v24 = vsub.f32 %v6819_v56, %v3056_v59  ;;  %7968 = vpow2.f32 %v3075_v17 }
 0x7e0   : > { %7315 = vmatpush3.bf16.msra.mxu0 %v7312_v37 }
 0x7e1   : > { %v3079_v28 = vmul.f32 1.442695, %v3064_v24  ;;  %v9734_v47 = vpop.eup %7962 }
 0x7e2   : > { %v3087_v27 = vsel %vm1728_vm4, %v9734_v47, 0.0 }
 0x7e5   : > { %v9736_v0 = vpop.eup %7964 }
 0x7e6   : > { %v9740_v35 = vpop.eup %7966  ;;  %v3090_v18 = vsel %vm1728_vm4, %v9736_v0, 0.0 }
 0x7e7   : > { %v3093_v15 = vsel %vm1728_vm4, %v9740_v35, 0.0 }
 0x7e9   : > { %v9746_v2 = vpop.eup %7968 }
 0x7f0   : > { %7738 = vrot.lane.b32.xlu1 %v10695_v32, %s8442_s28 }
 0x7f4   : > { %7728 = vrot.lane.b32.xlu0 %v10696_v8, %s8442_s28 }
 0x80b   : > { %v3053_v52 = vpop.xlane.xlu1 %3052 }
 0x80c   : > { %v3063_v41 = vsub.f32 %v3024_v20, %v3053_v52  ;;  %v3096_v20 = vsel %vm1728_vm4, %v9746_v2, 0.0 }
 0x80e   : > { %v3077_v1 = vmul.f32 1.442695, %v3063_v41 }
 0x80f   : > { %v7734_v38 = vpop.permute.xlu1 %7733 }
 0x810   : > { %7970 = vpow2.f32 %v3077_v1  ;;  %v7736_v26 = vunpack.i.h.bf16 %v7734_v38  ;;  %v7735_v43 = vunpack.i.l.bf16 %v7734_v38 }
 0x811   : > { %7972 = vpow2.f32 %v3079_v28 }
 0x812   : > { %v7320_v37 = vpack.c.bf16 %v7736_v26, %v7735_v43  ;;  %v10706_v26 = vld [vmem:[#allocation25_spill] sm:$0xff] }
 0x813   : > { %3088 = vadd.xlane.f32.xlu0 %v3087_v27 }
 0x814   : > { %3091 = vadd.xlane.f32.xlu1 %v3090_v18 }
 0x817   : > { %3094 = vadd.xlane.f32.xlu0 %v3093_v15 }
 0x81a   : > { %v9748_v56 = vpop.eup %7970 }
 0x81b   : > { %v9752_v31 = vpop.eup %7972  ;;  %3097 = vadd.xlane.f32.xlu0 %v3096_v20  ;;  %v3099_v33 = vsel %vm1728_vm4, %v9748_v56, 0.0  ;;  %v8118_v20 = vld [vmem:[%s8844_s7] ss:$0 sm:$0xff]  ;;  %s8443_s7 = smov 8  }
 0x81c   : > { %3100 = vadd.xlane.f32.xlu1 %v3099_v33  ;;  %v3102_v54 = vsel %vm1728_vm4, %v9752_v31, 0.0  ;;  %v10701_v33 = vld [vmem:[#allocation22_spill] sm:$0xff]  ;;  %v9825_v43 = vadd.f32 %v8118_v20, %v10706_v26 }
 0x81f   : > { %3103 = vadd.xlane.f32.xlu0 %v3102_v54  ;;  %v9799_v54 = vadd.f32 %v8118_v20, %v10701_v33 }
 0x86b   : > { %v3086_v45 = vpop.xlane.xlu0 %3085 }
 0x86c   : > { %v3083_v7 = vpop.xlane.xlu1 %3082 }
 0x86d   : > { %7974 = vrcp.f32 %v3083_v7  ;;  %v10705_v7 = vld [vmem:[#allocation26_spill] sm:$0xff] }
 0x86e   : > { %7976 = vrcp.f32 %v3086_v45 }
 0x86f   : > { %v7729_v42 = vpop.permute.xlu0 %7728 }
 0x870   : > { %v7731_v14 = vunpack.i.h.bf16 %v7729_v42  ;;  %v7730_v58 = vunpack.i.l.bf16 %v7729_v42  ;;  %v7739_v22 = vpop.permute.xlu1 %7738  ;;  %v9818_v42 = vadd.f32 %v8118_v20, %v10705_v7 }
 0x871   : > { %v7741_v51 = vunpack.i.h.bf16 %v7739_v22  ;;  %v7740_v55 = vunpack.i.l.bf16 %v7739_v22  ;;  %v10708_v22 = vld [vmem:[#allocation27_spill] sm:$0xff] }
 0x872   : > { %v7316_v13 = vpack.c.bf16 %v7731_v14, %v7730_v58  ;;  %v10707_v14 = vld [vmem:[#allocation28_spill] sm:$0xff] }
 0x873   : > { %v7324_v32 = vpack.c.bf16 %v7741_v51, %v7740_v55  ;;  %v9828_v58 = vadd.f32 %v8118_v20, %v10707_v14 }
 0x874   : > { %7317 = vmatprep.subr.bf16.mxu0 %v7316_v13 }
 0x875   : > { %7319 = vmatpush3.bf16.msra.mxu0 %v7316_v13  ;;  %v9835_v13 = vadd.f32 %v8118_v20, %v10708_v22 }
 0x876   : > { %7321 = vmatprep.subr.bf16.mxu0 %v7320_v37 }
 0x877   : > { %v7975_v62 = vpop.eup %7974 }
 0x878   : > { %v3113_v23 = vmul.f32 %v7975_v62, %v9724_v63  ;;  %v7977_v8 = vpop.eup %7976  ;;  %v10699_v63 = vld [vmem:[#allocation36_spill] sm:$0xff] }
 0x879   : > { %7323 = vmatpush3.bf16.msra.mxu0 %v7320_v37  ;;  %v3114_v57 = vmul.f32 %v7977_v8, %v9722_v16  ;;  %v10700_v16 = vld [vmem:[#allocation38_spill] sm:$0xff] }
 0x87a   : > { %7325 = vmatprep.subr.bf16.mxu0 %v7324_v32  ;;  %6836 = vmatprep.mubr.msk.f32.mxu0 %vm1728_vm4, %v3113_v23 }
 0x87d   : > { %7327 = vmatpush3.bf16.msra.mxu0 %v7324_v32 }
 0x87e   : > { %7330 = vmatprep.subr.msk.bf16.mxu0 %vm9002_vm3, %v10697_v44 }
 0x880   : > { %6837 = vmatmul.mubr.msk.f32.vlgmr.msra.gmra.mrb[48].mxu0 %vm1728_vm4, %v3114_v57 }
 0x886   : > { %7333 = vmatpush3.bf16.xpose.msk.msra.mxu0 %vm9002_vm3, %v10697_v44 }
 0x887   : > { %7336 = vmatprep.subr.msk.bf16.mxu0 %vm9002_vm3, %v10698_v29 }
 0x88e   : > { %7339 = vmatpush3.bf16.xpose.msk.msra.mxu0 %vm9002_vm3, %v10698_v29 }
 0x88f   : > { %7342 = vmatprep.subr.msk.bf16.mxu0 %vm9002_vm3, %v10699_v63 }
 0x896   : > { %7345 = vmatpush3.bf16.xpose.msk.msra.mxu0 %vm9002_vm3, %v10699_v63 }
 0x897   : > { %7348 = vmatprep.subr.msk.bf16.mxu0 %vm9002_vm3, %v10700_v16 }
 0x89e   : > { %7351 = vmatpush3.bf16.xpose.msk.msra.mxu0 %vm9002_vm3, %v10700_v16 }
 0x8a0   : > { %v3089_v48 = vpop.xlane.xlu0 %3088 }
 0x8a1   : > { %7978 = vrcp.f32 %v3089_v48  ;;  %v3092_v25 = vpop.xlane.xlu1 %3091 }
 0x8a2   : > { %7980 = vrcp.f32 %v3092_v25 }
 0x8a4   : > { %v3095_v12 = vpop.xlane.xlu0 %3094 }
 0x8a5   : > { %7982 = vrcp.f32 %v3095_v12 }
 0x8a8   : > { %v3098_v60 = vpop.xlane.xlu0 %3097 }
 0x8a9   : > { %7984 = vrcp.f32 %v3098_v60  ;;  %v3101_v3 = vpop.xlane.xlu1 %3100 }
 0x8aa   : > { %7986 = vrcp.f32 %v3101_v3 }
 0x8ab   : > { %v7979_v21 = vpop.eup %7978 }
 0x8ac   : > { %v7981_v59 = vpop.eup %7980  ;;  %v3104_v17 = vpop.xlane.xlu0 %3103  ;;  %v3115_v24 = vmul.f32 %v7979_v21, %v9734_v47 }
 0x8ad   : > { %7988 = vrcp.f32 %v3104_v17  ;;  %v3116_v52 = vmul.f32 %v7981_v59, %v9736_v0 }
 0x8ae   : > { %6839 = vmatprep.mubr.msk.f32.mxu0 %vm1728_vm4, %v3115_v24 }
 0x8af   : > { %v7983_v41 = vpop.eup %7982  ;;  %6840 = vmatmul.mubr.msk.f32.gmra.mrb[50].mxu0 %vm1728_vm4, %v3116_v52 }
 0x8b0   : > { %v3117_v28 = vmul.f32 %v7983_v41, %v9740_v35  ;;  %v10702_v35 = vld [vmem:[#allocation21_spill] sm:$0xff] }
 0x8b2   : > { %6842 = vmatprep.mubr.msk.f32.mxu0 %vm1728_vm4, %v3117_v28 }
 0x8b3   : > { %v7985_v1 = vpop.eup %7984 }
 0x8b4   : > { %v7987_v27 = vpop.eup %7986  ;;  %v3118_v18 = vmul.f32 %v7985_v1, %v9746_v2  ;;  %v9805_v2 = vadd.f32 %v8118_v20, %v10702_v35  ;;  %v10710_v1 = vld [vmem:[#allocation33_spill] sm:$0xff] }
 0x8b5   : > { %v3119_v15 = vmul.f32 %v7987_v27, %v9748_v56  ;;  %v10703_v56 = vld [vmem:[#allocation24_spill] sm:$0xff] }
 0x8b6   : > { %6843 = vmatmul.mubr.msk.f32.gmra.mrb[52].mxu0 %vm1728_vm4, %v3118_v18  ;;  %v9808_v38 = vadd.f32 %v8118_v20, %v10703_v56 }
 0x8b7   : > { %v7989_v47 = vpop.eup %7988  ;;  %6845 = vmatprep.mubr.msk.f32.mxu0 %vm1728_vm4, %v3119_v15 }
 0x8b8   : > { %v3120_v0 = vmul.f32 %v7989_v47, %v9752_v31  ;;  %v10704_v31 = vld [vmem:[#allocation23_spill] sm:$0xff] }
 0x8b9   : > { %v9815_v45 = vadd.f32 %v8118_v20, %v10704_v31 }
 0x8ba   : > { %6846 = vmatmul.mubr.msk.f32.gmra.mrb[54].mxu0 %vm1728_vm4, %v3120_v0 }
 0x8bb   : > { %6864 = vmatprep.mubr.msk.f32.mxu0 %vm1574_vm2, %v9799_v54 }
 0x8be   : > { %6865 = vmatmul.mubr.msk.f32.vlgmr.msra.gmra.mrb[56].mxu0 %vm1574_vm2, %v9805_v2 }
 0x8bf   : > { %6867 = vmatprep.mubr.msk.f32.mxu0 %vm1574_vm2, %v9808_v38 }
 0x8c2   : > { %6868 = vmatmul.mubr.msk.f32.gmra.mrb[58].mxu0 %vm1574_vm2, %v9815_v45 }
 0x8c3   : > { %6870 = vmatprep.mubr.msk.f32.mxu0 %vm1574_vm2, %v9818_v42 }
 0x8c6   : > { %6871 = vmatmul.mubr.msk.f32.gmra.mrb[60].mxu0 %vm1574_vm2, %v9825_v43 }
 0x8c7   : > { %6873 = vmatprep.mubr.msk.f32.mxu0 %vm1574_vm2, %v9828_v58 }
 0x8ca   : > { %6874 = vmatmul.mubr.msk.f32.gmra.mrb[62].mxu0 %vm1574_vm2, %v9835_v13 }
 0x953   : > { %v9839_v51 = vpop.f32.mrb[48].mxu0 }
 0x954   : > { %v9841_v55 = vpop.f32.mrb[49].mxu0 }
 0x982   : > { %v9843_v37 = vpop.f32.mrb[50].mxu0 }
 0x983   : > { %v9845_v62 = vpop.f32.mrb[51].mxu0 }
 0x989   : > { %v9847_v32 = vpop.f32.mrb[52].mxu0 }
 0x98a   : > { %v9849_v23 = vpop.f32.mrb[53].mxu0 }
 0x98d   : > { %v9851_v8 = vpop.f32.mrb[54].mxu0 }
 0x98e   : > { %v9853_v57 = vpop.f32.mrb[55].mxu0 }
 0x98f   : > { %10709 = vst [vmem:[#allocation30_spill] sm:$0xff] %v9853_v57 }
 0x991   : > { %v6866_v44 = vpop.f32.mrb[56].mxu0 }
 0x992   : > { %v3429_v29 = vpop.f32.mrb[57].mxu0  ;;  %v3471_v63 = vsel %vm1728_vm4, %v6866_v44, -inf }
 0x993   : > { %3472 = vmax.xlane.f32.xlu0 %v3471_v63  ;;  %v3468_v16 = vsel %vm1728_vm4, %v3429_v29, -inf }
 0x994   : > { %3469 = vmax.xlane.f32.xlu1 %v3468_v16 }
 0x995   : > { %v6869_v48 = vpop.f32.mrb[58].mxu0 }
 0x996   : > { %v3439_v25 = vpop.f32.mrb[59].mxu0  ;;  %v3477_v12 = vsel %vm1728_vm4, %v6869_v48, -inf }
 0x997   : > { %3478 = vmax.xlane.f32.xlu0 %v3477_v12  ;;  %v3474_v60 = vsel %vm1728_vm4, %v3439_v25, -inf }
 0x998   : > { %3475 = vmax.xlane.f32.xlu1 %v3474_v60 }
 0x999   : > { %v6872_v3 = vpop.f32.mrb[60].mxu0 }
 0x99a   : > { %v3449_v21 = vpop.f32.mrb[61].mxu0  ;;  %v3483_v59 = vsel %vm1728_vm4, %v6872_v3, -inf }
 0x99b   : > { %3484 = vmax.xlane.f32.xlu0 %v3483_v59  ;;  %v3480_v17 = vsel %vm1728_vm4, %v3449_v21, -inf }
 0x99c   : > { %3481 = vmax.xlane.f32.xlu1 %v3480_v17 }
 0x99d   : > { %v6875_v24 = vpop.f32.mrb[62].mxu0 }
 0x99e   : > { %v3459_v52 = vpop.f32.mrb[63].mxu0  ;;  %v3489_v41 = vsel %vm1728_vm4, %v6875_v24, -inf }
 0x99f   : > { %3490 = vmax.xlane.f32.xlu0 %v3489_v41  ;;  %v3486_v28 = vsel %vm1728_vm4, %v3459_v52, -inf }
 0x9a0   : > { %3487 = vmax.xlane.f32.xlu1 %v3486_v28 }
 0x9b1   : > { %7743 = vrot.lane.b32.xlu1 %v10710_v1, %s8440_s0 }
 0xa20   : > { %v3473_v27 = vpop.xlane.xlu0 %3472 }
 0xa21   : > { %v3493_v18 = vsub.f32 %v6866_v44, %v3473_v27  ;;  %v3470_v15 = vpop.xlane.xlu1 %3469 }
 0xa22   : > { %v3492_v47 = vsub.f32 %v3429_v29, %v3470_v15 }
 0xa23   : > { %v3502_v0 = vmul.f32 1.442695, %v3493_v18 }
 0xa24   : > { %v3500_v20 = vmul.f32 1.442695, %v3492_v47  ;;  %v3479_v33 = vpop.xlane.xlu0 %3478 }
 0xa25   : > { %7990 = vpow2.f32 %v3502_v0  ;;  %v3495_v35 = vsub.f32 %v6869_v48, %v3479_v33  ;;  %v3476_v56 = vpop.xlane.xlu1 %3475 }
 0xa26   : > { %7992 = vpow2.f32 %v3500_v20  ;;  %v3494_v31 = vsub.f32 %v3439_v25, %v3476_v56 }
 0xa27   : > { %v3506_v7 = vmul.f32 1.442695, %v3495_v35 }
 0xa28   : > { %v3504_v26 = vmul.f32 1.442695, %v3494_v31  ;;  %v3485_v14 = vpop.xlane.xlu0 %3484 }
 0xa29   : > { %7994 = vpow2.f32 %v3506_v7  ;;  %v3497_v22 = vsub.f32 %v6872_v3, %v3485_v14  ;;  %v3482_v63 = vpop.xlane.xlu1 %3481 }
 0xa2a   : > { %7996 = vpow2.f32 %v3504_v26  ;;  %v3496_v16 = vsub.f32 %v3449_v21, %v3482_v63  ;;  %v10711_v63 = vld [vmem:[#allocation37_spill] sm:$0xff] }
 0xa2b   : > { %v3510_v12 = vmul.f32 1.442695, %v3497_v22 }
 0xa2c   : > { %v3508_v44 = vmul.f32 1.442695, %v3496_v16  ;;  %v3491_v60 = vpop.xlane.xlu0 %3490  ;;  %v10712_v16 = vld [vmem:[#allocation39_spill] sm:$0xff] }
 0xa2d   : > { %7998 = vpow2.f32 %v3510_v12  ;;  %v3499_v29 = vsub.f32 %v6875_v24, %v3491_v60  ;;  %v3488_v59 = vpop.xlane.xlu1 %3487  ;;  %v10713_v12 = vld [vmem:[#allocation35_spill] sm:$0xff] }
 0xa2e   : > { %8000 = vpow2.f32 %v3508_v44  ;;  %v3498_v17 = vsub.f32 %v3459_v52, %v3488_v59 }
 0xa2f   : > { %v7991_v48 = vpop.eup %7990  ;;  %v3514_v41 = vmul.f32 1.442695, %v3499_v29 }
 0xa30   : > { %v7993_v28 = vpop.eup %7992  ;;  %v3512_v25 = vmul.f32 1.442695, %v3498_v17  ;;  %v3519_v27 = vsel %vm1728_vm4, %v7991_v48, 0.0 }
 0xa31   : > { %8002 = vpow2.f32 %v3514_v41  ;;  %3520 = vadd.xlane.f32.xlu0 %v3519_v27  ;;  %v7744_v3 = vpop.permute.xlu1 %7743  ;;  %v3516_v18 = vsel %vm1728_vm4, %v7993_v28, 0.0 }
 0xa32   : > { %v7746_v21 = vunpack.i.h.bf16 %v7744_v3  ;;  %v7745_v15 = vunpack.i.l.bf16 %v7744_v3  ;;  %3517 = vadd.xlane.f32.xlu1 %v3516_v18  ;;  %8004 = vpow2.f32 %v3512_v25 }
 0xa33   : > { %v7995_v47 = vpop.eup %7994 }
 0xa34   : > { %v7997_v24 = vpop.eup %7996  ;;  %v7368_v0 = vpack.c.bf16 %v7746_v21, %v7745_v15  ;;  %v3525_v52 = vsel %vm1728_vm4, %v7995_v47, 0.0 }
 0xa35   : > { %3526 = vadd.xlane.f32.xlu0 %v3525_v52  ;;  %v3522_v20 = vsel %vm1728_vm4, %v7997_v24, 0.0 }
 0xa36   : > { %3523 = vadd.xlane.f32.xlu1 %v3522_v20  ;;  %7370 = vmatprep.subr.msk.bf16.mxu1 %vm9002_vm3, %v7368_v0 }
 0xa37   : > { %v7999_v33 = vpop.eup %7998 }
 0xa38   : > { %v8001_v35 = vpop.eup %8000  ;;  %v3531_v56 = vsel %vm1728_vm4, %v7999_v33, 0.0 }
 0xa39   : > { %3532 = vadd.xlane.f32.xlu0 %v3531_v56  ;;  %v3528_v31 = vsel %vm1728_vm4, %v8001_v35, 0.0 }
 0xa3a   : > { %3529 = vadd.xlane.f32.xlu1 %v3528_v31 }
 0xa3b   : > { %v9873_v7 = vpop.eup %8002 }
 0xa3c   : > { %v3537_v26 = vsel %vm1728_vm4, %v9873_v7, 0.0  ;;  %v9877_v14 = vpop.eup %8004 }
 0xa3d   : > { %3538 = vadd.xlane.f32.xlu0 %v3537_v26  ;;  %v3534_v22 = vsel %vm1728_vm4, %v9877_v14, 0.0 }
 0xa41   : > { %3535 = vadd.xlane.f32.xlu0 %v3534_v22 }
 0xa4b   : > { %7753 = vrot.lane.b32.xlu1 %v10711_v63, %s8440_s0 }
 0xa4f   : > { %7758 = vrot.lane.b32.xlu1 %v10712_v16, %s8440_s0 }
 0xa53   : > { %3693 = vrot.lane.b32.xlu1 %v9799_v54, %s8440_s0 }
 0xa57   : > { %3695 = vrot.lane.b32.xlu1 %v9805_v2, %s8440_s0  ;;  %7748 = vrot.lane.b32.xlu0 %v10713_v12, %s8440_s0 }
 0xa5b   : > { %3699 = vrot.lane.b32.xlu1 %v9815_v45, %s8440_s0  ;;  %3697 = vrot.lane.b32.xlu0 %v9808_v38, %s8440_s0 }
 0xa5f   : > { %3703 = vrot.lane.b32.xlu1 %v9825_v43, %s8440_s0  ;;  %3701 = vrot.lane.b32.xlu0 %v9818_v42, %s8440_s0 }
 0xa63   : > { %3707 = vrot.lane.b32.xlu1 %v9835_v13, %s8440_s0  ;;  %3705 = vrot.lane.b32.xlu0 %v9828_v58, %s8440_s0 }
 0xabe   : > { %v3521_v44 = vpop.xlane.xlu0 %3520 }
 0xabf   : > { %8006 = vrcp.f32 %v3521_v44  ;;  %v3518_v60 = vpop.xlane.xlu1 %3517 }
 0xac0   : > { %8008 = vrcp.f32 %v3518_v60 }
 0xac2   : > { %v3527_v29 = vpop.xlane.xlu0 %3526 }
 0xac3   : > { %8010 = vrcp.f32 %v3527_v29  ;;  %v3524_v59 = vpop.xlane.xlu1 %3523 }
 0xac4   : > { %8012 = vrcp.f32 %v3524_v59 }
 0xac6   : > { %v3533_v17 = vpop.xlane.xlu0 %3532 }
 0xac7   : > { %8014 = vrcp.f32 %v3533_v17  ;;  %v3530_v41 = vpop.xlane.xlu1 %3529 }
 0xac8   : > { %8016 = vrcp.f32 %v3530_v41 }
 0xac9   : > { %v8007_v25 = vpop.eup %8006 }
 0xaca   : > { %v8009_v27 = vpop.eup %8008  ;;  %v3539_v3 = vpop.xlane.xlu0 %3538  ;;  %v3549_v21 = vmul.f32 %v8007_v25, %v7991_v48 }
 0xacb   : > { %v3548_v18 = vmul.f32 %v8009_v27, %v7993_v28  ;;  %8018 = vrcp.f32 %v3539_v3  ;;  %v7754_v56 = vpop.permute.xlu1 %7753 }
 0xacc   : > { %v7756_v48 = vunpack.i.h.bf16 %v7754_v56  ;;  %v7755_v60 = vunpack.i.l.bf16 %v7754_v56 }
 0xacd   : > { %v8011_v15 = vpop.eup %8010  ;;  %6892 = vmatprep.mubr.msk.f32.mxu1 %vm1728_vm4, %v3548_v18 }
 0xace   : > { %v8013_v52 = vpop.eup %8012  ;;  %v3536_v20 = vpop.xlane.xlu0 %3535  ;;  %6893 = vmatmul.mubr.msk.f32.vlgmr.msra.gmra.mrb[56].mxu1 %vm1728_vm4, %v3549_v21  ;;  %v3551_v26 = vmul.f32 %v8011_v15, %v7995_v47 }
 0xacf   : > { %8020 = vrcp.f32 %v3536_v20  ;;  %7373 = vmatpush3.bf16.xpose.msk.msra.mxu1 %vm9002_vm3, %v7368_v0  ;;  %v3550_v31 = vmul.f32 %v8013_v52, %v7997_v24  ;;  %v7380_v24 = vpack.c.bf16 %v7756_v48, %v7755_v60  ;;  %v7759_v47 = vpop.permute.xlu1 %7758 }
 0xad0   : > { %v7760_v3 = vunpack.i.l.bf16 %v7759_v47 }
 0xad1   : > { %v8015_v22 = vpop.eup %8014  ;;  %6895 = vmatprep.mubr.msk.f32.mxu1 %vm1728_vm4, %v3550_v31 }
 0xad2   : > { %v8017_v28 = vpop.eup %8016  ;;  %v7749_v44 = vpop.permute.xlu0 %7748  ;;  %6896 = vmatmul.mubr.msk.f32.gmra.mrb[58].mxu1 %vm1728_vm4, %v3551_v26  ;;  %v3553_v41 = vmul.f32 %v8015_v22, %v7999_v33 }
 0xad3   : > { %v7751_v29 = vunpack.i.h.bf16 %v7749_v44  ;;  %v7750_v59 = vunpack.i.l.bf16 %v7749_v44  ;;  %v3552_v17 = vmul.f32 %v8017_v28, %v8001_v35  ;;  %v7761_v35 = vunpack.i.h.bf16 %v7759_v47  ;;  %v3694_v21 = vpop.permute.xlu1 %3693 }
 0xad5   : > { %v7374_v25 = vpack.c.bf16 %v7751_v29, %v7750_v59  ;;  %6898 = vmatprep.mubr.msk.f32.mxu1 %vm1728_vm4, %v3552_v17  ;;  %v8019_v0 = vpop.eup %8018  ;;  %v7386_v15 = vpack.c.bf16 %v7761_v35, %v7760_v3 }
 0xad6   : > { %6899 = vmatmul.mubr.msk.f32.gmra.mrb[60].mxu1 %vm1728_vm4, %v3553_v41  ;;  %v3555_v18 = vmul.f32 %v8019_v0, %v9873_v7 }
 0xad7   : > { %7376 = vmatprep.subr.msk.bf16.mxu1 %vm9002_vm3, %v7374_v25  ;;  %v3696_v52 = vpop.permute.xlu1 %3695 }
 0xad8   : > { %7379 = vmatpush3.bf16.xpose.msk.msra.mxu1 %vm9002_vm3, %v7374_v25 }
 0xad9   : > { %v8021_v27 = vpop.eup %8020  ;;  %7382 = vmatprep.subr.msk.bf16.mxu1 %vm9002_vm3, %v7380_v24 }
 0xada   : > { %v3554_v33 = vmul.f32 %v8021_v27, %v9877_v14  ;;  %v3698_v14 = vpop.permute.xlu0 %3697 }
 0xadb   : > { %v3700_v7 = vpop.permute.xlu1 %3699 }
 0xadc   : > { %6901 = vmatprep.mubr.msk.f32.mxu1 %vm1728_vm4, %v3554_v33 }
 0xadd   : > { %6902 = vmatmul.mubr.msk.f32.gmra.mrb[62].mxu1 %vm1728_vm4, %v3555_v18 }
 0xade   : > { %6920 = vmatprep.mubr.msk.f32.mxu1 %vm1574_vm2, %v3694_v21  ;;  %v3702_v20 = vpop.permute.xlu0 %3701 }
 0xadf   : > { %v3704_v56 = vpop.permute.xlu1 %3703 }
 0xae0   : > { %7385 = vmatpush3.bf16.xpose.msk.msra.mxu1 %vm9002_vm3, %v7380_v24 }
 0xae1   : > { %7388 = vmatprep.subr.msk.bf16.mxu1 %vm9002_vm3, %v7386_v15 }
 0xae2   : > { %v3706_v31 = vpop.permute.xlu0 %3705 }
 0xae3   : > { %v3708_v26 = vpop.permute.xlu1 %3707 }
 0xae8   : > { %7391 = vmatpush3.bf16.xpose.msk.msra.mxu1 %vm9002_vm3, %v7386_v15 }
 0xaef   : > { %6921 = vmatmul.mubr.msk.f32.vlgmr.msra.gmra.mrb[64].mxu1 %vm1574_vm2, %v3696_v52 }
 0xaf0   : > { %6923 = vmatprep.mubr.msk.f32.mxu1 %vm1574_vm2, %v3698_v14 }
 0xaf3   : > { %6924 = vmatmul.mubr.msk.f32.gmra.mrb[66].mxu1 %vm1574_vm2, %v3700_v7  ;;  %v10714_v7 = vld [vmem:[#allocation40_spill] sm:$0xff] }
 0xaf4   : > { %6926 = vmatprep.mubr.msk.f32.mxu1 %vm1574_vm2, %v3702_v20  ;;  %v10715_v20 = vld [vmem:[#allocation41_spill] sm:$0xff] }
 0xaf7   : > { %6927 = vmatmul.mubr.msk.f32.gmra.mrb[68].mxu1 %vm1574_vm2, %v3704_v56 }
 0xaf8   : > { %6929 = vmatprep.mubr.msk.f32.mxu1 %vm1574_vm2, %v3706_v31  ;;  %v10716_v31 = vld [vmem:[#allocation42_spill] sm:$0xff] }
 0xafb   : > { %6930 = vmatmul.mubr.msk.f32.gmra.mrb[70].mxu1 %vm1574_vm2, %v3708_v26 }
 0xba1   : > { %v6894_v22 = vpop.f32.mrb[56].mxu1 }
 0xba2   : > { %3686 = vst.msk [vmem:[#allocation3 + $0x48] sm:$0xff] %vm1574_vm2, %v6894_v22  ;;  %v3646_v28 = vpop.f32.mrb[57].mxu1  ;;  %v10717_v22 = vld [vmem:[#allocation43_spill] sm:$0xff] }
 0xba3   : > { %3685 = vst.msk [vmem:[#allocation3 + $0x40] sm:$0xff] %vm1574_vm2, %v3646_v28 }
 0xba5   : > { %v6897_v48 = vpop.f32.mrb[58].mxu1 }
 0xba6   : > { %3688 = vst.msk [vmem:[#allocation3 + $0x58] sm:$0xff] %vm1574_vm2, %v6897_v48  ;;  %v3656_v44 = vpop.f32.mrb[59].mxu1 }
 0xba7   : > { %3687 = vst.msk [vmem:[#allocation3 + $0x50] sm:$0xff] %vm1574_vm2, %v3656_v44 }
 0xba9   : > { %v6900_v60 = vpop.f32.mrb[60].mxu1 }
 0xbaa   : > { %3690 = vst.msk [vmem:[#allocation3 + $0x68] sm:$0xff] %vm1574_vm2, %v6900_v60  ;;  %v3666_v29 = vpop.f32.mrb[61].mxu1 }
 0xbab   : > { %3689 = vst.msk [vmem:[#allocation3 + $0x60] sm:$0xff] %vm1574_vm2, %v3666_v29 }
 0xbb0   : > { %v6903_v59 = vpop.f32.mrb[62].mxu1 }
 0xbb1   : > { %3692 = vst.msk [vmem:[#allocation3 + $0x78] sm:$0xff] %vm1574_vm2, %v6903_v59  ;;  %v3676_v17 = vpop.f32.mrb[63].mxu1 }
 0xbb2   : > { %3691 = vst.msk [vmem:[#allocation3 + $0x70] sm:$0xff] %vm1574_vm2, %v3676_v17 }
 0xbc2   : > { %v6922_v41 = vpop.f32.mrb[64].mxu1 }
 0xbc3   : > { %v3823_v25 = vpop.f32.mrb[65].mxu1  ;;  %v3865_v24 = vsel %vm1728_vm4, %v6922_v41, -inf }
 0xbc4   : > { %3866 = vmax.xlane.f32.xlu1 %v3865_v24  ;;  %v3862_v47 = vsel %vm1728_vm4, %v3823_v25, -inf }
 0xbc5   : > { %3863 = vmax.xlane.f32.xlu0 %v3862_v47 }
 0xbc6   : > { %v9945_v0 = vpop.f32.mrb[66].mxu1 }
 0xbc7   : > { %v3833_v27 = vpop.f32.mrb[67].mxu1  ;;  %v3871_v33 = vsel %vm1728_vm4, %v9945_v0, -inf }
 0xbc8   : > { %v3868_v18 = vsel %vm1728_vm4, %v3833_v27, -inf }
 0xbc9   : > { %3872 = vmax.xlane.f32.xlu0 %v3871_v33 }
 0xbca   : > { %v6928_v35 = vpop.f32.mrb[68].mxu1 }
 0xbcb   : > { %v9949_v3 = vpop.f32.mrb[69].mxu1  ;;  %v3877_v52 = vsel %vm1728_vm4, %v6928_v35, -inf }
 0xbcc   : > { %v3874_v56 = vsel %vm1728_vm4, %v9949_v3, -inf }
 0xbcd   : > { %3869 = vmax.xlane.f32.xlu0 %v3868_v18 }
 0xbce   : > { %v6931_v21 = vpop.f32.mrb[70].mxu1 }
 0xbcf   : > { %v9952_v15 = vpop.f32.mrb[71].mxu1  ;;  %v3883_v14 = vsel %vm1728_vm4, %v6931_v21, -inf }
 0xbd0   : > { %v3880_v26 = vsel %vm1728_vm4, %v9952_v15, -inf }
 0xbd1   : > { %3878 = vmax.xlane.f32.xlu0 %v3877_v52 }
 0xbd5   : > { %7763 = vrot.lane.b32.xlu1 %v10714_v7, %s8440_s0  ;;  %3884 = vmax.xlane.f32.xlu0 %v3883_v14 }
 0xbeb   : > { %7768 = vrot.lane.b32.xlu0 %v10715_v20, %s8440_s0 }
 0xbf9   : > { %3875 = vmax.xlane.f32.xlu1 %v3874_v56 }
 0xc0a   : > { %7773 = vrot.lane.b32.xlu1 %v10716_v31, %s8440_s0 }
 0xc2e   : > { %3881 = vmax.xlane.f32.xlu1 %v3880_v26 }
 0xc3f   : > { %7778 = vrot.lane.b32.xlu1 %v10717_v22, %s8440_s0 }
 0xc51   : > { %v3867_v28 = vpop.xlane.xlu1 %3866 }
 0xc52   : > { %v3887_v48 = vsub.f32 %v6922_v41, %v3867_v28  ;;  %v3864_v44 = vpop.xlane.xlu0 %3863 }
 0xc53   : > { %v3886_v60 = vsub.f32 %v3823_v25, %v3864_v44 }
 0xc54   : > { %v3896_v29 = vmul.f32 1.442695, %v3887_v48 }
 0xc55   : > { %v3894_v59 = vmul.f32 1.442695, %v3886_v60  ;;  %v7764_v17 = vpop.permute.xlu1 %7763 }
 0xc56   : > { %8022 = vpow2.f32 %v3896_v29  ;;  %v7766_v24 = vunpack.i.h.bf16 %v7764_v17  ;;  %v7765_v47 = vunpack.i.l.bf16 %v7764_v17  ;;  %v3873_v33 = vpop.xlane.xlu0 %3872 }
 0xc57   : > { %8024 = vpow2.f32 %v3894_v59 }
 0xc58   : > { %v7392_v18 = vpack.c.bf16 %v7766_v24, %v7765_v47 }
 0xc5a   : > { %7393 = vmatprep.subr.bf16.mxu0 %v7392_v18  ;;  %v3870_v52 = vpop.xlane.xlu0 %3869 }
 0xc5b   : > { %v3888_v14 = vsub.f32 %v3833_v27, %v3870_v52  ;;  %7395 = vmatpush3.bf16.msra.mxu0 %v7392_v18  ;;  %v3889_v18 = vsub.f32 %v9945_v0, %v3873_v33 }
 0xc5d   : > { %v3898_v56 = vmul.f32 1.442695, %v3888_v14  ;;  %v3900_v14 = vmul.f32 1.442695, %v3889_v18 }
 0xc5e   : > { %v3879_v26 = vpop.xlane.xlu0 %3878 }
 0xc5f   : > { %8026 = vpow2.f32 %v3898_v56  ;;  %v3891_v57 = vsub.f32 %v6928_v35, %v3879_v26 }
 0xc60   : > { %v9968_v41 = vpop.eup %8022 }
 0xc61   : > { %v9970_v25 = vpop.eup %8024  ;;  %v3904_v28 = vmul.f32 1.442695, %v3891_v57  ;;  %v3913_v48 = vsel %vm1728_vm4, %v9968_v41, 0.0 }
 0xc62   : > { %3914 = vadd.xlane.f32.xlu0 %v3913_v48  ;;  %v3885_v44 = vpop.xlane.xlu0 %3884  ;;  %v3910_v60 = vsel %vm1728_vm4, %v9970_v25, 0.0 }
 0xc63   : > { %8028 = vpow2.f32 %v3904_v28  ;;  %3911 = vadd.xlane.f32.xlu1 %v3910_v60  ;;  %v3893_v52 = vsub.f32 %v6931_v21, %v3885_v44 }
 0xc64   : > { %8030 = vpow2.f32 %v3900_v14 }
 0xc65   : > { %v3908_v28 = vmul.f32 1.442695, %v3893_v52 }
 0xc66   : > { %v7769_v27 = vpop.permute.xlu0 %7768 }
 0xc67   : > { %v7771_v29 = vunpack.i.h.bf16 %v7769_v27  ;;  %v7770_v59 = vunpack.i.l.bf16 %v7769_v27 }
 0xc69   : > { %v9976_v17 = vpop.eup %8026  ;;  %v7396_v35 = vpack.c.bf16 %v7771_v29, %v7770_v59 }
 0xc6a   : > { %v3916_v24 = vsel %vm1728_vm4, %v9976_v17, 0.0 }
 0xc6b   : > { %3917 = vadd.xlane.f32.xlu0 %v3916_v24  ;;  %7397 = vmatprep.subr.bf16.mxu0 %v7396_v35 }
 0xc6c   : > { %7399 = vmatpush3.bf16.msra.mxu0 %v7396_v35 }
 0xc6d   : > { %v9980_v57 = vpop.eup %8028 }
 0xc6e   : > { %v3925_v47 = vsel %vm1728_vm4, %v9980_v57, 0.0  ;;  %v8031_v35 = vpop.eup %8030 }
 0xc6f   : > { %3926 = vadd.xlane.f32.xlu0 %v3925_v47 }
 0xc74   : > { %7783 = vrot.lane.b32.xlu1 %v10710_v1, %s8441_s15 }
 0xc86   : > { %v3876_v56 = vpop.xlane.xlu1 %3875 }
 0xc87   : > { %v3890_v26 = vsub.f32 %v9949_v3, %v3876_v56  ;;  %v3919_v3 = vsel %vm1728_vm4, %v8031_v35, 0.0 }
 0xc89   : > { %v3902_v48 = vmul.f32 1.442695, %v3890_v26 }
 0xc8a   : > { %v7774_v60 = vpop.permute.xlu1 %7773 }
 0xc8b   : > { %8032 = vpow2.f32 %v3902_v48  ;;  %v7776_v27 = vunpack.i.h.bf16 %v7774_v60  ;;  %v7775_v29 = vunpack.i.l.bf16 %v7774_v60 }
 0xc8c   : > { %8034 = vpow2.f32 %v3908_v28 }
 0xc8d   : > { %v7400_v59 = vpack.c.bf16 %v7776_v27, %v7775_v29 }
 0xc8f   : > { %7401 = vmatprep.subr.bf16.mxu0 %v7400_v59 }
 0xc90   : > { %7403 = vmatpush3.bf16.msra.mxu0 %v7400_v59 }
 0xc95   : > { %v9988_v24 = vpop.eup %8032 }
 0xc96   : > { %v3922_v0 = vsel %vm1728_vm4, %v9988_v24, 0.0  ;;  %v9992_v21 = vpop.eup %8034 }
 0xc97   : > { %3923 = vadd.xlane.f32.xlu0 %v3922_v0  ;;  %v3931_v33 = vsel %vm1728_vm4, %v9992_v21, 0.0 }
 0xc98   : > { %3920 = vadd.xlane.f32.xlu1 %v3919_v3 }
 0xc9b   : > { %3932 = vadd.xlane.f32.xlu0 %v3931_v33 }
 0xca9   : > { %7793 = vrot.lane.b32.xlu1 %v10711_v63, %s8441_s15 }
 0xcad   : > { %7798 = vrot.lane.b32.xlu1 %v10712_v16, %s8441_s15 }
 0xcb1   : > { %4151 = vrot.lane.b32.xlu1 %v9799_v54, %s8441_s15 }
 0xcb5   : > { %4153 = vrot.lane.b32.xlu1 %v9805_v2, %s8441_s15 }
 0xcb9   : > { %4157 = vrot.lane.b32.xlu1 %v9815_v45, %s8441_s15 }
 0xcbb   : > { %v3882_v44 = vpop.xlane.xlu1 %3881 }
 0xcbc   : > { %v3892_v47 = vsub.f32 %v9952_v15, %v3882_v44 }
 0xcbd   : > { %4161 = vrot.lane.b32.xlu1 %v9825_v43, %s8441_s15 }
 0xcbe   : > { %v3906_v18 = vmul.f32 1.442695, %v3892_v47 }
 0xcbf   : > { %v7779_v52 = vpop.permute.xlu1 %7778 }
 0xcc0   : > { %8036 = vpow2.f32 %v3906_v18  ;;  %v7781_v14 = vunpack.i.h.bf16 %v7779_v52  ;;  %v7780_v56 = vunpack.i.l.bf16 %v7779_v52 }
 0xcc1   : > { %4165 = vrot.lane.b32.xlu1 %v9835_v13, %s8441_s15 }
 0xcc2   : > { %v7404_v26 = vpack.c.bf16 %v7781_v14, %v7780_v56 }
 0xcc4   : > { %7405 = vmatprep.subr.bf16.mxu0 %v7404_v26 }
 0xcc5   : > { %7407 = vmatpush3.bf16.msra.mxu0 %v7404_v26 }
 0xcca   : > { %v8037_v28 = vpop.eup %8036 }
 0xccb   : > { %v3928_v48 = vsel %vm1728_vm4, %v8037_v28, 0.0 }
 0xccc   : > { %3929 = vadd.xlane.f32.xlu0 %v3928_v48 }
 0xce2   : > { %7788 = vrot.lane.b32.xlu0 %v10713_v12, %s8441_s15 }
 0xce6   : > { %4155 = vrot.lane.b32.xlu0 %v9808_v38, %s8441_s15 }
 0xcea   : > { %4159 = vrot.lane.b32.xlu0 %v9818_v42, %s8441_s15 }
 0xcee   : > { %4163 = vrot.lane.b32.xlu0 %v9828_v58, %s8441_s15 }
 0xcef   : > { %v3915_v15 = vpop.xlane.xlu0 %3914 }
 0xcf0   : > { %8038 = vrcp.f32 %v3915_v15  ;;  %v3912_v60 = vpop.xlane.xlu1 %3911 }
 0xcf1   : > { %8040 = vrcp.f32 %v3912_v60 }
 0xcf4   : > { %v7784_v27 = vpop.permute.xlu1 %7783 }
 0xcf5   : > { %v7786_v29 = vunpack.i.h.bf16 %v7784_v27  ;;  %v7785_v59 = vunpack.i.l.bf16 %v7784_v27 }
 0xcf7   : > { %v7408_v0 = vpack.c.bf16 %v7786_v29, %v7785_v59 }
 0xcf8   : > { %v3918_v3 = vpop.xlane.xlu0 %3917 }
 0xcf9   : > { %8042 = vrcp.f32 %v3918_v3  ;;  %7410 = vmatprep.subr.msk.bf16.mxu0 %vm9002_vm3, %v7408_v0 }
 0xcfa   : > { %v8039_v33 = vpop.eup %8038 }
 0xcfb   : > { %v8041_v44 = vpop.eup %8040  ;;  %v3943_v18 = vmul.f32 %v8039_v33, %v9968_v41 }
 0xcfc   : > { %v3942_v47 = vmul.f32 %v8041_v44, %v9970_v25  ;;  %v3927_v56 = vpop.xlane.xlu0 %3926 }
 0xcfe   : > { %6948 = vmatprep.mubr.msk.f32.mxu0 %vm1728_vm4, %v3942_v47 }
 0xcff   : > { %6949 = vmatmul.mubr.msk.f32.vlgmr.msra.gmra.mrb[64].mxu0 %vm1728_vm4, %v3943_v18 }
 0xd00   : > { %7413 = vmatpush3.bf16.xpose.msk.msra.mxu0 %vm9002_vm3, %v7408_v0 }
 0xd03   : > { %v8043_v52 = vpop.eup %8042 }
 0xd04   : > { %v3944_v14 = vmul.f32 %v8043_v52, %v9976_v17 }
 0xd06   : > { %6951 = vmatprep.mubr.msk.f32.mxu0 %vm1728_vm4, %v3944_v14 }
 0xd24   : > { %v3924_v26 = vpop.xlane.xlu0 %3923 }
 0xd25   : > { %8044 = vrcp.f32 %v3924_v26  ;;  %v3921_v48 = vpop.xlane.xlu1 %3920 }
 0xd26   : > { %8046 = vrcp.f32 %v3921_v48 }
 0xd27   : > { %8048 = vrcp.f32 %v3927_v56 }
 0xd28   : > { %v3933_v29 = vpop.xlane.xlu0 %3932 }
 0xd29   : > { %8050 = vrcp.f32 %v3933_v29  ;;  %v7794_v0 = vpop.permute.xlu1 %7793 }
 0xd2a   : > { %v7796_v33 = vunpack.i.h.bf16 %v7794_v0  ;;  %v7795_v44 = vunpack.i.l.bf16 %v7794_v0 }
 0xd2d   : > { %v7799_v52 = vpop.permute.xlu1 %7798 }
 0xd2e   : > { %v7801_v26 = vunpack.i.h.bf16 %v7799_v52  ;;  %v7800_v48 = vunpack.i.l.bf16 %v7799_v52 }
 0xd2f   : > { %v8045_v25 = vpop.eup %8044 }
 0xd30   : > { %v8047_v41 = vpop.eup %8046  ;;  %v3946_v27 = vmul.f32 %v8045_v25, %v9988_v24  ;;  %v7420_v24 = vpack.c.bf16 %v7796_v33, %v7795_v44 }
 0xd31   : > { %v3945_v15 = vmul.f32 %v8047_v41, %v8031_v35  ;;  %v8049_v60 = vpop.eup %8048  ;;  %v4152_v41 = vpop.permute.xlu1 %4151 }
 0xd32   : > { %v3947_v17 = vmul.f32 %v8049_v60, %v9980_v57 }
 0xd33   : > { %6952 = vmatmul.mubr.msk.f32.gmra.mrb[66].mxu0 %vm1728_vm4, %v3945_v15  ;;  %v8051_v14 = vpop.eup %8050  ;;  %v7426_v15 = vpack.c.bf16 %v7801_v26, %v7800_v48 }
 0xd34   : > { %6954 = vmatprep.mubr.msk.f32.mxu0 %vm1728_vm4, %v3946_v27  ;;  %v3949_v25 = vmul.f32 %v8051_v14, %v9992_v21 }
 0xd35   : > { %v4154_v60 = vpop.permute.xlu1 %4153 }
 0xd37   : > { %6955 = vmatmul.mubr.msk.f32.gmra.mrb[68].mxu0 %vm1728_vm4, %v3947_v17 }
 0xd39   : > { %v4158_v21 = vpop.permute.xlu1 %4157 }
 0xd3d   : > { %v4162_v17 = vpop.permute.xlu1 %4161 }
 0xd59   : > { %v3930_v59 = vpop.xlane.xlu0 %3929 }
 0xd5a   : > { %8052 = vrcp.f32 %v3930_v59  ;;  %v4166_v59 = vpop.permute.xlu1 %4165 }
 0xd5d   : > { %v7789_v3 = vpop.permute.xlu0 %7788 }
 0xd5e   : > { %v7791_v35 = vunpack.i.h.bf16 %v7789_v3  ;;  %v7790_v47 = vunpack.i.l.bf16 %v7789_v3 }
 0xd60   : > { %v7414_v18 = vpack.c.bf16 %v7791_v35, %v7790_v47 }
 0xd62   : > { %7416 = vmatprep.subr.msk.bf16.mxu0 %vm9002_vm3, %v7414_v18 }
 0xd63   : > { %7419 = vmatpush3.bf16.xpose.msk.msra.mxu0 %vm9002_vm3, %v7414_v18 }
 0xd64   : > { %v8053_v57 = vpop.eup %8052  ;;  %7422 = vmatprep.subr.msk.bf16.mxu0 %vm9002_vm3, %v7420_v24 }
 0xd65   : > { %v3948_v56 = vmul.f32 %v8053_v57, %v8037_v28  ;;  %v4156_v28 = vpop.permute.xlu0 %4155 }
 0xd67   : > { %6957 = vmatprep.mubr.msk.f32.mxu0 %vm1728_vm4, %v3948_v56 }
 0xd68   : > { %6958 = vmatmul.mubr.msk.f32.gmra.mrb[70].mxu0 %vm1728_vm4, %v3949_v25 }
 0xd69   : > { %6976 = vmatprep.mubr.msk.f32.mxu0 %vm1574_vm2, %v4152_v41  ;;  %v4160_v27 = vpop.permute.xlu0 %4159 }
 0xd6b   : > { %7425 = vmatpush3.bf16.xpose.msk.msra.mxu0 %vm9002_vm3, %v7420_v24 }
 0xd6c   : > { %7428 = vmatprep.subr.msk.bf16.mxu0 %vm9002_vm3, %v7426_v15 }
 0xd6d   : > { %v4164_v29 = vpop.permute.xlu0 %4163 }
 0xd73   : > { %7431 = vmatpush3.bf16.xpose.msk.msra.mxu0 %vm9002_vm3, %v7426_v15 }
 0xd7a   : > { %6977 = vmatmul.mubr.msk.f32.vlgmr.msra.gmra.mrb[72].mxu0 %vm1574_vm2, %v4154_v60 }
 0xd7b   : > { %6979 = vmatprep.mubr.msk.f32.mxu0 %vm1574_vm2, %v4156_v28 }
 0xd7e   : > { %6980 = vmatmul.mubr.msk.f32.gmra.mrb[74].mxu0 %vm1574_vm2, %v4158_v21 }
 0xd7f   : > { %6982 = vmatprep.mubr.msk.f32.mxu0 %vm1574_vm2, %v4160_v27 }
 0xd82   : > { %6983 = vmatmul.mubr.msk.f32.gmra.mrb[76].mxu0 %vm1574_vm2, %v4162_v17 }
 0xd83   : > { %6985 = vmatprep.mubr.msk.f32.mxu0 %vm1574_vm2, %v4164_v29 }
 0xd86   : > { %6986 = vmatmul.mubr.msk.f32.gmra.mrb[78].mxu0 %vm1574_vm2, %v4166_v59 }
 0xdd2   : > { %v10059_v0 = vpop.f32.mrb[64].mxu0 }
 0xdd3   : > { %10718 = vst [vmem:[#allocation31_spill] sm:$0xff] %v10059_v0  ;;  %v10061_v3 = vpop.f32.mrb[65].mxu0 }
 0xdd4   : > { %10719 = vst [vmem:[#allocation29_spill] sm:$0xff] %v10061_v3 }
 0xe06   : > { %v10063_v33 = vpop.f32.mrb[66].mxu0 }
 0xe07   : > { %10720 = vst [vmem:[#allocation32_spill] sm:$0xff] %v10063_v33  ;;  %v10065_v44 = vpop.f32.mrb[67].mxu0 }
 0xe08   : > { %10721 = vst [vmem:[#allocation34_spill] sm:$0xff] %v10065_v44 }
 0xe0a   : > { %v10067_v35 = vpop.f32.mrb[68].mxu0 }
 0xe0b   : > { %10722 = vst [vmem:[#allocation36_spill] sm:$0xff] %v10067_v35  ;;  %v10069_v47 = vpop.f32.mrb[69].mxu0 }
 0xe0c   : > { %10723 = vst [vmem:[#allocation38_spill] sm:$0xff] %v10069_v47 }
 0xe3b   : > { %v10071_v18 = vpop.f32.mrb[70].mxu0 }
 0xe3c   : > { %10724 = vst [vmem:[#allocation22_spill] sm:$0xff] %v10071_v18  ;;  %v10073_v24 = vpop.f32.mrb[71].mxu0 }
 0xe3d   : > { %10725 = vst [vmem:[#allocation21_spill] sm:$0xff] %v10073_v24 }
 0xe4d   : > { %v6978_v52 = vpop.f32.mrb[72].mxu0 }
 0xe4e   : > { %v4281_v14 = vpop.f32.mrb[73].mxu0  ;;  %v4323_v57 = vsel %vm1728_vm4, %v6978_v52, -inf }
 0xe4f   : > { %4324 = vmax.xlane.f32.xlu1 %v4323_v57  ;;  %v4320_v56 = vsel %vm1728_vm4, %v4281_v14, -inf }
 0xe50   : > { %4321 = vmax.xlane.f32.xlu0 %v4320_v56 }
 0xe51   : > { %v10077_v26 = vpop.f32.mrb[74].mxu0 }
 0xe52   : > { %v4291_v48 = vpop.f32.mrb[75].mxu0  ;;  %v4329_v25 = vsel %vm1728_vm4, %v10077_v26, -inf }
 0xe53   : > { %v4326_v60 = vsel %vm1728_vm4, %v4291_v48, -inf }
 0xe54   : > { %4330 = vmax.xlane.f32.xlu0 %v4329_v25 }
 0xe55   : > { %v6984_v41 = vpop.f32.mrb[76].mxu0 }
 0xe56   : > { %v10081_v15 = vpop.f32.mrb[77].mxu0  ;;  %v4335_v27 = vsel %vm1728_vm4, %v6984_v41, -inf }
 0xe57   : > { %v4332_v29 = vsel %vm1728_vm4, %v10081_v15, -inf }
 0xe58   : > { %4327 = vmax.xlane.f32.xlu0 %v4326_v60 }
 0xe59   : > { %v6987_v28 = vpop.f32.mrb[78].mxu0 }
 0xe5a   : > { %v10084_v21 = vpop.f32.mrb[79].mxu0  ;;  %v4341_v17 = vsel %vm1728_vm4, %v6987_v28, -inf }
 0xe5b   : > { %v4338_v59 = vsel %vm1728_vm4, %v10084_v21, -inf }
 0xe5c   : > { %4336 = vmax.xlane.f32.xlu0 %v4335_v27 }
 0xe60   : > { %7803 = vrot.lane.b32.xlu1 %v10714_v7, %s8441_s15  ;;  %4342 = vmax.xlane.f32.xlu0 %v4341_v17 }
 0xe76   : > { %7808 = vrot.lane.b32.xlu0 %v10715_v20, %s8441_s15 }
 0xe84   : > { %4333 = vmax.xlane.f32.xlu1 %v4332_v29 }
 0xe95   : > { %7813 = vrot.lane.b32.xlu1 %v10716_v31, %s8441_s15 }
 0xeb9   : > { %4339 = vmax.xlane.f32.xlu1 %v4338_v59 }
 0xeca   : > { %7818 = vrot.lane.b32.xlu1 %v10717_v22, %s8441_s15 }
 0xedc   : > { %v4325_v57 = vpop.xlane.xlu1 %4324 }
 0xedd   : > { %v4345_v56 = vsub.f32 %v6978_v52, %v4325_v57  ;;  %v4322_v25 = vpop.xlane.xlu0 %4321 }
 0xede   : > { %v4344_v60 = vsub.f32 %v4281_v14, %v4322_v25 }
 0xedf   : > { %v4354_v27 = vmul.f32 1.442695, %v4345_v56 }
 0xee0   : > { %v4352_v17 = vmul.f32 1.442695, %v4344_v60  ;;  %v7804_v24 = vpop.permute.xlu1 %7803 }
 0xee1   : > { %8054 = vpow2.f32 %v4354_v27  ;;  %v7806_v18 = vunpack.i.h.bf16 %v7804_v24  ;;  %v7805_v29 = vunpack.i.l.bf16 %v7804_v24  ;;  %v4331_v47 = vpop.xlane.xlu0 %4330 }
 0xee2   : > { %8056 = vpow2.f32 %v4352_v17  ;;  %v4347_v60 = vsub.f32 %v10077_v26, %v4331_v47 }
 0xee3   : > { %v7432_v35 = vpack.c.bf16 %v7806_v18, %v7805_v29 }
 0xee4   : > { %v4358_v17 = vmul.f32 1.442695, %v4347_v60 }
 0xee5   : > { %7433 = vmatprep.subr.bf16.mxu1 %v7432_v35  ;;  %v4328_v44 = vpop.xlane.xlu0 %4327 }
 0xee6   : > { %v4346_v33 = vsub.f32 %v4291_v48, %v4328_v44  ;;  %7435 = vmatpush3.bf16.msra.mxu1 %v7432_v35 }
 0xee8   : > { %v4356_v59 = vmul.f32 1.442695, %v4346_v33 }
 0xee9   : > { %v4337_v3 = vpop.xlane.xlu0 %4336 }
 0xeea   : > { %8058 = vpow2.f32 %v4356_v59  ;;  %v4349_v0 = vsub.f32 %v6984_v41, %v4337_v3 }
 0xeeb   : > { %v10100_v52 = vpop.eup %8054 }
 0xeec   : > { %v10102_v14 = vpop.eup %8056  ;;  %v4362_v57 = vmul.f32 1.442695, %v4349_v0  ;;  %v4371_v56 = vsel %vm1728_vm4, %v10100_v52, 0.0 }
 0xeed   : > { %4372 = vadd.xlane.f32.xlu0 %v4371_v56  ;;  %v4343_v24 = vpop.xlane.xlu0 %4342  ;;  %v4368_v18 = vsel %vm1728_vm4, %v10102_v14, 0.0 }
 0xeee   : > { %8060 = vpow2.f32 %v4362_v57  ;;  %4369 = vadd.xlane.f32.xlu1 %v4368_v18  ;;  %v4351_v27 = vsub.f32 %v6987_v28, %v4343_v24 }
 0xeef   : > { %8062 = vpow2.f32 %v4358_v17 }
 0xef0   : > { %v4366_v57 = vmul.f32 1.442695, %v4351_v27 }
 0xef1   : > { %v7809_v44 = vpop.permute.xlu0 %7808 }
 0xef2   : > { %v7811_v33 = vunpack.i.h.bf16 %v7809_v44  ;;  %v7810_v35 = vunpack.i.l.bf16 %v7809_v44 }
 0xef4   : > { %v10108_v48 = vpop.eup %8058  ;;  %v7436_v3 = vpack.c.bf16 %v7811_v33, %v7810_v35 }
 0xef5   : > { %v4374_v41 = vsel %vm1728_vm4, %v10108_v48, 0.0 }
 0xef6   : > { %4375 = vadd.xlane.f32.xlu0 %v4374_v41  ;;  %7437 = vmatprep.subr.bf16.mxu1 %v7436_v3 }
 0xef7   : > { %7439 = vmatpush3.bf16.msra.mxu1 %v7436_v3 }
 0xef8   : > { %v10112_v0 = vpop.eup %8060 }
 0xef9   : > { %v4383_v25 = vsel %vm1728_vm4, %v10112_v0, 0.0  ;;  %v8063_v3 = vpop.eup %8062 }
 0xefa   : > { %4384 = vadd.xlane.f32.xlu0 %v4383_v25 }
 0xeff   : > { %7823 = vrot.lane.b32.xlu1 %v10710_v1, %s8442_s28 }
 0xf11   : > { %v4334_v29 = vpop.xlane.xlu1 %4333 }
 0xf12   : > { %v4348_v59 = vsub.f32 %v10081_v15, %v4334_v29  ;;  %v4377_v15 = vsel %vm1728_vm4, %v8063_v3, 0.0 }
 0xf14   : > { %v4360_v56 = vmul.f32 1.442695, %v4348_v59 }
 0xf15   : > { %v7814_v18 = vpop.permute.xlu1 %7813 }
 0xf16   : > { %8064 = vpow2.f32 %v4360_v56  ;;  %v7816_v44 = vunpack.i.h.bf16 %v7814_v18  ;;  %v7815_v33 = vunpack.i.l.bf16 %v7814_v18 }
 0xf17   : > { %8066 = vpow2.f32 %v4366_v57 }
 0xf18   : > { %v7440_v35 = vpack.c.bf16 %v7816_v44, %v7815_v33 }
 0xf1a   : > { %7441 = vmatprep.subr.bf16.mxu1 %v7440_v35 }
 0xf1b   : > { %7443 = vmatpush3.bf16.msra.mxu1 %v7440_v35 }
 0xf20   : > { %v10120_v1 = vpop.eup %8064 }
 0xf21   : > { %v4380_v47 = vsel %vm1728_vm4, %v10120_v1, 0.0  ;;  %v10124_v26 = vpop.eup %8066 }
 0xf22   : > { %4381 = vadd.xlane.f32.xlu0 %v4380_v47  ;;  %v4389_v28 = vsel %vm1728_vm4, %v10124_v26, 0.0 }
 0xf23   : > { %4378 = vadd.xlane.f32.xlu1 %v4377_v15 }
 0xf26   : > { %4390 = vadd.xlane.f32.xlu0 %v4389_v28 }
 0xf34   : > { %7833 = vrot.lane.b32.xlu1 %v10711_v63, %s8442_s28 }
 0xf38   : > { %7838 = vrot.lane.b32.xlu1 %v10712_v16, %s8442_s28 }
 0xf3c   : > { %4601 = vrot.lane.b32.xlu1 %v9799_v54, %s8442_s28 }
 0xf40   : > { %4603 = vrot.lane.b32.xlu1 %v9805_v2, %s8442_s28 }
 0xf44   : > { %4607 = vrot.lane.b32.xlu1 %v9815_v45, %s8442_s28 }
 0xf46   : > { %v4340_v24 = vpop.xlane.xlu1 %4339 }
 0xf47   : > { %v4350_v41 = vsub.f32 %v10084_v21, %v4340_v24 }
 0xf48   : > { %4611 = vrot.lane.b32.xlu1 %v9825_v43, %s8442_s28 }
 0xf49   : > { %v4364_v25 = vmul.f32 1.442695, %v4350_v41 }
 0xf4a   : > { %v7819_v63 = vpop.permute.xlu1 %7818 }
 0xf4b   : > { %8068 = vpow2.f32 %v4364_v25  ;;  %v7821_v60 = vunpack.i.h.bf16 %v7819_v63  ;;  %v7820_v16 = vunpack.i.l.bf16 %v7819_v63 }
 0xf4c   : > { %4615 = vrot.lane.b32.xlu1 %v9835_v13, %s8442_s28 }
 0xf4d   : > { %v7444_v54 = vpack.c.bf16 %v7821_v60, %v7820_v16 }
 0xf4f   : > { %7445 = vmatprep.subr.bf16.mxu1 %v7444_v54 }
 0xf50   : > { %7447 = vmatpush3.bf16.msra.mxu1 %v7444_v54 }
 0xf55   : > { %v8069_v2 = vpop.eup %8068 }
 0xf56   : > { %v4386_v45 = vsel %vm1728_vm4, %v8069_v2, 0.0 }
 0xf57   : > { %4387 = vadd.xlane.f32.xlu0 %v4386_v45 }
 0xf6d   : > { %7828 = vrot.lane.b32.xlu0 %v10713_v12, %s8442_s28 }
 0xf71   : > { %4605 = vrot.lane.b32.xlu0 %v9808_v38, %s8442_s28 }
 0xf75   : > { %4609 = vrot.lane.b32.xlu0 %v9818_v42, %s8442_s28 }
 0xf79   : > { %4613 = vrot.lane.b32.xlu0 %v9828_v58, %s8442_s28 }
 0xf7a   : > { %v4373_v43 = vpop.xlane.xlu0 %4372 }
 0xf7b   : > { %8070 = vrcp.f32 %v4373_v43  ;;  %v4370_v13 = vpop.xlane.xlu1 %4369 }
 0xf7c   : > { %8072 = vrcp.f32 %v4370_v13 }
 0xf7f   : > { %v7824_v21 = vpop.permute.xlu1 %7823 }
 0xf80   : > { %v7826_v27 = vunpack.i.h.bf16 %v7824_v21  ;;  %v7825_v17 = vunpack.i.l.bf16 %v7824_v21 }
 0xf82   : > { %v7448_v29 = vpack.c.bf16 %v7826_v27, %v7825_v17 }
 0xf83   : > { %v4376_v59 = vpop.xlane.xlu0 %4375 }
 0xf84   : > { %8074 = vrcp.f32 %v4376_v59  ;;  %7450 = vmatprep.subr.msk.bf16.mxu1 %vm9002_vm3, %v7448_v29 }
 0xf85   : > { %v8071_v38 = vpop.eup %8070 }
 0xf86   : > { %v8073_v12 = vpop.eup %8072  ;;  %v4401_v57 = vmul.f32 %v8071_v38, %v10100_v52 }
 0xf87   : > { %v4400_v42 = vmul.f32 %v8073_v12, %v10102_v14  ;;  %v4385_v18 = vpop.xlane.xlu0 %4384 }
 0xf89   : > { %7004 = vmatprep.mubr.msk.f32.mxu1 %vm1728_vm4, %v4400_v42 }
 0xf8a   : > { %7005 = vmatmul.mubr.msk.f32.vlgmr.msra.gmra.mrb[72].mxu1 %vm1728_vm4, %v4401_v57 }
 0xf8b   : > { %7453 = vmatpush3.bf16.xpose.msk.msra.mxu1 %vm9002_vm3, %v7448_v29 }
 0xf8e   : > { %v8075_v58 = vpop.eup %8074 }
 0xf8f   : > { %v4402_v56 = vmul.f32 %v8075_v58, %v10108_v48 }
 0xf91   : > { %7007 = vmatprep.mubr.msk.f32.mxu1 %vm1728_vm4, %v4402_v56 }
 0xfaf   : > { %v4382_v44 = vpop.xlane.xlu0 %4381 }
 0xfb0   : > { %8076 = vrcp.f32 %v4382_v44  ;;  %v4379_v33 = vpop.xlane.xlu1 %4378 }
 0xfb1   : > { %8078 = vrcp.f32 %v4379_v33 }
 0xfb2   : > { %8080 = vrcp.f32 %v4385_v18 }
 0xfb3   : > { %v4391_v28 = vpop.xlane.xlu0 %4390 }
 0xfb4   : > { %8082 = vrcp.f32 %v4391_v28  ;;  %v7834_v41 = vpop.permute.xlu1 %7833 }
 0xfb5   : > { %v7836_v63 = vunpack.i.h.bf16 %v7834_v41  ;;  %v7835_v60 = vunpack.i.l.bf16 %v7834_v41 }
 0xfb8   : > { %v7839_v45 = vpop.permute.xlu1 %7838 }
 0xfb9   : > { %v7841_v21 = vunpack.i.h.bf16 %v7839_v45  ;;  %v7840_v27 = vunpack.i.l.bf16 %v7839_v45 }
 0xfba   : > { %v8077_v14 = vpop.eup %8076 }
 0xfbb   : > { %v8079_v52 = vpop.eup %8078  ;;  %v4404_v15 = vmul.f32 %v8077_v14, %v10120_v1  ;;  %v7460_v1 = vpack.c.bf16 %v7836_v63, %v7835_v60  ;;  %v7466_v59 = vpack.c.bf16 %v7841_v21, %v7840_v27 }
 0xfbc   : > { %v4403_v35 = vmul.f32 %v8079_v52, %v8063_v3  ;;  %v8081_v47 = vpop.eup %8080  ;;  %v4602_v29 = vpop.permute.xlu1 %4601 }
 0xfbd   : > { %v4405_v48 = vmul.f32 %v8081_v47, %v10112_v0 }
 0xfbe   : > { %7008 = vmatmul.mubr.msk.f32.gmra.mrb[74].mxu1 %vm1728_vm4, %v4403_v35  ;;  %v8083_v43 = vpop.eup %8082 }
 0xfbf   : > { %7010 = vmatprep.mubr.msk.f32.mxu1 %vm1728_vm4, %v4404_v15  ;;  %v4407_v17 = vmul.f32 %v8083_v43, %v10124_v26 }
 0xfc0   : > { %v4604_v38 = vpop.permute.xlu1 %4603 }
 0xfc2   : > { %7011 = vmatmul.mubr.msk.f32.gmra.mrb[76].mxu1 %vm1728_vm4, %v4405_v48 }
 0xfc4   : > { %v4608_v26 = vpop.permute.xlu1 %4607 }
 0xfc8   : > { %v4612_v42 = vpop.permute.xlu1 %4611 }
 0xfcc   : > { %v4616_v58 = vpop.permute.xlu1 %4615 }
 0xfe4   : > { %v4388_v24 = vpop.xlane.xlu0 %4387 }
 0xfe5   : > { %8084 = vrcp.f32 %v4388_v24 }
 0xfe8   : > { %v7829_v25 = vpop.permute.xlu0 %7828 }
 0xfe9   : > { %v7831_v3 = vunpack.i.h.bf16 %v7829_v25  ;;  %v7830_v16 = vunpack.i.l.bf16 %v7829_v25 }
 0xfeb   : > { %v7454_v54 = vpack.c.bf16 %v7831_v3, %v7830_v16 }
 0xfed   : > { %7456 = vmatprep.subr.msk.bf16.mxu1 %vm9002_vm3, %v7454_v54 }
 0xfee   : > { %7459 = vmatpush3.bf16.xpose.msk.msra.mxu1 %vm9002_vm3, %v7454_v54 }
 0xfef   : > { %v8085_v0 = vpop.eup %8084  ;;  %7462 = vmatprep.subr.msk.bf16.mxu1 %vm9002_vm3, %v7460_v1 }
 0xff0   : > { %v4406_v13 = vmul.f32 %v8085_v0, %v8069_v2  ;;  %v4606_v2 = vpop.permute.xlu0 %4605 }
 0xff2   : > { %7013 = vmatprep.mubr.msk.f32.mxu1 %vm1728_vm4, %v4406_v13 }
 0xff3   : > { %7014 = vmatmul.mubr.msk.f32.gmra.mrb[78].mxu1 %vm1728_vm4, %v4407_v17 }
 0xff4   : > { %7032 = vmatprep.mubr.msk.f32.mxu1 %vm1574_vm2, %v4602_v29  ;;  %v4610_v12 = vpop.permute.xlu0 %4609 }
 0xff6   : > { %7465 = vmatpush3.bf16.xpose.msk.msra.mxu1 %vm9002_vm3, %v7460_v1 }
 0xff7   : > { %7468 = vmatprep.subr.msk.bf16.mxu1 %vm9002_vm3, %v7466_v59 }
 0xff8   : > { %v4614_v57 = vpop.permute.xlu0 %4613 }
 0xffe   : > { %7471 = vmatpush3.bf16.xpose.msk.msra.mxu1 %vm9002_vm3, %v7466_v59 }
0x1005   : > { %7033 = vmatmul.mubr.msk.f32.vlgmr.msra.gmra.mrb[80].mxu1 %vm1574_vm2, %v4604_v38 }
0x1006   : > { %7035 = vmatprep.mubr.msk.f32.mxu1 %vm1574_vm2, %v4606_v2 }
0x1009   : > { %7036 = vmatmul.mubr.msk.f32.gmra.mrb[82].mxu1 %vm1574_vm2, %v4608_v26 }
0x100a   : > { %7038 = vmatprep.mubr.msk.f32.mxu1 %vm1574_vm2, %v4610_v12 }
0x100d   : > { %7039 = vmatmul.mubr.msk.f32.gmra.mrb[84].mxu1 %vm1574_vm2, %v4612_v42 }
0x100e   : > { %7041 = vmatprep.mubr.msk.f32.mxu1 %vm1574_vm2, %v4614_v57 }
0x1011   : > { %7042 = vmatmul.mubr.msk.f32.gmra.mrb[86].mxu1 %vm1574_vm2, %v4616_v58 }
0x105d   : > { %v10191_v6 = vpop.f32.mrb[72].mxu1 }
0x105e   : > { %v10193_v56 = vpop.f32.mrb[73].mxu1 }
0x1091   : > { %v10195_v18 = vpop.f32.mrb[74].mxu1 }
0x1092   : > { %v10197_v44 = vpop.f32.mrb[75].mxu1 }
0x1095   : > { %v10199_v33 = vpop.f32.mrb[76].mxu1 }
0x1096   : > { %v10201_v14 = vpop.f32.mrb[77].mxu1 }
0x10c6   : > { %v10203_v52 = vpop.f32.mrb[78].mxu1 }
0x10c7   : > { %v10205_v35 = vpop.f32.mrb[79].mxu1 }
0x10d8   : > { %v7034_v47 = vpop.f32.mrb[80].mxu1 }
0x10d9   : > { %v4731_v15 = vpop.f32.mrb[81].mxu1  ;;  %v4773_v48 = vsel %vm1728_vm4, %v7034_v47, -inf }
0x10da   : > { %4774 = vmax.xlane.f32.xlu1 %v4773_v48  ;;  %v4770_v28 = vsel %vm1728_vm4, %v4731_v15, -inf }
0x10db   : > { %4771 = vmax.xlane.f32.xlu0 %v4770_v28 }
0x10dc   : > { %v7037_v24 = vpop.f32.mrb[82].mxu1 }
0x10dd   : > { %v4741_v41 = vpop.f32.mrb[83].mxu1  ;;  %v4779_v3 = vsel %vm1728_vm4, %v7037_v24, -inf }
0x10de   : > { %v4776_v25 = vsel %vm1728_vm4, %v4741_v41, -inf }
0x10df   : > { %4777 = vmax.xlane.f32.xlu0 %v4776_v25 }
0x10e0   : > { %v7040_v63 = vpop.f32.mrb[84].mxu1 }
0x10e1   : > { %v4751_v60 = vpop.f32.mrb[85].mxu1  ;;  %v4785_v45 = vsel %vm1728_vm4, %v7040_v63, -inf }
0x10e2   : > { %v4782_v16 = vsel %vm1728_vm4, %v4751_v60, -inf }
0x10e3   : > { %4780 = vmax.xlane.f32.xlu0 %v4779_v3  ;;  %4783 = vmax.xlane.f32.xlu1 %v4782_v16 }
0x10e4   : > { %v7043_v54 = vpop.f32.mrb[86].mxu1 }
0x10e5   : > { %v4761_v1 = vpop.f32.mrb[87].mxu1  ;;  %v4791_v0 = vsel %vm1728_vm4, %v7043_v54, -inf }
0x10e6   : > { %v4788_v43 = vsel %vm1728_vm4, %v4761_v1, -inf }
0x10e7   : > { %4786 = vmax.xlane.f32.xlu0 %v4785_v45  ;;  %4789 = vmax.xlane.f32.xlu1 %v4788_v43 }
0x10eb   : > { %4792 = vmax.xlane.f32.xlu0 %v4791_v0 }
0x10f8   : > { %7843 = vrot.lane.b32.xlu1 %v10714_v7, %s8442_s28 }
0x1167   : > { %v4775_v13 = vpop.xlane.xlu1 %4774 }
0x1168   : > { %v4795_v21 = vsub.f32 %v7034_v47, %v4775_v13  ;;  %v4772_v27 = vpop.xlane.xlu0 %4771 }
0x1169   : > { %v4794_v17 = vsub.f32 %v4731_v15, %v4772_v27 }
0x116a   : > { %v4804_v29 = vmul.f32 1.442695, %v4795_v21 }
0x116b   : > { %v4802_v59 = vmul.f32 1.442695, %v4794_v17 }
0x116c   : > { %8086 = vpow2.f32 %v4804_v29  ;;  %v4778_v38 = vpop.xlane.xlu0 %4777 }
0x116d   : > { %8088 = vpow2.f32 %v4802_v59  ;;  %v4796_v2 = vsub.f32 %v4741_v41, %v4778_v38 }
0x116f   : > { %v4806_v26 = vmul.f32 1.442695, %v4796_v2 }
0x1170   : > { %v4781_v12 = vpop.xlane.xlu0 %4780  ;;  %v4784_v42 = vpop.xlane.xlu1 %4783 }
0x1171   : > { %8090 = vpow2.f32 %v4806_v26  ;;  %v4797_v57 = vsub.f32 %v7037_v24, %v4781_v12  ;;  %v4798_v58 = vsub.f32 %v4751_v60, %v4784_v42 }
0x1173   : > { %v4808_v48 = vmul.f32 1.442695, %v4797_v57  ;;  %v4810_v28 = vmul.f32 1.442695, %v4798_v58 }
0x1174   : > { %v4787_v25 = vpop.xlane.xlu0 %4786  ;;  %v4790_v7 = vpop.xlane.xlu1 %4789 }
0x1175   : > { %8092 = vpow2.f32 %v4808_v48  ;;  %v4799_v47 = vsub.f32 %v7040_v63, %v4787_v25  ;;  %v4800_v45 = vsub.f32 %v4761_v1, %v4790_v7  ;;  %v5067_v25 = vld [vmem:[%s8862_s13] sm:$0xff]  ;;  %v5068_v7 = vld [vmem:[%s8862_s13 + $0x8] sm:$0xff] }
0x1176   : > { %v10217_v3 = vpop.eup %8086  ;;  %8094 = vpow2.f32 %v4810_v28 }
0x1177   : > { %v10219_v15 = vpop.eup %8088  ;;  %v4812_v16 = vmul.f32 1.442695, %v4799_v47  ;;  %v4821_v41 = vsel %vm1728_vm4, %v10217_v3, 0.0  ;;  %v4814_v27 = vmul.f32 1.442695, %v4800_v45 }
0x1178   : > { %4822 = vadd.xlane.f32.xlu0 %v4821_v41  ;;  %v4793_v43 = vpop.xlane.xlu0 %4792  ;;  %v7844_v24 = vpop.permute.xlu1 %7843  ;;  %v4818_v60 = vsel %vm1728_vm4, %v10219_v15, 0.0 }
0x1179   : > { %8096 = vpow2.f32 %v4812_v16  ;;  %v4801_v0 = vsub.f32 %v7043_v54, %v4793_v43  ;;  %v7846_v13 = vunpack.i.h.bf16 %v7844_v24  ;;  %v7845_v63 = vunpack.i.l.bf16 %v7844_v24  ;;  %4819 = vadd.xlane.f32.xlu1 %v4818_v60  ;;  %v5069_v43 = vld [vmem:[%s8862_s13 + $0x10] sm:$0xff]  ;;  %v5070_v24 = vld [vmem:[%s8862_s13 + $0x18] sm:$0xff] }
0x117a   : > { %v7488_v16 = vpack.c.bf16 %v5068_v7, %v5067_v25  ;;  %v5287_v25 = vld [vmem:[%s8864_s30] sm:$0xff]  ;;  %v5288_v7 = vld [vmem:[%s8864_s30 + $0x8] sm:$0xff] }
0x117b   : > { %v10225_v21 = vpop.eup %8090  ;;  %v4816_v17 = vmul.f32 1.442695, %v4801_v0  ;;  %v7472_v29 = vpack.c.bf16 %v7846_v13, %v7845_v63  ;;  %v7492_v63 = vpack.c.bf16 %v5070_v24, %v5069_v43 }
0x117c   : > { %v4824_v1 = vsel %vm1728_vm4, %v10225_v21, 0.0 }
0x117d   : > { %8098 = vpow2.f32 %v4816_v17  ;;  %4825 = vadd.xlane.f32.xlu1 %v4824_v1  ;;  %7473 = vmatprep.subr.bf16.mxu0 %v7472_v29 }
0x117e   : > { %7475 = vmatpush3.bf16.msra.mxu0 %v7472_v29  ;;  %8100 = vpow2.f32 %v4814_v27 }
0x117f   : > { %v10229_v59 = vpop.eup %8092 }
0x1180   : > { %v10231_v38 = vpop.eup %8094  ;;  %v4827_v54 = vsel %vm1728_vm4, %v10229_v59, 0.0 }
0x1181   : > { %4828 = vadd.xlane.f32.xlu0 %v4827_v54  ;;  %v4830_v2 = vsel %vm1728_vm4, %v10231_v38, 0.0 }
0x1182   : > { %4831 = vadd.xlane.f32.xlu1 %v4830_v2 }
0x1183   : > { %v10237_v26 = vpop.eup %8096 }
0x1184   : > { %v4833_v12 = vsel %vm1728_vm4, %v10237_v26, 0.0 }
0x1185   : > { %4834 = vadd.xlane.f32.xlu0 %v4833_v12 }
0x1187   : > { %v10241_v42 = vpop.eup %8098 }
0x1188   : > { %v4839_v57 = vsel %vm1728_vm4, %v10241_v42, 0.0  ;;  %v10245_v58 = vpop.eup %8100 }
0x1189   : > { %4840 = vadd.xlane.f32.xlu0 %v4839_v57  ;;  %v4836_v48 = vsel %vm1728_vm4, %v10245_v58, 0.0 }
0x118d   : > { %4837 = vadd.xlane.f32.xlu0 %v4836_v48 }
0x1193   : > { %7853 = vrot.lane.b32.xlu1 %v10716_v31, %s8442_s28 }
0x1197   : > { %7858 = vrot.lane.b32.xlu1 %v10717_v22, %s8442_s28 }
0x119b   : > { %2380 = vrot.lane.b32.xlu1 %v9680_v30, %s8443_s7  ;;  %v10727_v30 = vld [vmem:[#allocation30_spill] sm:$0xff] }
0x119f   : > { %2382 = vrot.lane.b32.xlu1 %v9678_v49, %s8443_s7  ;;  %v10726_v49 = vld [vmem:[#allocation31_spill] sm:$0xff] }
0x11a3   : > { %2833 = vrot.lane.b32.xlu1 %v9694_v5, %s8444_s19  ;;  %7848 = vrot.lane.b32.xlu0 %v10715_v20, %s8442_s28  ;;  %v10734_v5 = vld [vmem:[#allocation21_spill] sm:$0xff] }
0x11a7   : > { %3284 = vrot.lane.b32.xlu1 %v9839_v51, %s8445_s21  ;;  %2831 = vrot.lane.b32.xlu0 %v9696_v11, %s8444_s19 }
0x11ab   : > { %2386 = vrot.lane.b32.xlu1 %v9682_v4, %s8443_s7  ;;  %3282 = vrot.lane.b32.xlu0 %v9841_v55, %s8445_s21  ;;  %v10728_v4 = vld [vmem:[#allocation29_spill] sm:$0xff] }
0x11af   : > { %2837 = vrot.lane.b32.xlu1 %v9698_v50, %s8444_s19  ;;  %2384 = vrot.lane.b32.xlu0 %v9684_v36, %s8443_s7  ;;  %v10729_v36 = vld [vmem:[#allocation32_spill] sm:$0xff] }
0x11b3   : > { %3288 = vrot.lane.b32.xlu1 %v9843_v37, %s8445_s21  ;;  %2835 = vrot.lane.b32.xlu0 %v9700_v61, %s8444_s19 }
0x11b7   : > { %2390 = vrot.lane.b32.xlu1 %v9686_v34, %s8443_s7  ;;  %3286 = vrot.lane.b32.xlu0 %v9845_v62, %s8445_s21  ;;  %v10730_v34 = vld [vmem:[#allocation34_spill] sm:$0xff] }
0x11bb   : > { %2841 = vrot.lane.b32.xlu1 %v9702_v46, %s8444_s19  ;;  %2388 = vrot.lane.b32.xlu0 %v9688_v9, %s8443_s7  ;;  %v10731_v9 = vld [vmem:[#allocation36_spill] sm:$0xff] }
0x11bf   : > { %3292 = vrot.lane.b32.xlu1 %v9847_v32, %s8445_s21  ;;  %2839 = vrot.lane.b32.xlu0 %v9704_v39, %s8444_s19 }
0x11c3   : > { %2394 = vrot.lane.b32.xlu1 %v9690_v53, %s8443_s7  ;;  %3290 = vrot.lane.b32.xlu0 %v9849_v23, %s8445_s21  ;;  %v10732_v53 = vld [vmem:[#allocation38_spill] sm:$0xff] }
0x11c7   : > { %2845 = vrot.lane.b32.xlu1 %v9706_v40, %s8444_s19  ;;  %2392 = vrot.lane.b32.xlu0 %v9692_v19, %s8443_s7  ;;  %v10733_v19 = vld [vmem:[#allocation22_spill] sm:$0xff] }
0x11cb   : > { %3296 = vrot.lane.b32.xlu1 %v9851_v8, %s8445_s21  ;;  %2843 = vrot.lane.b32.xlu0 %v9708_v10, %s8444_s19 }
0x11cf   : > { %4121 = vrot.lane.b32.xlu1 %v10726_v49, %s8443_s7  ;;  %3294 = vrot.lane.b32.xlu0 %v10727_v30, %s8445_s21 }
0x11d3   : > { %4571 = vrot.lane.b32.xlu1 %v10191_v6, %s8444_s19  ;;  %4119 = vrot.lane.b32.xlu0 %v10728_v4, %s8443_s7 }
0x11d7   : > { %4125 = vrot.lane.b32.xlu1 %v10729_v36, %s8443_s7  ;;  %4569 = vrot.lane.b32.xlu0 %v10193_v56, %s8444_s19 }
0x11db   : > { %4575 = vrot.lane.b32.xlu1 %v10195_v18, %s8444_s19  ;;  %4123 = vrot.lane.b32.xlu0 %v10730_v34, %s8443_s7 }
0x11df   : > { %4129 = vrot.lane.b32.xlu1 %v10731_v9, %s8443_s7  ;;  %4573 = vrot.lane.b32.xlu0 %v10197_v44, %s8444_s19 }
0x11e3   : > { %4579 = vrot.lane.b32.xlu1 %v10199_v33, %s8444_s19  ;;  %4127 = vrot.lane.b32.xlu0 %v10732_v53, %s8443_s7 }
0x11e7   : > { %4133 = vrot.lane.b32.xlu1 %v10733_v19, %s8443_s7  ;;  %4577 = vrot.lane.b32.xlu0 %v10201_v14, %s8444_s19 }
0x11eb   : > { %4583 = vrot.lane.b32.xlu1 %v10203_v52, %s8444_s19  ;;  %4131 = vrot.lane.b32.xlu0 %v10734_v5, %s8443_s7 }
0x11ef   : > { %4581 = vrot.lane.b32.xlu0 %v10205_v35, %s8444_s19 }
0x1205   : > { %v4823_v50 = vpop.xlane.xlu0 %4822 }
0x1206   : > { %v4820_v11 = vpop.xlane.xlu1 %4819 }
0x1207   : > { %8102 = vrcp.f32 %v4820_v11 }
0x1208   : > { %8104 = vrcp.f32 %v4823_v50 }
0x120a   : > { %v4826_v61 = vpop.xlane.xlu1 %4825 }
0x120b   : > { %8106 = vrcp.f32 %v4826_v61 }
0x120e   : > { %v4829_v46 = vpop.xlane.xlu0 %4828 }
0x120f   : > { %v4832_v39 = vpop.xlane.xlu1 %4831  ;;  %8108 = vrcp.f32 %v4829_v46 }
0x1210   : > { %8110 = vrcp.f32 %v4832_v39 }
0x1211   : > { %v8103_v40 = vpop.eup %8102 }
0x1212   : > { %v4835_v10 = vpop.xlane.xlu0 %4834  ;;  %v4850_v51 = vmul.f32 %v8103_v40, %v10219_v15  ;;  %v8105_v45 = vpop.eup %8104 }
0x1213   : > { %v7854_v55 = vpop.permute.xlu1 %7853  ;;  %8112 = vrcp.f32 %v4835_v10  ;;  %v4851_v13 = vmul.f32 %v8105_v45, %v10217_v3 }
0x1214   : > { %7060 = vmatprep.mubr.msk.f32.mxu0 %vm1728_vm4, %v4850_v51  ;;  %v7856_v20 = vunpack.i.h.bf16 %v7854_v55  ;;  %v7855_v31 = vunpack.i.l.bf16 %v7854_v55 }
0x1215   : > { %v8107_v60 = vpop.eup %8106 }
0x1216   : > { %v4841_v37 = vpop.xlane.xlu0 %4840  ;;  %v7480_v33 = vpack.c.bf16 %v7856_v20, %v7855_v31  ;;  %v4852_v29 = vmul.f32 %v8107_v60, %v10225_v21 }
0x1217   : > { %v7859_v62 = vpop.permute.xlu1 %7858 }
0x1218   : > { %v7861_v14 = vunpack.i.h.bf16 %v7859_v62  ;;  %v7860_v52 = vunpack.i.l.bf16 %v7859_v62 }
0x1219   : > { %v8109_v27 = vpop.eup %8108 }
0x121a   : > { %v4838_v32 = vpop.xlane.xlu0 %4837  ;;  %v7484_v47 = vpack.c.bf16 %v7861_v14, %v7860_v52  ;;  %v8111_v1 = vpop.eup %8110  ;;  %v4853_v2 = vmul.f32 %v8109_v27, %v10229_v59 }
0x121b   : > { %v2381_v23 = vpop.permute.xlu1 %2380  ;;  %8114 = vrcp.f32 %v4838_v32  ;;  %v4854_v57 = vmul.f32 %v8111_v1, %v10231_v38 }
0x121c   : > { %2405 = vst.msk [vmem:[#allocation3] sm:$0xff] %vm2404_vm5, %v2381_v23  ;;  %8116 = vrcp.f32 %v4841_v37 }
0x121d   : > { %v8113_v3 = vpop.eup %8112 }
0x121e   : > { %v7849_v8 = vpop.permute.xlu0 %7848  ;;  %v4855_v49 = vmul.f32 %v8113_v3, %v10237_v26  ;;  %v8119_v3 = vld [vmem:[#allocation2] sm:$0xff] }
0x121f   : > { %v7851_v22 = vunpack.i.h.bf16 %v7849_v8  ;;  %v7850_v6 = vunpack.i.l.bf16 %v7849_v8  ;;  %v2383_v56 = vpop.permute.xlu1 %2382 }
0x1220   : > { %2406 = vst.msk [vmem:[#allocation3 + $0x8] sm:$0xff] %vm2404_vm5, %v2383_v56 }
0x1221   : > { %v7476_v18 = vpack.c.bf16 %v7851_v22, %v7850_v6 }
0x1222   : > { %v2832_v44 = vpop.permute.xlu0 %2831 }
0x1223   : > { %2856 = vst.msk [vmem:[#allocation3] sm:$0xff] %vm2855_vm6, %v2832_v44  ;;  %v2834_v35 = vpop.permute.xlu1 %2833  ;;  %7477 = vmatprep.subr.bf16.mxu0 %v7476_v18 }
0x1224   : > { %2857 = vst.msk [vmem:[#allocation3 + $0x8] sm:$0xff] %vm2855_vm6, %v2834_v35  ;;  %7479 = vmatpush3.bf16.msra.mxu0 %v7476_v18 }
0x1225   : > { %7481 = vmatprep.subr.bf16.mxu0 %v7480_v33  ;;  %v8115_v48 = vpop.eup %8114 }
0x1226   : > { %v3283_v28 = vpop.permute.xlu0 %3282  ;;  %v8117_v30 = vpop.eup %8116  ;;  %v4856_v4 = vmul.f32 %v8115_v48, %v10245_v58  ;;  %v8120_v48 = vld [vmem:[#allocation2 + $0x8] sm:$0xff] }
0x1227   : > { %3307 = vst.msk [vmem:[#allocation3] sm:$0xff] %vm3306_vm7, %v3283_v28  ;;  %v3285_v15 = vpop.permute.xlu1 %3284  ;;  %v4857_v36 = vmul.f32 %v8117_v30, %v10241_v42 }
0x1228   : > { %3308 = vst.msk [vmem:[#allocation3 + $0x8] sm:$0xff] %vm3306_vm7, %v3285_v15  ;;  %7483 = vmatpush3.bf16.msra.mxu0 %v7480_v33  ;;  %v5289_v15 = vld [vmem:[%s8864_s30 + $0x10] sm:$0xff] }
0x1229   : > { %7485 = vmatprep.subr.bf16.mxu0 %v7484_v47 }
0x122a   : > { %v2385_v41 = vpop.permute.xlu0 %2384 }
0x122b   : > { %2407 = vst.msk [vmem:[#allocation3 + $0x10] sm:$0xff] %vm2404_vm5, %v2385_v41  ;;  %v2387_v0 = vpop.permute.xlu1 %2386 }
0x122c   : > { %2408 = vst.msk [vmem:[#allocation3 + $0x18] sm:$0xff] %vm2404_vm5, %v2387_v0  ;;  %7487 = vmatpush3.bf16.msra.mxu0 %v7484_v47  ;;  %v7496_v47 = vpack.c.bf16 %v5288_v7, %v5287_v25 }
0x122d   : > { %7489 = vmatprep.subr.bf16.mxu0 %v7488_v16 }
0x122e   : > { %v2836_v17 = vpop.permute.xlu0 %2835  ;;  %v5051_v26 = vld [vmem:[#allocation3] sm:$0xff]  ;;  %7497 = vmatprep.subr.bf16.mxu1 %v7496_v47 }
0x122f   : > { %2858 = vst.msk [vmem:[#allocation3 + $0x10] sm:$0xff] %vm2855_vm6, %v2836_v17  ;;  %v2838_v54 = vpop.permute.xlu1 %2837  ;;  %7061 = vmatmul.mubr.msk.f32.vlgmr.msra.gmra.mrb[80].mxu0 %vm1728_vm4, %v4851_v13  ;;  %v5052_v53 = vld [vmem:[#allocation3 + $0x8] sm:$0xff]  ;;  %7499 = vmatpush3.bf16.msra.mxu1 %v7496_v47  ;;  %v10420_v17 = vld [vmem:[%s677_s18] ss:$0 sm:$0xff] }
0x1230   : > { %2859 = vst.msk [vmem:[#allocation3 + $0x18] sm:$0xff] %vm2855_vm6, %v2838_v54  ;;  %7063 = vmatprep.mubr.msk.f32.mxu0 %vm1728_vm4, %v4852_v29  ;;  %7491 = vmatpush3.bf16.msra.mxu0 %v7488_v16  ;;  %v5290_v16 = vld [vmem:[%s8864_s30 + $0x18] sm:$0xff] }
0x1231   : > { %7493 = vmatprep.subr.bf16.mxu0 %v7492_v63  ;;  %v7500_v45 = vpack.c.bf16 %v5290_v16, %v5289_v15 }
0x1232   : > { %v3287_v12 = vpop.permute.xlu0 %3286 }
0x1233   : > { %3309 = vst.msk [vmem:[#allocation3 + $0x10] sm:$0xff] %vm3306_vm7, %v3287_v12  ;;  %v3289_v21 = vpop.permute.xlu1 %3288  ;;  %7064 = vmatmul.mubr.msk.f32.gmra.mrb[82].mxu0 %vm1728_vm4, %v4853_v2  ;;  %7501 = vmatprep.subr.bf16.mxu1 %v7500_v45 }
0x1234   : > { %3310 = vst.msk [vmem:[#allocation3 + $0x18] sm:$0xff] %vm3306_vm7, %v3289_v21  ;;  %7066 = vmatprep.mubr.msk.f32.mxu0 %vm1728_vm4, %v4854_v57  ;;  %7495 = vmatpush3.bf16.msra.mxu0 %v7492_v63 }
0x1235   : > { %7503 = vmatpush3.bf16.msra.mxu1 %v7500_v45 }
0x1236   : > { %v2389_v59 = vpop.permute.xlu0 %2388 }
0x1237   : > { %2409 = vst.msk [vmem:[#allocation3 + $0x20] sm:$0xff] %vm2404_vm5, %v2389_v59  ;;  %v2391_v38 = vpop.permute.xlu1 %2390  ;;  %7067 = vmatmul.mubr.msk.f32.gmra.mrb[84].mxu0 %vm1728_vm4, %v4855_v49 }
0x1238   : > { %2410 = vst.msk [vmem:[#allocation3 + $0x28] sm:$0xff] %vm2404_vm5, %v2391_v38  ;;  %7069 = vmatprep.mubr.msk.f32.mxu0 %vm1728_vm4, %v4856_v4  ;;  %v8121_v4 = vld [vmem:[#allocation2 + $0x10] sm:$0xff] }
0x123a   : > { %v2840_v34 = vpop.permute.xlu0 %2839  ;;  %v5053_v5 = vld [vmem:[#allocation3 + $0x10] sm:$0xff] }
0x123b   : > { %2860 = vst.msk [vmem:[#allocation3 + $0x20] sm:$0xff] %vm2855_vm6, %v2840_v34  ;;  %v2842_v9 = vpop.permute.xlu1 %2841  ;;  %7070 = vmatmul.mubr.msk.f32.gmra.mrb[86].mxu0 %vm1728_vm4, %v4857_v36  ;;  %v5054_v11 = vld [vmem:[#allocation3 + $0x18] sm:$0xff] }
0x123c   : > { %2861 = vst.msk [vmem:[#allocation3 + $0x28] sm:$0xff] %vm2855_vm6, %v2842_v9  ;;  %7080 = vmatprep.mubr.msk.f32.mxu0 %vm1068_vm1, %v5051_v26  ;;  %v8122_v36 = vld [vmem:[#allocation2 + $0x18] sm:$0xff] }
0x123e   : > { %v3291_v58 = vpop.permute.xlu0 %3290 }
0x123f   : > { %3311 = vst.msk [vmem:[#allocation3 + $0x20] sm:$0xff] %vm3306_vm7, %v3291_v58  ;;  %v3293_v19 = vpop.permute.xlu1 %3292  ;;  %7081 = vmatmul.mubr.msk.f32.vlgmr.msra.gmra.mrb[88].mxu0 %vm1068_vm1, %v5052_v53 }
0x1240   : > { %3312 = vst.msk [vmem:[#allocation3 + $0x28] sm:$0xff] %vm3306_vm7, %v3293_v19  ;;  %7083 = vmatprep.mubr.msk.f32.mxu0 %vm1068_vm1, %v5053_v5  ;;  %v8123_v19 = vld [vmem:[#allocation2 + $0x20] sm:$0xff] }
0x1242   : > { %v2393_v42 = vpop.permute.xlu0 %2392 }
0x1243   : > { %2411 = vst.msk [vmem:[#allocation3 + $0x30] sm:$0xff] %vm2404_vm5, %v2393_v42  ;;  %v2395_v50 = vpop.permute.xlu1 %2394  ;;  %7084 = vmatmul.mubr.msk.f32.gmra.mrb[90].mxu0 %vm1068_vm1, %v5054_v11  ;;  %v8124_v42 = vld [vmem:[#allocation2 + $0x28] sm:$0xff] }
0x1244   : > { %2412 = vst.msk [vmem:[#allocation3 + $0x38] sm:$0xff] %vm2404_vm5, %v2395_v50 }
0x1246   : > { %v2844_v61 = vpop.permute.xlu0 %2843  ;;  %v5055_v46 = vld [vmem:[#allocation3 + $0x20] sm:$0xff] }
0x1247   : > { %2862 = vst.msk [vmem:[#allocation3 + $0x30] sm:$0xff] %vm2855_vm6, %v2844_v61  ;;  %v2846_v39 = vpop.permute.xlu1 %2845  ;;  %7086 = vmatprep.mubr.msk.f32.mxu0 %vm1068_vm1, %v5055_v46  ;;  %v5056_v40 = vld [vmem:[#allocation3 + $0x28] sm:$0xff] }
0x1248   : > { %2863 = vst.msk [vmem:[#allocation3 + $0x38] sm:$0xff] %vm2855_vm6, %v2846_v39  ;;  %7087 = vmatmul.mubr.msk.f32.gmra.mrb[92].mxu0 %vm1068_vm1, %v5056_v40  ;;  %v8125_v40 = vld [vmem:[#allocation2 + $0x30] sm:$0xff] }
0x124a   : > { %v3295_v10 = vpop.permute.xlu0 %3294 }
0x124b   : > { %3313 = vst.msk [vmem:[#allocation3 + $0x30] sm:$0xff] %vm3306_vm7, %v3295_v10  ;;  %v3297_v51 = vpop.permute.xlu1 %3296 }
0x124c   : > { %3314 = vst.msk [vmem:[#allocation3 + $0x38] sm:$0xff] %vm3306_vm7, %v3297_v51  ;;  %v8126_v51 = vld [vmem:[#allocation2 + $0x38] sm:$0xff] }
0x124e   : > { %v4120_v55 = vpop.permute.xlu0 %4119 }
0x124f   : > { %4143 = vst.msk [vmem:[#allocation3 + $0x40] sm:$0xff] %vm2404_vm5, %v4120_v55  ;;  %v4122_v37 = vpop.permute.xlu1 %4121 }
0x1250   : > { %4144 = vst.msk [vmem:[#allocation3 + $0x48] sm:$0xff] %vm2404_vm5, %v4122_v37 }
0x1252   : > { %v4570_v62 = vpop.permute.xlu0 %4569  ;;  %v5057_v32 = vld [vmem:[#allocation3 + $0x30] sm:$0xff] }
0x1253   : > { %4593 = vst.msk [vmem:[#allocation3 + $0x40] sm:$0xff] %vm2855_vm6, %v4570_v62  ;;  %v4572_v23 = vpop.permute.xlu1 %4571  ;;  %7089 = vmatprep.mubr.msk.f32.mxu0 %vm1068_vm1, %v5057_v32  ;;  %v5058_v8 = vld [vmem:[#allocation3 + $0x38] sm:$0xff] }
0x1254   : > { %4594 = vst.msk [vmem:[#allocation3 + $0x48] sm:$0xff] %vm2855_vm6, %v4572_v23  ;;  %7090 = vmatmul.mubr.msk.f32.gmra.mrb[94].mxu0 %vm1068_vm1, %v5058_v8 }
0x1256   : > { %v4124_v20 = vpop.permute.xlu0 %4123 }
0x1257   : > { %4145 = vst.msk [vmem:[#allocation3 + $0x50] sm:$0xff] %vm2404_vm5, %v4124_v20  ;;  %v4126_v31 = vpop.permute.xlu1 %4125 }
0x1258   : > { %4146 = vst.msk [vmem:[#allocation3 + $0x58] sm:$0xff] %vm2404_vm5, %v4126_v31 }
0x125a   : > { %v4574_v22 = vpop.permute.xlu0 %4573 }
0x125b   : > { %4595 = vst.msk [vmem:[#allocation3 + $0x50] sm:$0xff] %vm2855_vm6, %v4574_v22  ;;  %v4576_v6 = vpop.permute.xlu1 %4575 }
0x125c   : > { %4596 = vst.msk [vmem:[#allocation3 + $0x58] sm:$0xff] %vm2855_vm6, %v4576_v6 }
0x125e   : > { %v4128_v56 = vpop.permute.xlu0 %4127 }
0x125f   : > { %4147 = vst.msk [vmem:[#allocation3 + $0x60] sm:$0xff] %vm2404_vm5, %v4128_v56  ;;  %v4130_v18 = vpop.permute.xlu1 %4129 }
0x1260   : > { %4148 = vst.msk [vmem:[#allocation3 + $0x68] sm:$0xff] %vm2404_vm5, %v4130_v18 }
0x1262   : > { %v4578_v44 = vpop.permute.xlu0 %4577 }
0x1263   : > { %4597 = vst.msk [vmem:[#allocation3 + $0x60] sm:$0xff] %vm2855_vm6, %v4578_v44  ;;  %v4580_v33 = vpop.permute.xlu1 %4579 }
0x1264   : > { %4598 = vst.msk [vmem:[#allocation3 + $0x68] sm:$0xff] %vm2855_vm6, %v4580_v33 }
0x1266   : > { %v4132_v14 = vpop.permute.xlu0 %4131 }
0x1267   : > { %4149 = vst.msk [vmem:[#allocation3 + $0x70] sm:$0xff] %vm2404_vm5, %v4132_v14  ;;  %v4134_v52 = vpop.permute.xlu1 %4133 }
0x1268   : > { %4150 = vst.msk [vmem:[#allocation3 + $0x78] sm:$0xff] %vm2404_vm5, %v4134_v52 }
0x126a   : > { %v4582_v35 = vpop.permute.xlu0 %4581 }
0x126b   : > { %4599 = vst.msk [vmem:[#allocation3 + $0x70] sm:$0xff] %vm2855_vm6, %v4582_v35  ;;  %v4584_v28 = vpop.permute.xlu1 %4583 }
0x126c   : > { %4600 = vst.msk [vmem:[#allocation3 + $0x78] sm:$0xff] %vm2855_vm6, %v4584_v28 }
0x1302   : > { %v7062_v41 = vpop.f32.mrb[80].mxu0 }
0x1303   : > { %5021 = vrot.lane.b32.xlu1 %v7062_v41, %s8445_s21  ;;  %v4972_v43 = vpop.f32.mrb[81].mxu0 }
0x1304   : > { %5019 = vrot.lane.b32.xlu0 %v4972_v43, %s8445_s21 }
0x1306   : > { %v7065_v24 = vpop.f32.mrb[82].mxu0 }
0x1307   : > { %5025 = vrot.lane.b32.xlu1 %v7065_v24, %s8445_s21  ;;  %v4982_v60 = vpop.f32.mrb[83].mxu0 }
0x1308   : > { %5023 = vrot.lane.b32.xlu0 %v4982_v60, %s8445_s21 }
0x130a   : > { %v7068_v0 = vpop.f32.mrb[84].mxu0 }
0x130b   : > { %5029 = vrot.lane.b32.xlu1 %v7068_v0, %s8445_s21  ;;  %v4992_v13 = vpop.f32.mrb[85].mxu0 }
0x130c   : > { %5027 = vrot.lane.b32.xlu0 %v4992_v13, %s8445_s21 }
0x130e   : > { %v7071_v63 = vpop.f32.mrb[86].mxu0 }
0x130f   : > { %5033 = vrot.lane.b32.xlu1 %v7071_v63, %s8445_s21  ;;  %v5002_v27 = vpop.f32.mrb[87].mxu0 }
0x1310   : > { %5031 = vrot.lane.b32.xlu0 %v5002_v27, %s8445_s21 }
0x1312   : > { %v7082_v29 = vpop.f32.mrb[88].mxu0 }
0x1313   : > { %v5198_v1 = vadd.f32 %v7082_v29, %v10420_v17  ;;  %v5192_v54 = vpop.f32.mrb[89].mxu0 }
0x1314   : > { %v5193_v2 = vadd.f32 %v10420_v17, %v5192_v54 }
0x1315   : > { %v10426_v21 = vadd.f32 %v8120_v48, %v5198_v1 }
0x1316   : > { %v10424_v12 = vadd.f32 %v8119_v3, %v5193_v2  ;;  %v7085_v57 = vpop.f32.mrb[90].mxu0 }
0x1317   : > { %v5208_v49 = vadd.f32 %v7085_v57, %v10420_v17  ;;  %v5202_v30 = vpop.f32.mrb[91].mxu0 }
0x1318   : > { %v5203_v59 = vadd.f32 %v10420_v17, %v5202_v30  ;;  %7112 = vmatprep.mubr.msk.f32.mxu1 %vm1068_vm1, %v10424_v12 }
0x1319   : > { %7113 = vmatmul.mubr.msk.f32.vlgmr.msra.gmra.mrb[88].mxu1 %vm1068_vm1, %v10426_v21  ;;  %v5274_v34 = vadd.f32 %v8122_v36, %v5208_v49 }
0x131a   : > { %v10434_v38 = vadd.f32 %v8121_v4, %v5203_v59 }
0x131b   : > { %v7088_v9 = vpop.f32.mrb[92].mxu0 }
0x131c   : > { %v5218_v26 = vadd.f32 %v7088_v9, %v10420_v17  ;;  %v5212_v58 = vpop.f32.mrb[93].mxu0  ;;  %7115 = vmatprep.mubr.msk.f32.mxu1 %vm1068_vm1, %v10434_v38  ;;  %v8130_v9 = vld [vmem:[#allocation2 + $0x58] sm:$0xff] }
0x131d   : > { %v5213_v53 = vadd.f32 %v10420_v17, %v5212_v58  ;;  %7116 = vmatmul.mubr.msk.f32.gmra.mrb[90].mxu1 %vm1068_vm1, %v5274_v34 }
0x131e   : > { %v5276_v11 = vadd.f32 %v8124_v42, %v5218_v26 }
0x131f   : > { %v5275_v5 = vadd.f32 %v8123_v19, %v5213_v53 }
0x1321   : > { %7118 = vmatprep.mubr.msk.f32.mxu1 %vm1068_vm1, %v5275_v5 }
0x1322   : > { %7119 = vmatmul.mubr.msk.f32.gmra.mrb[92].mxu1 %vm1068_vm1, %v5276_v11 }
0x1327   : > { %v7091_v50 = vpop.f32.mrb[94].mxu0 }
0x1328   : > { %v5228_v61 = vadd.f32 %v7091_v50, %v10420_v17  ;;  %v5222_v46 = vpop.f32.mrb[95].mxu0  ;;  %v8132_v50 = vld [vmem:[#allocation2 + $0x68] sm:$0xff] }
0x1329   : > { %v5223_v39 = vadd.f32 %v10420_v17, %v5222_v46 }
0x132a   : > { %v5278_v55 = vadd.f32 %v8126_v51, %v5228_v61 }
0x132b   : > { %v5277_v10 = vadd.f32 %v8125_v40, %v5223_v39 }
0x132d   : > { %7121 = vmatprep.mubr.msk.f32.mxu1 %vm1068_vm1, %v5277_v10 }
0x132e   : > { %7122 = vmatmul.mubr.msk.f32.gmra.mrb[94].mxu1 %vm1068_vm1, %v5278_v55 }
0x1375   : > { %v5022_v37 = vpop.permute.xlu1 %5021 }
0x1376   : > { %5044 = vst.msk [vmem:[#allocation3 + $0x48] sm:$0xff] %vm3306_vm7, %v5022_v37  ;;  %v5020_v62 = vpop.permute.xlu0 %5019 }
0x1377   : > { %5043 = vst.msk [vmem:[#allocation3 + $0x40] sm:$0xff] %vm3306_vm7, %v5020_v62 }
0x1379   : > { %v5026_v32 = vpop.permute.xlu1 %5025 }
0x137a   : > { %5046 = vst.msk [vmem:[#allocation3 + $0x58] sm:$0xff] %vm3306_vm7, %v5026_v32  ;;  %v5024_v23 = vpop.permute.xlu0 %5023 }
0x137b   : > { %5045 = vst.msk [vmem:[#allocation3 + $0x50] sm:$0xff] %vm3306_vm7, %v5024_v23 }
0x137d   : > { %v5030_v8 = vpop.permute.xlu1 %5029  ;;  %v5060_v22 = vld [vmem:[#allocation3 + $0x48] sm:$0xff] }
0x137e   : > { %5048 = vst.msk [vmem:[#allocation3 + $0x68] sm:$0xff] %vm3306_vm7, %v5030_v8  ;;  %v5028_v20 = vpop.permute.xlu0 %5027  ;;  %v5059_v31 = vld [vmem:[#allocation3 + $0x40] sm:$0xff] }
0x137f   : > { %5047 = vst.msk [vmem:[#allocation3 + $0x60] sm:$0xff] %vm3306_vm7, %v5028_v20  ;;  %7092 = vmatprep.mubr.msk.f32.mxu0 %vm1068_vm1, %v5059_v31 }
0x1380   : > { %7093 = vmatmul.mubr.msk.f32.gmra.mrb[96].mxu0 %vm1068_vm1, %v5060_v22 }
0x1381   : > { %v5034_v6 = vpop.permute.xlu1 %5033  ;;  %v5062_v44 = vld [vmem:[#allocation3 + $0x58] sm:$0xff] }
0x1382   : > { %5050 = vst.msk [vmem:[#allocation3 + $0x78] sm:$0xff] %vm3306_vm7, %v5034_v6  ;;  %v5032_v56 = vpop.permute.xlu0 %5031  ;;  %v5061_v18 = vld [vmem:[#allocation3 + $0x50] sm:$0xff] }
0x1383   : > { %5049 = vst.msk [vmem:[#allocation3 + $0x70] sm:$0xff] %vm3306_vm7, %v5032_v56  ;;  %7095 = vmatprep.mubr.msk.f32.mxu0 %vm1068_vm1, %v5061_v18 }
0x1384   : > { %7096 = vmatmul.mubr.msk.f32.gmra.mrb[98].mxu0 %vm1068_vm1, %v5062_v44 }
0x1385   : > { %v5064_v14 = vld [vmem:[#allocation3 + $0x68] sm:$0xff] }
0x1386   : > { %v5063_v33 = vld [vmem:[#allocation3 + $0x60] sm:$0xff] }
0x1387   : > { %7098 = vmatprep.mubr.msk.f32.mxu0 %vm1068_vm1, %v5063_v33 }
0x1388   : > { %7099 = vmatmul.mubr.msk.f32.gmra.mrb[100].mxu0 %vm1068_vm1, %v5064_v14 }
0x1389   : > { %v5066_v35 = vld [vmem:[#allocation3 + $0x78] sm:$0xff] }
0x138a   : > { %v5065_v52 = vld [vmem:[#allocation3 + $0x70] sm:$0xff] }
0x138b   : > { %7101 = vmatprep.mubr.msk.f32.mxu0 %vm1068_vm1, %v5065_v52 }
0x138c   : > { %7102 = vmatmul.mubr.msk.f32.gmra.mrb[102].mxu0 %vm1068_vm1, %v5066_v35 }
0x13ec   : > { %v7114_v28 = vpop.f32.mrb[88].mxu1 }
0x13ed   : > { %v10464_v25 = vadd.f32 %v7114_v28, %v10426_v21  ;;  %v5405_v7 = vpop.f32.mrb[89].mxu1  ;;  %v8128_v21 = vld [vmem:[#allocation2 + $0x48] sm:$0xff] }
0x13ee   : > { %v10467_v47 = vadd.f32 %v5405_v7, %v10424_v12  ;;  %v8127_v12 = vld [vmem:[#allocation2 + $0x40] sm:$0xff] }
0x13ef   : > { %5485 = vst.msk [vmem:[#allocation2 + $0x8] sm:$0xff] %vm1068_vm1, %v10464_v25 }
0x13f0   : > { %5484 = vst.msk [vmem:[#allocation2] sm:$0xff] %vm1068_vm1, %v10467_v47  ;;  %v7117_v15 = vpop.f32.mrb[90].mxu1  ;;  %5504 = vxpose.xlu0.b32.start [1/8] (short) (narrow) (!%p6110_p11), %v10467_v47, 32 }
0x13f1   : > { %v10473_v16 = vadd.f32 %v7117_v15, %v5274_v34  ;;  %v5415_v45 = vpop.f32.mrb[91].mxu1 }
0x13f2   : > { %v10476_v41 = vadd.f32 %v5415_v45, %v10434_v38  ;;  %v8129_v38 = vld [vmem:[#allocation2 + $0x50] sm:$0xff] }
0x13f3   : > { %5487 = vst.msk [vmem:[#allocation2 + $0x18] sm:$0xff] %vm1068_vm1, %v10473_v16 }
0x13f4   : > { %5486 = vst.msk [vmem:[#allocation2 + $0x10] sm:$0xff] %vm1068_vm1, %v10476_v41  ;;  %5505 = vxpose.xlu0.b32.cont [2/8] (short) (narrow) (!%p6110_p11), %v10464_v25, 32 }
0x13f5   : > { %v7120_v43 = vpop.f32.mrb[92].mxu1 }
0x13f6   : > { %v10482_v24 = vadd.f32 %v7120_v43, %v5276_v11  ;;  %v5425_v60 = vpop.f32.mrb[93].mxu1 }
0x13f7   : > { %v10484_v0 = vadd.f32 %v5425_v60, %v5275_v5  ;;  %v8131_v5 = vld [vmem:[#allocation2 + $0x60] sm:$0xff] }
0x13f8   : > { %5489 = vst.msk [vmem:[#allocation2 + $0x28] sm:$0xff] %vm1068_vm1, %v10482_v24  ;;  %5506 = vxpose.xlu0.b32.cont [3/8] (short) (narrow) (!%p6110_p11), %v10476_v41, 32 }
0x13f9   : > { %5488 = vst.msk [vmem:[#allocation2 + $0x20] sm:$0xff] %vm1068_vm1, %v10484_v0 }
0x13fc   : > { %5507 = vxpose.xlu0.b32.cont [4/8] (short) (narrow) (!%p6110_p11), %v10473_v16, 32 }
0x1400   : > { %5508 = vxpose.xlu0.b32.cont [5/8] (short) (narrow) (!%p6110_p11), %v10484_v0, 32 }
0x1401   : > { %v7123_v13 = vpop.f32.mrb[94].mxu1 }
0x1402   : > { %v10490_v63 = vadd.f32 %v7123_v13, %v5278_v55  ;;  %v5435_v27 = vpop.f32.mrb[95].mxu1  ;;  %v8134_v55 = vld [vmem:[#allocation2 + $0x78] sm:$0xff] }
0x1403   : > { %v10492_v29 = vadd.f32 %v5435_v27, %v5277_v10  ;;  %v8133_v10 = vld [vmem:[#allocation2 + $0x70] sm:$0xff] }
0x1404   : > { %5491 = vst.msk [vmem:[#allocation2 + $0x38] sm:$0xff] %vm1068_vm1, %v10490_v63  ;;  %5509 = vxpose.xlu0.b32.cont [6/8] (short) (narrow) (!%p6110_p11), %v10482_v24, 32 }
0x1405   : > { %5490 = vst.msk [vmem:[#allocation2 + $0x30] sm:$0xff] %vm1068_vm1, %v10492_v29 }
0x1408   : > { %5510 = vxpose.xlu0.b32.cont [7/8] (short) (narrow) (!%p6110_p11), %v10492_v29, 32 }
0x140c   : > { %5511 = vxpose.xlu0.b32.end [8/8] (short) (narrow) (!%p6110_p11), %v10490_v63, 32 }
0x1453   : > { %v7094_v1 = vpop.f32.mrb[96].mxu0 }
0x1454   : > { %v5238_v54 = vadd.f32 %v7094_v1, %v10420_v17  ;;  %v5232_v2 = vpop.f32.mrb[97].mxu0 }
0x1455   : > { %v5233_v3 = vadd.f32 %v10420_v17, %v5232_v2 }
0x1456   : > { %v5280_v49 = vadd.f32 %v8128_v21, %v5238_v54 }
0x1457   : > { %v5279_v57 = vadd.f32 %v8127_v12, %v5233_v3  ;;  %v7097_v48 = vpop.f32.mrb[98].mxu0 }
0x1458   : > { %v5248_v30 = vadd.f32 %v7097_v48, %v10420_v17  ;;  %v5242_v59 = vpop.f32.mrb[99].mxu0 }
0x1459   : > { %v5243_v4 = vadd.f32 %v10420_v17, %v5242_v59  ;;  %7124 = vmatprep.mubr.msk.f32.mxu1 %vm1068_vm1, %v5279_v57 }
0x145a   : > { %7125 = vmatmul.mubr.msk.f32.gmra.mrb[96].mxu1 %vm1068_vm1, %v5280_v49  ;;  %v5282_v26 = vadd.f32 %v8130_v9, %v5248_v30 }
0x145b   : > { %v5281_v36 = vadd.f32 %v8129_v38, %v5243_v4  ;;  %v7100_v34 = vpop.f32.mrb[100].mxu0 }
0x145c   : > { %v5258_v58 = vadd.f32 %v7100_v34, %v10420_v17  ;;  %v5252_v53 = vpop.f32.mrb[101].mxu0 }
0x145d   : > { %v5253_v19 = vadd.f32 %v10420_v17, %v5252_v53  ;;  %7127 = vmatprep.mubr.msk.f32.mxu1 %vm1068_vm1, %v5281_v36 }
0x145e   : > { %7128 = vmatmul.mubr.msk.f32.gmra.mrb[98].mxu1 %vm1068_vm1, %v5282_v26  ;;  %v5284_v61 = vadd.f32 %v8132_v50, %v5258_v58 }
0x145f   : > { %v5283_v42 = vadd.f32 %v8131_v5, %v5253_v19  ;;  %v7103_v11 = vpop.f32.mrb[102].mxu0 }
0x1460   : > { %v5268_v46 = vadd.f32 %v7103_v11, %v10420_v17  ;;  %v5262_v39 = vpop.f32.mrb[103].mxu0 }
0x1461   : > { %v5263_v40 = vadd.f32 %v10420_v17, %v5262_v39  ;;  %7130 = vmatprep.mubr.msk.f32.mxu1 %vm1068_vm1, %v5283_v42 }
0x1462   : > { %7131 = vmatmul.mubr.msk.f32.gmra.mrb[100].mxu1 %vm1068_vm1, %v5284_v61  ;;  %v5286_v37 = vadd.f32 %v8134_v55, %v5268_v46 }
0x1463   : > { %v5285_v51 = vadd.f32 %v8133_v10, %v5263_v40 }
0x1465   : > { %7133 = vmatprep.mubr.msk.f32.mxu1 %vm1068_vm1, %v5285_v51 }
0x1466   : > { %7134 = vmatmul.mubr.msk.f32.gmra.mrb[102].mxu1 %vm1068_vm1, %v5286_v37 }
0x1470   : > { %v5520_v25 = vpop.trf.xlu0 (!%p6110_p11) }
0x1471   : > { %5536 = vst.msk [vmem:[#allocation14] sm:$0xff] (!%p6110_p11), %vm1728_vm4, %v5520_v25 }
0x1474   : > { %v5521_v47 = vpop.trf.xlu0 (!%p6110_p11) }
0x1475   : > { %5537 = vst.msk [vmem:[#allocation14 + $0x8] sm:$0xff] (!%p6110_p11), %vm1728_vm4, %v5521_v47 }
0x1478   : > { %v5522_v16 = vpop.trf.xlu0 (!%p6110_p11) }
0x1479   : > { %5538 = vst.msk [vmem:[#allocation14 + $0x10] sm:$0xff] (!%p6110_p11), %vm1728_vm4, %v5522_v16 }
0x147c   : > { %v5523_v41 = vpop.trf.xlu0 (!%p6110_p11) }
0x147d   : > { %5539 = vst.msk [vmem:[#allocation14 + $0x18] sm:$0xff] (!%p6110_p11), %vm1728_vm4, %v5523_v41 }
0x152d   : > { %v7126_v62 = vpop.f32.mrb[96].mxu1 }
0x152e   : > { %v5451_v32 = vadd.f32 %v7126_v62, %v5280_v49  ;;  %v5445_v23 = vpop.f32.mrb[97].mxu1 }
0x152f   : > { %v5446_v8 = vadd.f32 %v5445_v23, %v5279_v57 }
0x1530   : > { %5493 = vst.msk [vmem:[#allocation2 + $0x48] sm:$0xff] %vm1068_vm1, %v5451_v32 }
0x1531   : > { %5492 = vst.msk [vmem:[#allocation2 + $0x40] sm:$0xff] %vm1068_vm1, %v5446_v8  ;;  %v7129_v17 = vpop.f32.mrb[98].mxu1  ;;  %5540 = vxpose.xlu1.b32.start [1/8] (short) (narrow) (!%p6110_p11), %v5446_v8, 32 }
0x1532   : > { %v5461_v20 = vadd.f32 %v7129_v17, %v5282_v26  ;;  %v5455_v31 = vpop.f32.mrb[99].mxu1 }
0x1533   : > { %v5456_v22 = vadd.f32 %v5455_v31, %v5281_v36 }
0x1534   : > { %5495 = vst.msk [vmem:[#allocation2 + $0x58] sm:$0xff] %vm1068_vm1, %v5461_v20 }
0x1535   : > { %5494 = vst.msk [vmem:[#allocation2 + $0x50] sm:$0xff] %vm1068_vm1, %v5456_v22  ;;  %v7132_v6 = vpop.f32.mrb[100].mxu1  ;;  %5541 = vxpose.xlu1.b32.cont [2/8] (short) (narrow) (!%p6110_p11), %v5451_v32, 32 }
0x1536   : > { %v5471_v56 = vadd.f32 %v7132_v6, %v5284_v61  ;;  %v5465_v18 = vpop.f32.mrb[101].mxu1 }
0x1537   : > { %v5466_v44 = vadd.f32 %v5465_v18, %v5283_v42  ;;  %5503 = sbr.rel (%p6110_p11) target bundleno = 5567 (0x15bf), region = 104 }
0x1538   : > { %5497 = vst.msk [vmem:[#allocation2 + $0x68] sm:$0xff] %vm1068_vm1, %v5471_v56 }
0x1539   : > { %5496 = vst.msk [vmem:[#allocation2 + $0x60] sm:$0xff] %vm1068_vm1, %v5466_v44  ;;  %v7135_v33 = vpop.f32.mrb[102].mxu1  ;;  %5542 = vxpose.xlu1.b32.cont [3/8] (short) (narrow) (!%p6110_p11), %v5456_v22, 32 }
0x153a   : > { %v5481_v14 = vadd.f32 %v7135_v33, %v5286_v37  ;;  %v5475_v52 = vpop.f32.mrb[103].mxu1 }
0x153b   : > { %v5476_v35 = vadd.f32 %v5475_v52, %v5285_v51 }
0x153c   : > { %5499 = vst.msk [vmem:[#allocation2 + $0x78] sm:$0xff] %vm1068_vm1, %v5481_v14 }
0x153d   : > { %5498 = vst.msk [vmem:[#allocation2 + $0x70] sm:$0xff] %vm1068_vm1, %v5476_v35  ;;  %5543 = vxpose.xlu1.b32.cont [4/8] (short) (narrow) (!%p6110_p11), %v5461_v20, 32 }
0x1541   : > { %5544 = vxpose.xlu1.b32.cont [5/8] (short) (narrow) %v5466_v44, 32 }
0x1545   : > { %5545 = vxpose.xlu1.b32.cont [6/8] (short) (narrow) %v5471_v56, 32 }
0x1549   : > { %5546 = vxpose.xlu1.b32.cont [7/8] (short) (narrow) %v5476_v35, 32 }
0x154d   : > { %5547 = vxpose.xlu1.b32.end [8/8] (short) (narrow) %v5481_v14, 32 }
0x15b1   : > { %v5556_v28 = vpop.trf.xlu1 }
0x15b2   : > { %5573 = vst.msk [vmem:[#allocation14 + $0x20] sm:$0xff] %vm1728_vm4, %v5556_v28 }
0x15b5   : > { %v5557_v7 = vpop.trf.xlu1 }
0x15b6   : > { %5574 = vst.msk [vmem:[#allocation14 + $0x28] sm:$0xff] %vm1728_vm4, %v5557_v7 }
0x15b9   : > { %v5558_v15 = vpop.trf.xlu1 }
0x15ba   : > { %5575 = vst.msk [vmem:[#allocation14 + $0x30] sm:$0xff] %vm1728_vm4, %v5558_v15 }
0x15bd   : > { %v5559_v45 = vpop.trf.xlu1 }
0x15be   : > { %5576 = vst.msk [vmem:[#allocation14 + $0x38] sm:$0xff] %vm1728_vm4, %v5559_v45 }
0x15bf PF: > { %p7558_p4 = scmp.eq.s32.totalorder %s8542_s27, 1  ;;  %s8446_s24 = smov [#allocation14]  }
0x15c0   : > { %s5587_s12 = sshll.u32 %s8446_s24, 4  ;;  %s5588_s12 = int_to_ptr.vmem [resolvable:$true] %s5587_s12 }
0x15c1   : > { %s8341_s18 = scalar_lea.vmem %s5588_s12, 1024  ;;  %p8348_p9 = scmp.lt.s32.totalorder %s5588_s12, %s5588_s12 }
0x15c2   : > { %p8342_p12 = scmp.ne.s32.totalorder %s5588_s12, %s8341_s18  ;;  %p8349_p13 = scmp.lt.s32.totalorder %s8341_s18, %s8341_s18 }
0x15c4   : > { %p8343_p7 = pnand %p8342_p12, %p7558_p4  ;;  %p8350_p10 = por %p8349_p13, %p8348_p9 }
0x15c6   : > { %p8344_p2 = pneg %p8343_p7 }
0x15c8   : > { %p8351_p6 = pnand %p8350_p10, %p8344_p2 }
0x15ca   : > { %8354 = shalt.err (!%p8351_p6)
}
0x15cb   : > { %s10736_s6 = sld [smem:[#allocation53_spill]] }
0x15d1   : > { %s8355_s2 = scalar_lea.hbm %s10736_s6, 1024 }
0x15d2   : > { %p8356_p0 = scmp.ne.s32.totalorder %s10736_s6, %s8355_s2  ;;  %p8361_p1 = scmp.lt.u32.totalorder %s8355_s2, %s10736_s6 }
0x15d4   : > { %p8357_p8 = pnand %p8356_p0, %p7558_p4 }
0x15d6   : > { %p8358_p3 = pneg %p8357_p8 }
0x15d8   : > { %p8363_p5 = pnand %p8361_p1, %p8358_p3 }
0x15da   : > { %8366 = shalt.err (!%p8363_p5)
}
0x15db   : > { %s8447_s0 = smov 128  }
0x15dc   : > { %7527 = dma.vmem_to_hbm [thread:$0]  (%p7558_p4), %s5588_s12, 1024, %s10736_s6, [#allocation6], %s8447_s0, %s8447_s0, %s8443_s7  }
0x15dd   : > { %8404 = dma.done.wait (%p7558_p4), [#allocation6], 1024  }
0x15de   : > { %8406 = vsyncadd (%p7558_p4), [#allocation6], 4294966272 }
0x15df PF: > { %s25_s26 = sadd.s32 1, %s8429_s26   ;;  %s10737_s24 = sld [smem:[#allocation19_spill]] }
0x15e0   : > { %p22_p11 = scmp.ge.s32.totalorder %s25_s26, 4   ;;  %s10738_s25 = sld [smem:[#allocation20_spill]] }
0x15e1   : > { %s10739_s21 = smov %s8413_s22  ;;  %s10740_s22 = smov %s8417_s23 }
0x15e2   : > { %s10741_s23 = smov %s8622_s20  ;;  %24 = sbr.rel (!%p22_p11) target bundleno = 16 (0x10), region = 180 }
0x15e9   :  { %5603 = vsyncpa [#allocation5], 1 }
0x15ea   :  { %5605 = vsyncpa [#allocation5 + $0x1], 1 }
0x15eb   :  { %5606 = vsyncpa [#allocation8], 1 }
0x15ec   :  { %5607 = vsyncpa [#allocation6], 1 }
0x15ed   :  { %5609 = vsyncpa [#allocation6 + $0x1], 1 }

</bundles_post_ra>
